<compile_context>
chip_gen: v6e
topology: v6e:2x2x1
jax: 0.10.0
libtpu: 0.0.40
codegen_flags: <defaults>
</compile_context>

<pallas_src>
import jax
import jax.numpy as jnp
from jax.experimental import pallas as pl
from jax.experimental.pallas import tpu as pltpu


def _round_up(n, m):
    return ((n + m - 1) // m) * m


# ----------------------------- Pallas kernels -----------------------------

def conv_bn_relu_kernel(p_ref, w_ref, bss_ref, o_ref):
    # p_ref:   (Cin*9, B*H*W)  im2col patches for the WHOLE fused batch
    # w_ref:   (Cout, Cin*9)
    # bss_ref: (Cout, 3)       columns = [conv bias, BN scale, BN shift]
    # o_ref:   (Cout, B*H*W)
    acc = jnp.dot(w_ref[...], p_ref[...],
                  preferred_element_type=jnp.float32)        # Conv2d
    bias = bss_ref[:, 0:1]
    scale = bss_ref[:, 1:2]
    shift = bss_ref[:, 2:3]
    y = jnp.maximum(acc + bias, 0.0)                         # + bias, ReLU
    y = y * scale + shift                                    # BatchNorm2d (eval)
    # Dropout2d(p=0.2) is identity in eval mode.
    o_ref[...] = y.astype(o_ref.dtype)


def fc_kernel(x_ref, w1_ref, b1_ref, w2_ref, b2_ref, w3_ref, b3_ref, o_ref):
    # x_ref: (B, 2048); w1: (2048, 512); w2: (512, 512); w3: (512, 128)
    # b*: (1, out); o_ref: (B, 128)  -- all dims lane-dense (zero-padded).
    h = jnp.dot(x_ref[...], w1_ref[...],
                preferred_element_type=jnp.float32) + b1_ref[...]
    h = jnp.maximum(h, 0.0)
    h = jnp.dot(h, w2_ref[...],
                preferred_element_type=jnp.float32) + b2_ref[...]
    h = jnp.maximum(h, 0.0)
    y = jnp.dot(h, w3_ref[...],
                preferred_element_type=jnp.float32) + b3_ref[...]
    o_ref[...] = y.astype(o_ref.dtype)


_VSPEC = pl.BlockSpec(memory_space=pltpu.MemorySpace.VMEM)


# ------------------------------ layer wrappers -----------------------------

def conv_bn_relu(x_nchw, w, b, gamma, beta, rmean, rvar, eps=1e-5):
    """ReflectionPad2d(1) -> Conv2d(k=3) -> ReLU -> BatchNorm2d(eval) -> Dropout2d(eval=id).

    Processes the whole (fused-branch) batch in a single gridless matmul with
    the batch folded into the lane dimension.
    """
    B, Cin, H, W = x_nchw.shape
    Cout = w.shape[0]

    # ReflectionPad2d(1)  (glue)
    xp = jnp.pad(x_nchw, ((0, 0), (0, 0), (1, 1), (1, 1)), mode="reflect")

    # im2col (glue): sublane flatten order (Cin, kh, kw) matches
    # w.reshape(Cout, Cin*9); lane flatten order is (B, H, W).
    patches = jnp.stack(
        [xp[:, :, kh:kh + H, kw:kw + W] for kh in range(3) for kw in range(3)],
        axis=2,
    )                                               # (B, Cin, 9, H, W)
    patches = patches.transpose(1, 2, 0, 3, 4).reshape(Cin * 9, B * H * W)
    w_flat = w.reshape(Cout, Cin * 9)

    # eval-mode BN folded to scale/shift; merged params -> single tiny DMA.
    scale = gamma / jnp.sqrt(rvar + eps)
    shift = beta - rmean * scale
    bss = jnp.stack([b, scale, shift], axis=1)      # (Cout, 3)

    out = pl.pallas_call(
        conv_bn_relu_kernel,
        out_shape=jax.ShapeDtypeStruct((Cout, B * H * W), jnp.float32),
        in_specs=[_VSPEC, _VSPEC, _VSPEC],
        out_specs=_VSPEC,
    )(patches, w_flat, bss)

    # (Cout, B*H*W) -> (B, Cout, H, W)   (glue)
    return out.reshape(Cout, B, H, W).transpose(1, 0, 2, 3)


def fc_forward(x, fc_params):
    """Linear(500) -> ReLU -> Linear(500) -> ReLU -> Linear(5), fused.

    Hidden / output widths are zero-padded to multiples of 128 so all
    loads/stores are lane-dense; padding is exact through ReLU and zero
    weights, and the true 5 outputs are sliced off in the wrapper.
    """
    w1, b1, w2, b2, w3, b3 = fc_params
    hid = _round_up(w1.shape[1], 128)     # 500 -> 512
    out_d = _round_up(w3.shape[1], 128)   # 5   -> 128

    w1p = jnp.pad(w1, ((0, 0), (0, hid - w1.shape[1])))
    b1p = jnp.pad(b1, (0, hid - b1.shape[0])).reshape(1, hid)
    w2p = jnp.pad(w2, ((0, hid - w2.shape[0]), (0, hid - w2.shape[1])))
    b2p = jnp.pad(b2, (0, hid - b2.shape[0])).reshape(1, hid)
    w3p = jnp.pad(w3, ((0, hid - w3.shape[0]), (0, out_d - w3.shape[1])))
    b3p = jnp.pad(b3, (0, out_d - b3.shape[0])).reshape(1, out_d)

    B = x.shape[0]
    y = pl.pallas_call(
        fc_kernel,
        out_shape=jax.ShapeDtypeStruct((B, out_d), jnp.float32),
        in_specs=[_VSPEC] * 7,
        out_specs=_VSPEC,
        compiler_params=pltpu.CompilerParams(
            vmem_limit_bytes=32 * 1024 * 1024),
    )(x, w1p, b1p, w2p, b2p, w3p, b3p)

    return y[:, :w3.shape[1]]             # (B, 5)


# ------------------------------ model ------------------------------

def forward_once(x, params):
    out = x
    for (w, b, gamma, beta, rmean, rvar) in params["conv"]:
        out = conv_bn_relu(out, w, b, gamma, beta, rmean, rvar)
    out = out.reshape(out.shape[0], -1)   # view(B, -1): flatten (C, H, W)
    return fc_forward(out, params["fc"])


def siamese_forward(input1, input2, params):
    # Fuse the two Siamese branches: one pass over the stack, weights DMA'd once.
    n = input1.shape[0]
    x = jnp.concatenate([input1, input2], axis=0)   # (2N, C, H, W)
    out = forward_once(x, params)                   # (2N, 5)
    return out[:n], out[n:]


def init_params(key, H, W):
    ks = jax.random.split(key, 12)

    def conv_block(kw, kb, cout, cin):
        w = 0.05 * jax.random.normal(kw, (cout, cin, 3, 3), jnp.float32)
        b = 0.05 * jax.random.normal(kb, (cout,), jnp.float32)
        gamma = jnp.ones((cout,), jnp.float32)       # BatchNorm2d defaults
        beta = jnp.zeros((cout,), jnp.float32)
        rmean = jnp.zeros((cout,), jnp.float32)
        rvar = jnp.ones((cout,), jnp.float32)
        return (w, b, gamma, beta, rmean, rvar)

    conv = [
        conv_block(ks[0], ks[1], 4, 1),
        conv_block(ks[2], ks[3], 8, 4),
        conv_block(ks[4], ks[5], 8, 8),
    ]

    fc_in = 8 * H * W
    w1 = 0.02 * jax.random.normal(ks[6], (fc_in, 500), jnp.float32)
    b1 = 0.02 * jax.random.normal(ks[7], (500,), jnp.float32)
    w2 = 0.02 * jax.random.normal(ks[8], (500, 500), jnp.float32)
    b2 = 0.02 * jax.random.normal(ks[9], (500,), jnp.float32)
    w3 = 0.02 * jax.random.normal(ks[10], (500, 5), jnp.float32)
    b3 = 0.02 * jax.random.normal(ks[11], (5,), jnp.float32)

    return {"conv": conv, "fc": (w1, b1, w2, b2, w3, b3)}


if __name__ == "__main__":
    N, C, H, W = 2, 1, 16, 16
    key = jax.random.PRNGKey(0)
    k_in1, k_in2, k_params = jax.random.split(key, 3)

    input1 = jax.random.normal(k_in1, (N, C, H, W), jnp.float32)
    input2 = jax.random.normal(k_in2, (N, C, H, W), jnp.float32)
    params = init_params(k_params, H, W)

    fwd = jax.jit(lambda a, b: siamese_forward(a, b, params))
    out1, out2 = fwd(input1, input2)
    jax.block_until_ready((out1, out2))

    assert out1.shape == (N, 5) and out2.shape == (N, 5)
    assert out1.dtype == jnp.float32 and out2.dtype == jnp.float32
    print("KERNEL_OK")
</pallas_src>

<mosaic_0001>
module attributes {stable_mosaic.version = 11 : i64} {
  func.func @conv_bn_relu_kernel(%arg0: memref<9x1024xf32, #tpu.memory_space<vmem>>, %arg1: memref<4x9xf32, #tpu.memory_space<vmem>>, %arg2: memref<4x3xf32, #tpu.memory_space<vmem>>, %arg3: memref<4x1024xf32, #tpu.memory_space<vmem>>) attributes {dimension_semantics = [], scalar_prefetch = 0 : i64, scratch_operands = 0 : i64, tpu.core_type = #tpu.core_type<tc>} {
    %c0 = arith.constant 0 : index
    %c0_0 = arith.constant 0 : index
    %0 = vector.load %arg1[%c0, %c0_0] : memref<4x9xf32, #tpu.memory_space<vmem>>, vector<4x9xf32>
    %c0_1 = arith.constant 0 : index
    %c0_2 = arith.constant 0 : index
    %1 = vector.load %arg0[%c0_1, %c0_2] : memref<9x1024xf32, #tpu.memory_space<vmem>>, vector<9x1024xf32>
    %cst = arith.constant dense<0.000000e+00> : vector<4x1024xf32>
    %2 = tpu.matmul %0, %1, %cst {dimension_numbers = #tpu.dot_dimension_numbers<[1], [0], [0], [1], [0, 0, 1, 1], [], []>} : vector<4x9xf32>, vector<9x1024xf32>, vector<4x1024xf32> -> vector<4x1024xf32>
    %c0_3 = arith.constant 0 : index
    %c0_4 = arith.constant 0 : index
    %3 = vector.load %arg2[%c0_3, %c0_4] : memref<4x3xf32, #tpu.memory_space<vmem>>, vector<4x1xf32>
    %c0_5 = arith.constant 0 : index
    %c1 = arith.constant 1 : index
    %4 = vector.load %arg2[%c0_5, %c1] : memref<4x3xf32, #tpu.memory_space<vmem>>, vector<4x1xf32>
    %c0_6 = arith.constant 0 : index
    %c2 = arith.constant 2 : index
    %5 = vector.load %arg2[%c0_6, %c2] : memref<4x3xf32, #tpu.memory_space<vmem>>, vector<4x1xf32>
    %6 = vector.broadcast %3 : vector<4x1xf32> to vector<4x1024xf32>
    %7 = arith.addf %2, %6 : vector<4x1024xf32>
    %cst_7 = arith.constant 0.000000e+00 : f32
    %8 = vector.broadcast %cst_7 : f32 to vector<4x1024xf32>
    %9 = arith.maximumf %7, %8 : vector<4x1024xf32>
    %10 = vector.broadcast %4 : vector<4x1xf32> to vector<4x1024xf32>
    %11 = arith.mulf %9, %10 : vector<4x1024xf32>
    %12 = vector.broadcast %5 : vector<4x1xf32> to vector<4x1024xf32>
    %13 = arith.addf %11, %12 : vector<4x1024xf32>
    %c0_8 = arith.constant 0 : index
    %c0_9 = arith.constant 0 : index
    %14 = vector.load %arg3[%c0_8, %c0_9] : memref<4x1024xf32, #tpu.memory_space<vmem>>, vector<4x1024xf32>
    tpu.vector_store %arg3[%c0_8, %c0_9], %13 {strides = array<i32>} : memref<4x1024xf32, #tpu.memory_space<vmem>>, vector<4x1024xf32>,
    return
  }
}

module attributes {stable_mosaic.version = 11 : i64} {
  func.func @conv_bn_relu_kernel(%arg0: memref<36x1024xf32, #tpu.memory_space<vmem>>, %arg1: memref<8x36xf32, #tpu.memory_space<vmem>>, %arg2: memref<8x3xf32, #tpu.memory_space<vmem>>, %arg3: memref<8x1024xf32, #tpu.memory_space<vmem>>) attributes {dimension_semantics = [], scalar_prefetch = 0 : i64, scratch_operands = 0 : i64, tpu.core_type = #tpu.core_type<tc>} {
    %c0 = arith.constant 0 : index
    %c0_0 = arith.constant 0 : index
    %0 = vector.load %arg1[%c0, %c0_0] : memref<8x36xf32, #tpu.memory_space<vmem>>, vector<8x36xf32>
    %c0_1 = arith.constant 0 : index
    %c0_2 = arith.constant 0 : index
    %1 = vector.load %arg0[%c0_1, %c0_2] : memref<36x1024xf32, #tpu.memory_space<vmem>>, vector<36x1024xf32>
    %cst = arith.constant dense<0.000000e+00> : vector<8x1024xf32>
    %2 = tpu.matmul %0, %1, %cst {dimension_numbers = #tpu.dot_dimension_numbers<[1], [0], [0], [1], [0, 0, 1, 1], [], []>} : vector<8x36xf32>, vector<36x1024xf32>, vector<8x1024xf32> -> vector<8x1024xf32>
    %c0_3 = arith.constant 0 : index
    %c0_4 = arith.constant 0 : index
    %3 = vector.load %arg2[%c0_3, %c0_4] : memref<8x3xf32, #tpu.memory_space<vmem>>, vector<8x1xf32>
    %c0_5 = arith.constant 0 : index
    %c1 = arith.constant 1 : index
    %4 = vector.load %arg2[%c0_5, %c1] : memref<8x3xf32, #tpu.memory_space<vmem>>, vector<8x1xf32>
    %c0_6 = arith.constant 0 : index
    %c2 = arith.constant 2 : index
    %5 = vector.load %arg2[%c0_6, %c2] : memref<8x3xf32, #tpu.memory_space<vmem>>, vector<8x1xf32>
    %6 = vector.broadcast %3 : vector<8x1xf32> to vector<8x1024xf32>
    %7 = arith.addf %2, %6 : vector<8x1024xf32>
    %cst_7 = arith.constant 0.000000e+00 : f32
    %8 = vector.broadcast %cst_7 : f32 to vector<8x1024xf32>
    %9 = arith.maximumf %7, %8 : vector<8x1024xf32>
    %10 = vector.broadcast %4 : vector<8x1xf32> to vector<8x1024xf32>
    %11 = arith.mulf %9, %10 : vector<8x1024xf32>
    %12 = vector.broadcast %5 : vector<8x1xf32> to vector<8x1024xf32>
    %13 = arith.addf %11, %12 : vector<8x1024xf32>
    %c0_8 = arith.constant 0 : index
    %c0_9 = arith.constant 0 : index
    %14 = vector.load %arg3[%c0_8, %c0_9] : memref<8x1024xf32, #tpu.memory_space<vmem>>, vector<8x1024xf32>
    tpu.vector_store %arg3[%c0_8, %c0_9], %13 {strides = array<i32>} : memref<8x1024xf32, #tpu.memory_space<vmem>>, vector<8x1024xf32>,
    return
  }
}

module attributes {stable_mosaic.version = 11 : i64} {
  func.func @conv_bn_relu_kernel(%arg0: memref<72x1024xf32, #tpu.memory_space<vmem>>, %arg1: memref<8x72xf32, #tpu.memory_space<vmem>>, %arg2: memref<8x3xf32, #tpu.memory_space<vmem>>, %arg3: memref<8x1024xf32, #tpu.memory_space<vmem>>) attributes {dimension_semantics = [], scalar_prefetch = 0 : i64, scratch_operands = 0 : i64, tpu.core_type = #tpu.core_type<tc>} {
    %c0 = arith.constant 0 : index
    %c0_0 = arith.constant 0 : index
    %0 = vector.load %arg1[%c0, %c0_0] : memref<8x72xf32, #tpu.memory_space<vmem>>, vector<8x72xf32>
    %c0_1 = arith.constant 0 : index
    %c0_2 = arith.constant 0 : index
    %1 = vector.load %arg0[%c0_1, %c0_2] : memref<72x1024xf32, #tpu.memory_space<vmem>>, vector<72x1024xf32>
    %cst = arith.constant dense<0.000000e+00> : vector<8x1024xf32>
    %2 = tpu.matmul %0, %1, %cst {dimension_numbers = #tpu.dot_dimension_numbers<[1], [0], [0], [1], [0, 0, 1, 1], [], []>} : vector<8x72xf32>, vector<72x1024xf32>, vector<8x1024xf32> -> vector<8x1024xf32>
    %c0_3 = arith.constant 0 : index
    %c0_4 = arith.constant 0 : index
    %3 = vector.load %arg2[%c0_3, %c0_4] : memref<8x3xf32, #tpu.memory_space<vmem>>, vector<8x1xf32>
    %c0_5 = arith.constant 0 : index
    %c1 = arith.constant 1 : index
    %4 = vector.load %arg2[%c0_5, %c1] : memref<8x3xf32, #tpu.memory_space<vmem>>, vector<8x1xf32>
    %c0_6 = arith.constant 0 : index
    %c2 = arith.constant 2 : index
    %5 = vector.load %arg2[%c0_6, %c2] : memref<8x3xf32, #tpu.memory_space<vmem>>, vector<8x1xf32>
    %6 = vector.broadcast %3 : vector<8x1xf32> to vector<8x1024xf32>
    %7 = arith.addf %2, %6 : vector<8x1024xf32>
    %cst_7 = arith.constant 0.000000e+00 : f32
    %8 = vector.broadcast %cst_7 : f32 to vector<8x1024xf32>
    %9 = arith.maximumf %7, %8 : vector<8x1024xf32>
    %10 = vector.broadcast %4 : vector<8x1xf32> to vector<8x1024xf32>
    %11 = arith.mulf %9, %10 : vector<8x1024xf32>
    %12 = vector.broadcast %5 : vector<8x1xf32> to vector<8x1024xf32>
    %13 = arith.addf %11, %12 : vector<8x1024xf32>
    %c0_8 = arith.constant 0 : index
    %c0_9 = arith.constant 0 : index
    %14 = vector.load %arg3[%c0_8, %c0_9] : memref<8x1024xf32, #tpu.memory_space<vmem>>, vector<8x1024xf32>
    tpu.vector_store %arg3[%c0_8, %c0_9], %13 {strides = array<i32>} : memref<8x1024xf32, #tpu.memory_space<vmem>>, vector<8x1024xf32>,
    return
  }
}

module attributes {stable_mosaic.version = 11 : i64} {
  func.func @fc_kernel(%arg0: memref<4x2048xf32, #tpu.memory_space<vmem>>, %arg1: memref<2048x512xf32, #tpu.memory_space<vmem>>, %arg2: memref<1x512xf32, #tpu.memory_space<vmem>>, %arg3: memref<512x512xf32, #tpu.memory_space<vmem>>, %arg4: memref<1x512xf32, #tpu.memory_space<vmem>>, %arg5: memref<512x128xf32, #tpu.memory_space<vmem>>, %arg6: memref<1x128xf32, #tpu.memory_space<vmem>>, %arg7: memref<4x128xf32, #tpu.memory_space<vmem>>) attributes {dimension_semantics = [], scalar_prefetch = 0 : i64, scratch_operands = 0 : i64, tpu.core_type = #tpu.core_type<tc>} {
    %c0 = arith.constant 0 : index
    %c0_0 = arith.constant 0 : index
    %0 = vector.load %arg0[%c0, %c0_0] : memref<4x2048xf32, #tpu.memory_space<vmem>>, vector<4x2048xf32>
    %c0_1 = arith.constant 0 : index
    %c0_2 = arith.constant 0 : index
    %1 = vector.load %arg1[%c0_1, %c0_2] : memref<2048x512xf32, #tpu.memory_space<vmem>>, vector<2048x512xf32>
    %cst = arith.constant dense<0.000000e+00> : vector<4x512xf32>
    %2 = tpu.matmul %0, %1, %cst {dimension_numbers = #tpu.dot_dimension_numbers<[1], [0], [0], [1], [0, 0, 1, 1], [], []>} : vector<4x2048xf32>, vector<2048x512xf32>, vector<4x512xf32> -> vector<4x512xf32>
    %c0_3 = arith.constant 0 : index
    %c0_4 = arith.constant 0 : index
    %3 = vector.load %arg2[%c0_3, %c0_4] : memref<1x512xf32, #tpu.memory_space<vmem>>, vector<1x512xf32>
    %4 = vector.broadcast %3 : vector<1x512xf32> to vector<4x512xf32>
    %5 = arith.addf %2, %4 : vector<4x512xf32>
    %cst_5 = arith.constant 0.000000e+00 : f32
    %6 = vector.broadcast %cst_5 : f32 to vector<4x512xf32>
    %7 = arith.maximumf %5, %6 : vector<4x512xf32>
    %c0_6 = arith.constant 0 : index
    %c0_7 = arith.constant 0 : index
    %8 = vector.load %arg3[%c0_6, %c0_7] : memref<512x512xf32, #tpu.memory_space<vmem>>, vector<512x512xf32>
    %cst_8 = arith.constant dense<0.000000e+00> : vector<4x512xf32>
    %9 = tpu.matmul %7, %8, %cst_8 {dimension_numbers = #tpu.dot_dimension_numbers<[1], [0], [0], [1], [0, 0, 1, 1], [], []>} : vector<4x512xf32>, vector<512x512xf32>, vector<4x512xf32> -> vector<4x512xf32>
    %c0_9 = arith.constant 0 : index
    %c0_10 = arith.constant 0 : index
    %10 = vector.load %arg4[%c0_9, %c0_10] : memref<1x512xf32, #tpu.memory_space<vmem>>, vector<1x512xf32>
    %11 = vector.broadcast %10 : vector<1x512xf32> to vector<4x512xf32>
    %12 = arith.addf %9, %11 : vector<4x512xf32>
    %cst_11 = arith.constant 0.000000e+00 : f32
    %13 = vector.broadcast %cst_11 : f32 to vector<4x512xf32>
    %14 = arith.maximumf %12, %13 : vector<4x512xf32>
    %c0_12 = arith.constant 0 : index
    %c0_13 = arith.constant 0 : index
    %15 = vector.load %arg5[%c0_12, %c0_13] : memref<512x128xf32, #tpu.memory_space<vmem>>, vector<512x128xf32>
    %cst_14 = arith.constant dense<0.000000e+00> : vector<4x128xf32>
    %16 = tpu.matmul %14, %15, %cst_14 {dimension_numbers = #tpu.dot_dimension_numbers<[1], [0], [0], [1], [0, 0, 1, 1], [], []>} : vector<4x512xf32>, vector<512x128xf32>, vector<4x128xf32> -> vector<4x128xf32>
    %c0_15 = arith.constant 0 : index
    %c0_16 = arith.constant 0 : index
    %17 = vector.load %arg6[%c0_15, %c0_16] : memref<1x128xf32, #tpu.memory_space<vmem>>, vector<1x128xf32>
    %18 = vector.broadcast %17 : vector<1x128xf32> to vector<4x128xf32>
    %19 = arith.addf %16, %18 : vector<4x128xf32>
    %c0_17 = arith.constant 0 : index
    %c0_18 = arith.constant 0 : index
    %20 = vector.load %arg7[%c0_17, %c0_18] : memref<4x128xf32, #tpu.memory_space<vmem>>, vector<4x128xf32>
    tpu.vector_store %arg7[%c0_17, %c0_18], %19 {strides = array<i32>} : memref<4x128xf32, #tpu.memory_space<vmem>>, vector<4x128xf32>,
    return
  }
}

</mosaic_0001>

<bundles_post_ra>
// kernel: _lambda_.4
= control target key start
LH: loop header
LB: loop body
LE: loop exit
PB: predicated region body
PF: predicated region fallthrough
CT: control target
= control target key end

     0   :  { %8 = vsyncpa [#allocation3], 0  ;;  %s602_s0 = inlined_call_operand.vmem [shape: f32[9,1024], index: 0, kind: input, shape index: {}]   ;;  %s603_s1 = inlined_call_operand.hbm [shape: f32[4,9], index: 1, kind: input, shape index: {}]   ;;  %s604_s2 = inlined_call_operand.hbm [shape: f32[4,3], index: 2, kind: input, shape index: {}]   ;;  %s605_s3 = inlined_call_operand.vmem [shape: f32[4,1024], index: 3, kind: output, shape index: {}]  }
   0x1   :  { %9 = vsyncpa [#allocation5], 0  ;;  %s498_s12 = smov [#allocation2]   ;;  %s499_s14 = smov [#allocation4]  }
   0x2   :  { %s18_s13 = sshll.u32 %s498_s12, 4  ;;  %s28_s15 = sshll.u32 %s499_s14, 4  ;;  %s19_s13 = int_to_ptr.vmem [resolvable:$true] %s18_s13  ;;  %s29_s15 = int_to_ptr.vmem [resolvable:$true] %s28_s15 }
   0x3   :  { %s462_s16 = scalar_lea.vmem %s19_s13, 64  ;;  %p467_p1 = scmp.lt.s32.totalorder %s19_s13, %s19_s13 }
   0x4   :  { %p463_p0 = scmp.ne.s32.totalorder %s19_s13, %s462_s16  ;;  %p468_p2 = scmp.lt.s32.totalorder %s462_s16, %s462_s16 }
   0x6   :  { %p469_p3 = por %p468_p2, %p467_p1 }
   0x8   :  { %p470_p4 = pnand %p469_p3, %p463_p0 }
   0xa   :  { %473 = shalt.err (!%p470_p4)
}
   0xb   :  { %21 = dma.hbm_to_vmem [thread:$0]  %s603_s1, 64, %s19_s13, [#allocation3]  }
   0xc   :  { %s482_s19 = scalar_lea.vmem %s29_s15, 64  ;;  %p487_p6 = scmp.lt.s32.totalorder %s29_s15, %s29_s15 }
   0xd   :  { %p483_p5 = scmp.ne.s32.totalorder %s29_s15, %s482_s19  ;;  %p488_p7 = scmp.lt.s32.totalorder %s482_s19, %s482_s19 }
   0xf   :  { %p489_p8 = por %p488_p7, %p487_p6 }
  0x11   :  { %p490_p9 = pnand %p489_p8, %p483_p5 }
  0x13   :  { %493 = shalt.err (!%p490_p9)
}
  0x14   :  { %31 = dma.hbm_to_vmem [thread:$0]  %s604_s2, 64, %s29_s15, [#allocation5]  }
  0x15   :  { %494 = dma.done.wait [#allocation3], 64  }
  0x16   :  { %495 = vsyncadd [#allocation3], 4294967232 }
  0x17   :  { %496 = dma.done.wait [#allocation5], 64  }
  0x18   :  { %497 = vsyncadd [#allocation5], 4294967232  ;;  %v500_v0 = vmov 0.0   ;;  %v501_v1 = vmov 0   ;;  %v502_v2 = vmov 2   ;;  %vm65_vm0 = vcmask 1040384  }
  0x19   :  { %154 = vmatprep.mubr.f32.mxu0 %v500_v0  ;;  %225 = vmatprep.mubr.f32.mxu1 %v500_v0  ;;  %v48_v3 = vld [vmem:[%s602_s0 + $0x48] sm:$0x1]  ;;  %v50_v4 = vld [vmem:[%s602_s0 + $0x58] sm:$0x1]  ;;  %v47_v5 = vld [vmem:[%s602_s0 + $0x40] sm:$0x1] }
  0x1a   :  { %450 = vset.pattern.permute.xlu0 %v501_v1  ;;  %452 = vset.pattern.permute.xlu1 %v502_v2  ;;  %v49_v6 = vld [vmem:[%s602_s0 + $0x50] sm:$0x1]  ;;  %v40_v7 = vld [vmem:[%s602_s0 + $0x8] sm:$0xff]  ;;  %v42_v8 = vld [vmem:[%s602_s0 + $0x18] sm:$0xff]  ;;  %vm61_vm1 = vcmask 72704   ;;  %v503_v21 = vmov 1  }
  0x1b   :  { %432 = vmatprep.subr.msk.mxu0 %vm65_vm0, %v48_v3  ;;  %435 = vmatprep.subr.msk.mxu1 %vm65_vm0, %v50_v4  ;;  %v39_v9 = vld [vmem:[%s602_s0] sm:$0xff]  ;;  %v41_v10 = vld [vmem:[%s602_s0 + $0x10] sm:$0xff]  ;;  %v52_v12 = vld [vmem:[%s602_s0 + $0x68] sm:$0x1] }
  0x1c   :  { %433 = vmatpush1.msk.msra.mxu0 %vm65_vm0, %v47_v5  ;;  %436 = vmatpush1.msk.msra.mxu1 %vm65_vm0, %v49_v6  ;;  %v38_v11 = vld [vmem:[#allocation2] sm:$0xf]  ;;  %v54_v13 = vld [vmem:[%s602_s0 + $0x78] sm:$0x1]  ;;  %v53_v15 = vld [vmem:[%s602_s0 + $0x70] sm:$0x1] }
  0x1d   :  { %120 = vmatprep.subr.mxu0 %v40_v7  ;;  %191 = vmatprep.subr.mxu1 %v42_v8  ;;  %v51_v14 = vld [vmem:[%s602_s0 + $0x60] sm:$0x1]  ;;  %v44_v16 = vld [vmem:[%s602_s0 + $0x28] sm:$0xff]  ;;  %v46_v17 = vld [vmem:[%s602_s0 + $0x38] sm:$0xff] }
  0x1e   :  { %121 = vmatpush1.msra.mxu0 %v39_v9  ;;  %192 = vmatpush1.msra.mxu1 %v41_v10  ;;  %v43_v18 = vld [vmem:[%s602_s0 + $0x20] sm:$0xff]  ;;  %v45_v19 = vld [vmem:[%s602_s0 + $0x30] sm:$0xff] }
  0x1f   :  { %434 = vmatmul.mubr.msk.f32.vlgmr.msra.gmra.mxu0 %vm61_vm1, %v38_v11  ;;  %437 = vmatmul.mubr.msk.f32.vlgmr.msra.gmra.mxu1 %vm61_vm1, %v38_v11  ;;  %v55_v20 = vld [vmem:[#allocation4] sm:$0xf] }
  0x20   :  { %438 = vmatprep.subr.msk.mxu0 %vm65_vm0, %v52_v12  ;;  %441 = vmatprep.subr.msk.mxu1 %vm65_vm0, %v54_v13 }
  0x21   :  { %439 = vmatpush1.msk.msra.mxu0 %vm65_vm0, %v51_v14  ;;  %442 = vmatpush1.msk.msra.mxu1 %vm65_vm0, %v53_v15 }
  0x22   :  { %262 = vmatprep.subr.mxu0 %v44_v16  ;;  %333 = vmatprep.subr.mxu1 %v46_v17 }
  0x23   :  { %263 = vmatpush1.msra.mxu0 %v43_v18  ;;  %296 = vmatprep.mubr.f32.mxu0 %v500_v0 }
  0x24   :  { %334 = vmatpush1.msra.mxu1 %v45_v19  ;;  %367 = vmatprep.mubr.f32.mxu1 %v500_v0 }
  0x25   :  { %440 = vmatmul.mubr.msk.f32.vlgmr.msra.gmra.mxu0 %vm61_vm1, %v38_v11  ;;  %443 = vmatmul.mubr.msk.f32.vlgmr.msra.gmra.mxu1 %vm61_vm1, %v38_v11 }
  0x26   :  { %58 = vperm.xlu0 %450, %v55_v20   ;;  %395 = vperm.xlu1 %452, %v55_v20  }
  0x2a   :  { %451 = vset.pattern.permute.xlu0 %v503_v21 }
  0x2b   :  { %383 = vperm.xlu0 %451, %v55_v20  }
  0x2f   :  { %453 = vset.pattern.permute.xlu0 %v502_v2 }
  0xa1   :  { %v59_v22 = vpop.permute.xlu0 %58  ;;  %v396_v44 = vpop.permute.xlu1 %395 }
  0xa6   :  { %v384_v31 = vpop.permute.xlu0 %383 }
  0xdf   :  { %v156_v23 = vpop.f32.mrf.mxu0  ;;  %v227_v24 = vpop.f32.mrf.mxu1 }
  0xe0   :  { %v157_v25 = vadd.f32 %v156_v23, %v59_v22  ;;  %v228_v26 = vadd.f32 %v227_v24, %v59_v22 }
  0xe1   :  { %v158_v27 = vpop.f32.mrf.mxu0  ;;  %v229_v28 = vpop.f32.mrf.mxu1 }
  0xe2   :  { %v159_v29 = vadd.f32 %v158_v27, %v59_v22  ;;  %v230_v30 = vadd.f32 %v229_v28, %v59_v22  ;;  %v374_v32 = vmax.f32 %v157_v25, 0.0  ;;  %v376_v33 = vmax.f32 %v228_v26, 0.0 }
  0xe4   :  { %v375_v34 = vmax.f32 %v159_v29, 0.0  ;;  %v377_v35 = vmax.f32 %v230_v30, 0.0  ;;  %v386_v38 = vmul.f32 %v384_v31, %v374_v32  ;;  %v388_v39 = vmul.f32 %v384_v31, %v376_v33 }
  0xe5   :  { %v298_v36 = vpop.f32.mrf.mxu0  ;;  %v369_v37 = vpop.f32.mrf.mxu1 }
  0xe6   :  { %v299_v40 = vadd.f32 %v298_v36, %v59_v22  ;;  %v370_v41 = vadd.f32 %v369_v37, %v59_v22  ;;  %v387_v42 = vmul.f32 %v384_v31, %v375_v34  ;;  %v389_v43 = vmul.f32 %v384_v31, %v377_v35 }
  0xe7   :  { %v300_v45 = vpop.f32.mrf.mxu0  ;;  %v371_v46 = vpop.f32.mrf.mxu1  ;;  %v398_v51 = vadd.f32 %v396_v44, %v386_v38  ;;  %v400_v53 = vadd.f32 %v396_v44, %v388_v39 }
  0xe8   :  { %v378_v47 = vmax.f32 %v299_v40, 0.0  ;;  %v380_v48 = vmax.f32 %v370_v41, 0.0  ;;  %v301_v49 = vadd.f32 %v300_v45, %v59_v22  ;;  %v372_v50 = vadd.f32 %v371_v46, %v59_v22 }
  0xe9   :  { %v399_v52 = vadd.f32 %v396_v44, %v387_v42  ;;  %v401_v54 = vadd.f32 %v396_v44, %v389_v43 }
  0xea   :  { %v390_v55 = vmul.f32 %v384_v31, %v378_v47  ;;  %v392_v56 = vmul.f32 %v384_v31, %v380_v48  ;;  %v379_v57 = vmax.f32 %v301_v49, 0.0  ;;  %v381_v58 = vmax.f32 %v372_v50, 0.0 }
  0xeb   :  { %v414_v59 = vcombine.low %v398_v51, %v399_v52  ;;  %v415_v60 = vcombine.low %v400_v53, %v401_v54 }
  0xec   :  { %v391_v61 = vmul.f32 %v384_v31, %v379_v57  ;;  %v393_v62 = vmul.f32 %v384_v31, %v381_v58  ;;  %v402_v63 = vadd.f32 %v396_v44, %v390_v55  ;;  %v404_v1 = vadd.f32 %v396_v44, %v392_v56 }
  0xed   :  { %422 = vst [vmem:[%s605_s3] sm:$0xff] %v414_v59  ;;  %423 = vst [vmem:[%s605_s3 + $0x8] sm:$0xff] %v415_v60 }
  0xee   :  { %v403_v0 = vadd.f32 %v396_v44, %v391_v61  ;;  %v405_v2 = vadd.f32 %v396_v44, %v393_v62 }
  0xf0   :  { %v416_v3 = vcombine.low %v402_v63, %v403_v0  ;;  %v417_v4 = vcombine.low %v404_v1, %v405_v2 }
  0xf2   :  { %424 = vst [vmem:[%s605_s3 + $0x10] sm:$0xff] %v416_v3  ;;  %425 = vst [vmem:[%s605_s3 + $0x18] sm:$0xff] %v417_v4 }
  0xf3   :  { %430 = vsyncpa [#allocation3], 1 }
  0xf4   :  { %431 = vsyncpa [#allocation5], 1 }

// kernel: _lambda_.5
= control target key start
LH: loop header
LB: loop body
LE: loop exit
PB: predicated region body
PF: predicated region fallthrough
CT: control target
= control target key end

     0   :  { %vm65_vm0 = vcmask 1043456   ;;  %v438_v3 = vmov 0.0   ;;  %vm61_vm1 = vcmask 293888   ;;  %v439_v43 = vmov 0   ;;  %s628_s0 = inlined_call_operand.vmem [shape: f32[36,1024], index: 0, kind: input, shape index: {}]   ;;  %s629_s1 = inlined_call_operand.vmem [shape: f32[8,36], index: 1, kind: input, shape index: {}]   ;;  %s630_s2 = inlined_call_operand.vmem [shape: f32[8,3], index: 2, kind: input, shape index: {}]   ;;  %s631_s3 = inlined_call_operand.vmem [shape: f32[8,1024], index: 3, kind: output, shape index: {}]  }
   0x1   :  { %v48_v0 = vld [vmem:[%s628_s0 + $0x108] sm:$0xf]  ;;  %v50_v1 = vld [vmem:[%s628_s0 + $0x118] sm:$0xf]  ;;  %v47_v2 = vld [vmem:[%s628_s0 + $0x100] sm:$0xf]  ;;  %154 = vmatprep.mubr.f32.mxu0 %v438_v3  ;;  %225 = vmatprep.mubr.f32.mxu1 %v438_v3 }
   0x2   :  { %418 = vmatprep.subr.msk.mxu0 %vm65_vm0, %v48_v0  ;;  %421 = vmatprep.subr.msk.mxu1 %vm65_vm0, %v50_v1  ;;  %v49_v4 = vld [vmem:[%s628_s0 + $0x110] sm:$0xf]  ;;  %v40_v5 = vld [vmem:[%s628_s0 + $0xc8] sm:$0xff]  ;;  %v42_v6 = vld [vmem:[%s628_s0 + $0xd8] sm:$0xff]  ;;  %v440_v44 = vmov 2   ;;  %v441_v45 = vmov 1  }
   0x3   :  { %419 = vmatpush1.msk.msra.mxu0 %vm65_vm0, %v47_v2  ;;  %422 = vmatpush1.msk.msra.mxu1 %vm65_vm0, %v49_v4  ;;  %v39_v7 = vld [vmem:[%s628_s0 + $0xc0] sm:$0xff]  ;;  %v41_v8 = vld [vmem:[%s628_s0 + $0xd0] sm:$0xff]  ;;  %v32_v9 = vld [vmem:[%s628_s0 + $0x88] sm:$0xff] }
   0x4   :  { %114 = vmatprep.subr.mxu0 %v40_v5  ;;  %185 = vmatprep.subr.mxu1 %v42_v6  ;;  %v34_v10 = vld [vmem:[%s628_s0 + $0x98] sm:$0xff]  ;;  %v31_v11 = vld [vmem:[%s628_s0 + $0x80] sm:$0xff]  ;;  %v33_v12 = vld [vmem:[%s628_s0 + $0x90] sm:$0xff] }
   0x5   :  { %115 = vmatpush1.msra.mxu0 %v39_v7  ;;  %186 = vmatpush1.msra.mxu1 %v41_v8  ;;  %v24_v13 = vld [vmem:[%s628_s0 + $0x48] sm:$0xff]  ;;  %v26_v14 = vld [vmem:[%s628_s0 + $0x58] sm:$0xff]  ;;  %v23_v15 = vld [vmem:[%s628_s0 + $0x40] sm:$0xff] }
   0x6   :  { %116 = vmatprep.subr.mxu0 %v32_v9  ;;  %187 = vmatprep.subr.mxu1 %v34_v10  ;;  %v25_v16 = vld [vmem:[%s628_s0 + $0x50] sm:$0xff]  ;;  %v16_v17 = vld [vmem:[%s628_s0 + $0x8] sm:$0xff]  ;;  %v18_v18 = vld [vmem:[%s628_s0 + $0x18] sm:$0xff] }
   0x7   :  { %117 = vmatpush1.msra.mxu0 %v31_v11  ;;  %188 = vmatpush1.msra.mxu1 %v33_v12  ;;  %v15_v19 = vld [vmem:[%s628_s0] sm:$0xff]  ;;  %v17_v20 = vld [vmem:[%s628_s0 + $0x10] sm:$0xff]  ;;  %v52_v22 = vld [vmem:[%s628_s0 + $0x128] sm:$0xf] }
   0x8   :  { %118 = vmatprep.subr.mxu0 %v24_v13  ;;  %189 = vmatprep.subr.mxu1 %v26_v14  ;;  %v14_v21 = vld [vmem:[%s629_s1] sm:$0xff]  ;;  %v54_v23 = vld [vmem:[%s628_s0 + $0x138] sm:$0xf]  ;;  %v53_v25 = vld [vmem:[%s628_s0 + $0x130] sm:$0xf] }
   0x9   :  { %119 = vmatpush1.msra.mxu0 %v23_v15  ;;  %190 = vmatpush1.msra.mxu1 %v25_v16  ;;  %v51_v24 = vld [vmem:[%s628_s0 + $0x120] sm:$0xf]  ;;  %v44_v26 = vld [vmem:[%s628_s0 + $0xe8] sm:$0xff]  ;;  %v46_v27 = vld [vmem:[%s628_s0 + $0xf8] sm:$0xff] }
   0xa   :  { %120 = vmatprep.subr.mxu0 %v16_v17  ;;  %191 = vmatprep.subr.mxu1 %v18_v18  ;;  %v43_v28 = vld [vmem:[%s628_s0 + $0xe0] sm:$0xff]  ;;  %v45_v29 = vld [vmem:[%s628_s0 + $0xf0] sm:$0xff]  ;;  %v36_v30 = vld [vmem:[%s628_s0 + $0xa8] sm:$0xff] }
   0xb   :  { %121 = vmatpush1.msra.mxu0 %v15_v19  ;;  %192 = vmatpush1.msra.mxu1 %v17_v20  ;;  %v38_v31 = vld [vmem:[%s628_s0 + $0xb8] sm:$0xff]  ;;  %v35_v32 = vld [vmem:[%s628_s0 + $0xa0] sm:$0xff]  ;;  %v37_v33 = vld [vmem:[%s628_s0 + $0xb0] sm:$0xff] }
   0xc   :  { %420 = vmatmul.mubr.msk.f32.vlgmr.msra.gmra.mxu0 %vm61_vm1, %v14_v21  ;;  %423 = vmatmul.mubr.msk.f32.vlgmr.msra.gmra.mxu1 %vm61_vm1, %v14_v21  ;;  %v28_v34 = vld [vmem:[%s628_s0 + $0x68] sm:$0xff]  ;;  %v30_v35 = vld [vmem:[%s628_s0 + $0x78] sm:$0xff]  ;;  %v27_v36 = vld [vmem:[%s628_s0 + $0x60] sm:$0xff] }
   0xd   :  { %424 = vmatprep.subr.msk.mxu0 %vm65_vm0, %v52_v22  ;;  %427 = vmatprep.subr.msk.mxu1 %vm65_vm0, %v54_v23  ;;  %v29_v37 = vld [vmem:[%s628_s0 + $0x70] sm:$0xff]  ;;  %v20_v38 = vld [vmem:[%s628_s0 + $0x28] sm:$0xff]  ;;  %v22_v39 = vld [vmem:[%s628_s0 + $0x38] sm:$0xff] }
   0xe   :  { %425 = vmatpush1.msk.msra.mxu0 %vm65_vm0, %v51_v24  ;;  %428 = vmatpush1.msk.msra.mxu1 %vm65_vm0, %v53_v25  ;;  %v19_v40 = vld [vmem:[%s628_s0 + $0x20] sm:$0xff]  ;;  %v21_v41 = vld [vmem:[%s628_s0 + $0x30] sm:$0xff] }
   0xf   :  { %256 = vmatprep.subr.mxu0 %v44_v26  ;;  %327 = vmatprep.subr.mxu1 %v46_v27  ;;  %v55_v42 = vld [vmem:[%s630_s2] sm:$0xff] }
  0x10   :  { %257 = vmatpush1.msra.mxu0 %v43_v28  ;;  %328 = vmatpush1.msra.mxu1 %v45_v29 }
  0x11   :  { %258 = vmatprep.subr.mxu0 %v36_v30  ;;  %329 = vmatprep.subr.mxu1 %v38_v31 }
  0x12   :  { %259 = vmatpush1.msra.mxu0 %v35_v32  ;;  %330 = vmatpush1.msra.mxu1 %v37_v33 }
  0x13   :  { %260 = vmatprep.subr.mxu0 %v28_v34  ;;  %331 = vmatprep.subr.mxu1 %v30_v35 }
  0x14   :  { %261 = vmatpush1.msra.mxu0 %v27_v36  ;;  %332 = vmatpush1.msra.mxu1 %v29_v37 }
  0x15   :  { %262 = vmatprep.subr.mxu0 %v20_v38  ;;  %333 = vmatprep.subr.mxu1 %v22_v39 }
  0x16   :  { %263 = vmatpush1.msra.mxu0 %v19_v40  ;;  %296 = vmatprep.mubr.f32.mxu0 %v438_v3 }
  0x17   :  { %334 = vmatpush1.msra.mxu1 %v21_v41  ;;  %367 = vmatprep.mubr.f32.mxu1 %v438_v3 }
  0x18   :  { %426 = vmatmul.mubr.msk.f32.vlgmr.msra.gmra.mxu0 %vm61_vm1, %v14_v21  ;;  %429 = vmatmul.mubr.msk.f32.vlgmr.msra.gmra.mxu1 %vm61_vm1, %v14_v21 }
  0x19   :  { %434 = vset.pattern.permute.xlu0 %v439_v43  ;;  %436 = vset.pattern.permute.xlu1 %v440_v44 }
  0x1a   :  { %58 = vperm.xlu0 %434, %v55_v42   ;;  %395 = vperm.xlu1 %436, %v55_v42  }
  0x1e   :  { %435 = vset.pattern.permute.xlu0 %v441_v45 }
  0x1f   :  { %383 = vperm.xlu0 %435, %v55_v42  }
  0x23   :  { %437 = vset.pattern.permute.xlu0 %v440_v44 }
  0x95   :  { %v59_v46 = vpop.permute.xlu0 %58  ;;  %v396_v58 = vpop.permute.xlu1 %395 }
  0x9a   :  { %v384_v49 = vpop.permute.xlu0 %383 }
  0xcc   :  { %v156_v47 = vpop.f32.mrf.mxu0  ;;  %v227_v48 = vpop.f32.mrf.mxu1 }
  0xcd   :  { %v157_v50 = vadd.f32 %v156_v47, %v59_v46  ;;  %v228_v51 = vadd.f32 %v227_v48, %v59_v46 }
  0xce   :  { %v158_v52 = vpop.f32.mrf.mxu0  ;;  %v229_v53 = vpop.f32.mrf.mxu1 }
  0xcf   :  { %v159_v54 = vadd.f32 %v158_v52, %v59_v46  ;;  %v230_v55 = vadd.f32 %v229_v53, %v59_v46  ;;  %v374_v56 = vmax.f32 %v157_v50, 0.0  ;;  %v376_v57 = vmax.f32 %v228_v51, 0.0 }
  0xd1   :  { %v375_v59 = vmax.f32 %v159_v54, 0.0  ;;  %v377_v60 = vmax.f32 %v230_v55, 0.0  ;;  %v386_v61 = vmul.f32 %v384_v49, %v374_v56  ;;  %v388_v62 = vmul.f32 %v384_v49, %v376_v57 }
  0xd3   :  { %v387_v63 = vmul.f32 %v384_v49, %v375_v59  ;;  %v389_v0 = vmul.f32 %v384_v49, %v377_v60  ;;  %v398_v1 = vadd.f32 %v396_v58, %v386_v61  ;;  %v400_v2 = vadd.f32 %v396_v58, %v388_v62 }
  0xd5   :  { %v399_v3 = vadd.f32 %v396_v58, %v387_v63  ;;  %v401_v4 = vadd.f32 %v396_v58, %v389_v0  ;;  %406 = vst [vmem:[%s631_s3] sm:$0xff] %v398_v1  ;;  %408 = vst [vmem:[%s631_s3 + $0x10] sm:$0xff] %v400_v2 }
  0xd7   :  { %407 = vst [vmem:[%s631_s3 + $0x8] sm:$0xff] %v399_v3  ;;  %409 = vst [vmem:[%s631_s3 + $0x18] sm:$0xff] %v401_v4 }
  0xd8   :  { %v298_v5 = vpop.f32.mrf.mxu0  ;;  %v369_v6 = vpop.f32.mrf.mxu1 }
  0xd9   :  { %v299_v7 = vadd.f32 %v298_v5, %v59_v46  ;;  %v370_v8 = vadd.f32 %v369_v6, %v59_v46 }
  0xda   :  { %v300_v9 = vpop.f32.mrf.mxu0  ;;  %v371_v10 = vpop.f32.mrf.mxu1 }
  0xdb   :  { %v378_v11 = vmax.f32 %v299_v7, 0.0  ;;  %v380_v12 = vmax.f32 %v370_v8, 0.0  ;;  %v301_v13 = vadd.f32 %v300_v9, %v59_v46  ;;  %v372_v14 = vadd.f32 %v371_v10, %v59_v46 }
  0xdd   :  { %v390_v15 = vmul.f32 %v384_v49, %v378_v11  ;;  %v392_v16 = vmul.f32 %v384_v49, %v380_v12  ;;  %v379_v17 = vmax.f32 %v301_v13, 0.0  ;;  %v381_v18 = vmax.f32 %v372_v14, 0.0 }
  0xdf   :  { %v402_v19 = vadd.f32 %v396_v58, %v390_v15  ;;  %v404_v20 = vadd.f32 %v396_v58, %v392_v16  ;;  %v391_v21 = vmul.f32 %v384_v49, %v379_v17  ;;  %v393_v22 = vmul.f32 %v384_v49, %v381_v18 }
  0xe1   :  { %410 = vst [vmem:[%s631_s3 + $0x20] sm:$0xff] %v402_v19  ;;  %412 = vst [vmem:[%s631_s3 + $0x30] sm:$0xff] %v404_v20  ;;  %v403_v23 = vadd.f32 %v396_v58, %v391_v21  ;;  %v405_v24 = vadd.f32 %v396_v58, %v393_v22 }
  0xe3   :  { %411 = vst [vmem:[%s631_s3 + $0x28] sm:$0xff] %v403_v23  ;;  %413 = vst [vmem:[%s631_s3 + $0x38] sm:$0xff] %v405_v24 }

// kernel: _lambda_.6
= control target key start
LH: loop header
LB: loop body
LE: loop exit
PB: predicated region body
PF: predicated region fallthrough
CT: control target
= control target key end

     0   :  { %v437_v3 = vmov 0.0   ;;  %vm93_vm0 = vcmask 588800   ;;  %s721_s0 = inlined_call_operand.vmem [shape: f32[72,1024], index: 0, kind: input, shape index: {}]   ;;  %s722_s1 = inlined_call_operand.vmem [shape: f32[8,72], index: 1, kind: input, shape index: {}]   ;;  %s723_s2 = inlined_call_operand.vmem [shape: f32[8,3], index: 2, kind: input, shape index: {}]   ;;  %s724_s3 = inlined_call_operand.vmem [shape: f32[8,1024], index: 3, kind: output, shape index: {}]  }
   0x1   :  { %v80_v0 = vld [vmem:[%s721_s0 + $0x208] sm:$0xff]  ;;  %v82_v1 = vld [vmem:[%s721_s0 + $0x218] sm:$0xff]  ;;  %v79_v2 = vld [vmem:[%s721_s0 + $0x200] sm:$0xff]  ;;  %161 = vmatprep.mubr.f32.mxu0 %v437_v3  ;;  %232 = vmatprep.mubr.f32.mxu1 %v437_v3 }
   0x2   :  { %111 = vmatprep.subr.mxu0 %v80_v0  ;;  %182 = vmatprep.subr.mxu1 %v82_v1  ;;  %v81_v4 = vld [vmem:[%s721_s0 + $0x210] sm:$0xff]  ;;  %v72_v5 = vld [vmem:[%s721_s0 + $0x1c8] sm:$0xff]  ;;  %v74_v6 = vld [vmem:[%s721_s0 + $0x1d8] sm:$0xff] }
   0x3   :  { %112 = vmatpush1.msra.mxu0 %v79_v2  ;;  %183 = vmatpush1.msra.mxu1 %v81_v4  ;;  %v71_v7 = vld [vmem:[%s721_s0 + $0x1c0] sm:$0xff]  ;;  %v73_v8 = vld [vmem:[%s721_s0 + $0x1d0] sm:$0xff]  ;;  %v64_v9 = vld [vmem:[%s721_s0 + $0x188] sm:$0xff] }
   0x4   :  { %113 = vmatprep.subr.mxu0 %v72_v5  ;;  %184 = vmatprep.subr.mxu1 %v74_v6  ;;  %v66_v10 = vld [vmem:[%s721_s0 + $0x198] sm:$0xff]  ;;  %v63_v11 = vld [vmem:[%s721_s0 + $0x180] sm:$0xff]  ;;  %v65_v12 = vld [vmem:[%s721_s0 + $0x190] sm:$0xff] }
   0x5   :  { %114 = vmatpush1.msra.mxu0 %v71_v7  ;;  %185 = vmatpush1.msra.mxu1 %v73_v8  ;;  %v56_v13 = vld [vmem:[%s721_s0 + $0x148] sm:$0xff]  ;;  %v58_v14 = vld [vmem:[%s721_s0 + $0x158] sm:$0xff]  ;;  %v55_v15 = vld [vmem:[%s721_s0 + $0x140] sm:$0xff] }
   0x6   :  { %115 = vmatprep.subr.mxu0 %v64_v9  ;;  %186 = vmatprep.subr.mxu1 %v66_v10  ;;  %v57_v16 = vld [vmem:[%s721_s0 + $0x150] sm:$0xff]  ;;  %v48_v17 = vld [vmem:[%s721_s0 + $0x108] sm:$0xff]  ;;  %v50_v18 = vld [vmem:[%s721_s0 + $0x118] sm:$0xff] }
   0x7   :  { %116 = vmatpush1.msra.mxu0 %v63_v11  ;;  %187 = vmatpush1.msra.mxu1 %v65_v12  ;;  %v47_v19 = vld [vmem:[%s721_s0 + $0x100] sm:$0xff]  ;;  %v49_v20 = vld [vmem:[%s721_s0 + $0x110] sm:$0xff]  ;;  %v40_v21 = vld [vmem:[%s721_s0 + $0xc8] sm:$0xff]  ;;  %v438_v12 = vmov 0  }
   0x8   :  { %117 = vmatprep.subr.mxu0 %v56_v13  ;;  %188 = vmatprep.subr.mxu1 %v58_v14  ;;  %v42_v22 = vld [vmem:[%s721_s0 + $0xd8] sm:$0xff]  ;;  %v39_v23 = vld [vmem:[%s721_s0 + $0xc0] sm:$0xff]  ;;  %v41_v24 = vld [vmem:[%s721_s0 + $0xd0] sm:$0xff]  ;;  %v439_v13 = vmov 2   ;;  %v440_v14 = vmov 1  }
   0x9   :  { %118 = vmatpush1.msra.mxu0 %v55_v15  ;;  %189 = vmatpush1.msra.mxu1 %v57_v16  ;;  %v32_v25 = vld [vmem:[%s721_s0 + $0x88] sm:$0xff]  ;;  %v34_v26 = vld [vmem:[%s721_s0 + $0x98] sm:$0xff]  ;;  %v31_v27 = vld [vmem:[%s721_s0 + $0x80] sm:$0xff] }
   0xa   :  { %119 = vmatprep.subr.mxu0 %v48_v17  ;;  %190 = vmatprep.subr.mxu1 %v50_v18  ;;  %v33_v28 = vld [vmem:[%s721_s0 + $0x90] sm:$0xff]  ;;  %v24_v29 = vld [vmem:[%s721_s0 + $0x48] sm:$0xff]  ;;  %v26_v30 = vld [vmem:[%s721_s0 + $0x58] sm:$0xff] }
   0xb   :  { %120 = vmatpush1.msra.mxu0 %v47_v19  ;;  %191 = vmatpush1.msra.mxu1 %v49_v20  ;;  %v23_v31 = vld [vmem:[%s721_s0 + $0x40] sm:$0xff]  ;;  %v25_v32 = vld [vmem:[%s721_s0 + $0x50] sm:$0xff]  ;;  %v16_v33 = vld [vmem:[%s721_s0 + $0x8] sm:$0xff] }
   0xc   :  { %121 = vmatprep.subr.mxu0 %v40_v21  ;;  %192 = vmatprep.subr.mxu1 %v42_v22  ;;  %v18_v34 = vld [vmem:[%s721_s0 + $0x18] sm:$0xff]  ;;  %v15_v35 = vld [vmem:[%s721_s0] sm:$0xff]  ;;  %v17_v36 = vld [vmem:[%s721_s0 + $0x10] sm:$0xff] }
   0xd   :  { %122 = vmatpush1.msra.mxu0 %v39_v23  ;;  %193 = vmatpush1.msra.mxu1 %v41_v24  ;;  %v574_v37 = vld [vmem:[%s722_s1] sm:$0xff]  ;;  %v84_v38 = vld [vmem:[%s721_s0 + $0x228] sm:$0xff]  ;;  %v86_v39 = vld [vmem:[%s721_s0 + $0x238] sm:$0xff] }
   0xe   :  { %123 = vmatprep.subr.mxu0 %v32_v25  ;;  %194 = vmatprep.subr.mxu1 %v34_v26  ;;  %v83_v40 = vld [vmem:[%s721_s0 + $0x220] sm:$0xff]  ;;  %v85_v41 = vld [vmem:[%s721_s0 + $0x230] sm:$0xff]  ;;  %v76_v42 = vld [vmem:[%s721_s0 + $0x1e8] sm:$0xff] }
   0xf   :  { %124 = vmatpush1.msra.mxu0 %v31_v27  ;;  %195 = vmatpush1.msra.mxu1 %v33_v28  ;;  %v78_v43 = vld [vmem:[%s721_s0 + $0x1f8] sm:$0xff]  ;;  %v75_v44 = vld [vmem:[%s721_s0 + $0x1e0] sm:$0xff]  ;;  %v77_v45 = vld [vmem:[%s721_s0 + $0x1f0] sm:$0xff] }
  0x10   :  { %125 = vmatprep.subr.mxu0 %v24_v29  ;;  %196 = vmatprep.subr.mxu1 %v26_v30  ;;  %v68_v46 = vld [vmem:[%s721_s0 + $0x1a8] sm:$0xff]  ;;  %v70_v47 = vld [vmem:[%s721_s0 + $0x1b8] sm:$0xff]  ;;  %v67_v48 = vld [vmem:[%s721_s0 + $0x1a0] sm:$0xff] }
  0x11   :  { %126 = vmatpush1.msra.mxu0 %v23_v31  ;;  %197 = vmatpush1.msra.mxu1 %v25_v32  ;;  %v69_v49 = vld [vmem:[%s721_s0 + $0x1b0] sm:$0xff]  ;;  %v60_v50 = vld [vmem:[%s721_s0 + $0x168] sm:$0xff]  ;;  %v62_v51 = vld [vmem:[%s721_s0 + $0x178] sm:$0xff] }
  0x12   :  { %127 = vmatprep.subr.mxu0 %v16_v33  ;;  %198 = vmatprep.subr.mxu1 %v18_v34  ;;  %v59_v52 = vld [vmem:[%s721_s0 + $0x160] sm:$0xff]  ;;  %v61_v53 = vld [vmem:[%s721_s0 + $0x170] sm:$0xff]  ;;  %v52_v54 = vld [vmem:[%s721_s0 + $0x128] sm:$0xff] }
  0x13   :  { %128 = vmatpush1.msra.mxu0 %v15_v35  ;;  %199 = vmatpush1.msra.mxu1 %v17_v36  ;;  %v54_v55 = vld [vmem:[%s721_s0 + $0x138] sm:$0xff]  ;;  %v51_v56 = vld [vmem:[%s721_s0 + $0x120] sm:$0xff]  ;;  %v53_v57 = vld [vmem:[%s721_s0 + $0x130] sm:$0xff] }
  0x14   :  { %425 = vmatmul.mubr.msk.f32.vlgmr.msra.gmra.mxu0 %vm93_vm0, %v574_v37  ;;  %426 = vmatmul.mubr.msk.f32.vlgmr.msra.gmra.mxu1 %vm93_vm0, %v574_v37  ;;  %v44_v58 = vld [vmem:[%s721_s0 + $0xe8] sm:$0xff]  ;;  %v46_v59 = vld [vmem:[%s721_s0 + $0xf8] sm:$0xff]  ;;  %v43_v60 = vld [vmem:[%s721_s0 + $0xe0] sm:$0xff] }
  0x15   :  { %253 = vmatprep.subr.mxu0 %v84_v38  ;;  %324 = vmatprep.subr.mxu1 %v86_v39  ;;  %v45_v61 = vld [vmem:[%s721_s0 + $0xf0] sm:$0xff]  ;;  %v36_v62 = vld [vmem:[%s721_s0 + $0xa8] sm:$0xff]  ;;  %v38_v63 = vld [vmem:[%s721_s0 + $0xb8] sm:$0xff] }
  0x16   :  { %254 = vmatpush1.msra.mxu0 %v83_v40  ;;  %325 = vmatpush1.msra.mxu1 %v85_v41  ;;  %v35_v0 = vld [vmem:[%s721_s0 + $0xa0] sm:$0xff]  ;;  %v37_v1 = vld [vmem:[%s721_s0 + $0xb0] sm:$0xff]  ;;  %v28_v2 = vld [vmem:[%s721_s0 + $0x68] sm:$0xff] }
  0x17   :  { %255 = vmatprep.subr.mxu0 %v76_v42  ;;  %326 = vmatprep.subr.mxu1 %v78_v43  ;;  %v30_v4 = vld [vmem:[%s721_s0 + $0x78] sm:$0xff]  ;;  %v27_v5 = vld [vmem:[%s721_s0 + $0x60] sm:$0xff]  ;;  %v29_v6 = vld [vmem:[%s721_s0 + $0x70] sm:$0xff] }
  0x18   :  { %256 = vmatpush1.msra.mxu0 %v75_v44  ;;  %327 = vmatpush1.msra.mxu1 %v77_v45  ;;  %v20_v7 = vld [vmem:[%s721_s0 + $0x28] sm:$0xff]  ;;  %v22_v8 = vld [vmem:[%s721_s0 + $0x38] sm:$0xff]  ;;  %v19_v9 = vld [vmem:[%s721_s0 + $0x20] sm:$0xff] }
  0x19   :  { %257 = vmatprep.subr.mxu0 %v68_v46  ;;  %328 = vmatprep.subr.mxu1 %v70_v47  ;;  %v21_v10 = vld [vmem:[%s721_s0 + $0x30] sm:$0xff]  ;;  %v87_v11 = vld [vmem:[%s723_s2] sm:$0xff] }
  0x1a   :  { %258 = vmatpush1.msra.mxu0 %v67_v48  ;;  %329 = vmatpush1.msra.mxu1 %v69_v49 }
  0x1b   :  { %259 = vmatprep.subr.mxu0 %v60_v50  ;;  %330 = vmatprep.subr.mxu1 %v62_v51 }
  0x1c   :  { %260 = vmatpush1.msra.mxu0 %v59_v52  ;;  %331 = vmatpush1.msra.mxu1 %v61_v53 }
  0x1d   :  { %261 = vmatprep.subr.mxu0 %v52_v54  ;;  %332 = vmatprep.subr.mxu1 %v54_v55 }
  0x1e   :  { %262 = vmatpush1.msra.mxu0 %v51_v56  ;;  %333 = vmatpush1.msra.mxu1 %v53_v57 }
  0x1f   :  { %263 = vmatprep.subr.mxu0 %v44_v58  ;;  %334 = vmatprep.subr.mxu1 %v46_v59 }
  0x20   :  { %264 = vmatpush1.msra.mxu0 %v43_v60  ;;  %335 = vmatpush1.msra.mxu1 %v45_v61 }
  0x21   :  { %265 = vmatprep.subr.mxu0 %v36_v62  ;;  %336 = vmatprep.subr.mxu1 %v38_v63 }
  0x22   :  { %266 = vmatpush1.msra.mxu0 %v35_v0  ;;  %337 = vmatpush1.msra.mxu1 %v37_v1 }
  0x23   :  { %267 = vmatprep.subr.mxu0 %v28_v2  ;;  %338 = vmatprep.subr.mxu1 %v30_v4 }
  0x24   :  { %268 = vmatpush1.msra.mxu0 %v27_v5  ;;  %339 = vmatpush1.msra.mxu1 %v29_v6 }
  0x25   :  { %269 = vmatprep.subr.mxu0 %v20_v7  ;;  %340 = vmatprep.subr.mxu1 %v22_v8 }
  0x26   :  { %270 = vmatpush1.msra.mxu0 %v19_v9  ;;  %303 = vmatprep.mubr.f32.mxu0 %v437_v3 }
  0x27   :  { %341 = vmatpush1.msra.mxu1 %v21_v10  ;;  %374 = vmatprep.mubr.f32.mxu1 %v437_v3 }
  0x28   :  { %427 = vmatmul.mubr.msk.f32.vlgmr.msra.gmra.mxu0 %vm93_vm0, %v574_v37  ;;  %428 = vmatmul.mubr.msk.f32.vlgmr.msra.gmra.mxu1 %vm93_vm0, %v574_v37 }
  0x29   :  { %433 = vset.pattern.permute.xlu0 %v438_v12  ;;  %435 = vset.pattern.permute.xlu1 %v439_v13 }
  0x2a   :  { %90 = vperm.xlu0 %433, %v87_v11   ;;  %402 = vperm.xlu1 %435, %v87_v11  }
  0x2e   :  { %434 = vset.pattern.permute.xlu0 %v440_v14 }
  0x2f   :  { %390 = vperm.xlu0 %434, %v87_v11  }
  0x33   :  { %436 = vset.pattern.permute.xlu0 %v439_v13 }
  0xa5   :  { %v91_v3 = vpop.permute.xlu0 %90  ;;  %v403_v26 = vpop.permute.xlu1 %402 }
  0xaa   :  { %v391_v17 = vpop.permute.xlu0 %390 }
  0xd4   :  { %v163_v15 = vpop.f32.mrf.mxu0  ;;  %v234_v16 = vpop.f32.mrf.mxu1 }
  0xd5   :  { %v164_v18 = vadd.f32 %v163_v15, %v91_v3  ;;  %v235_v19 = vadd.f32 %v234_v16, %v91_v3 }
  0xd6   :  { %v165_v20 = vpop.f32.mrf.mxu0  ;;  %v236_v21 = vpop.f32.mrf.mxu1 }
  0xd7   :  { %v166_v22 = vadd.f32 %v165_v20, %v91_v3  ;;  %v237_v23 = vadd.f32 %v236_v21, %v91_v3  ;;  %v381_v24 = vmax.f32 %v164_v18, 0.0  ;;  %v383_v25 = vmax.f32 %v235_v19, 0.0 }
  0xd9   :  { %v382_v27 = vmax.f32 %v166_v22, 0.0  ;;  %v384_v28 = vmax.f32 %v237_v23, 0.0  ;;  %v393_v29 = vmul.f32 %v391_v17, %v381_v24  ;;  %v395_v30 = vmul.f32 %v391_v17, %v383_v25 }
  0xdb   :  { %v394_v31 = vmul.f32 %v391_v17, %v382_v27  ;;  %v396_v32 = vmul.f32 %v391_v17, %v384_v28  ;;  %v405_v33 = vadd.f32 %v403_v26, %v393_v29  ;;  %v407_v34 = vadd.f32 %v403_v26, %v395_v30 }
  0xdd   :  { %v406_v35 = vadd.f32 %v403_v26, %v394_v31  ;;  %v408_v36 = vadd.f32 %v403_v26, %v396_v32  ;;  %413 = vst [vmem:[%s724_s3] sm:$0xff] %v405_v33  ;;  %415 = vst [vmem:[%s724_s3 + $0x10] sm:$0xff] %v407_v34 }
  0xdf   :  { %414 = vst [vmem:[%s724_s3 + $0x8] sm:$0xff] %v406_v35  ;;  %416 = vst [vmem:[%s724_s3 + $0x18] sm:$0xff] %v408_v36 }
  0xe8   :  { %v305_v37 = vpop.f32.mrf.mxu0  ;;  %v376_v38 = vpop.f32.mrf.mxu1 }
  0xe9   :  { %v306_v39 = vadd.f32 %v305_v37, %v91_v3  ;;  %v377_v40 = vadd.f32 %v376_v38, %v91_v3 }
  0xea   :  { %v307_v41 = vpop.f32.mrf.mxu0  ;;  %v378_v42 = vpop.f32.mrf.mxu1 }
  0xeb   :  { %v385_v43 = vmax.f32 %v306_v39, 0.0  ;;  %v387_v44 = vmax.f32 %v377_v40, 0.0  ;;  %v308_v45 = vadd.f32 %v307_v41, %v91_v3  ;;  %v379_v46 = vadd.f32 %v378_v42, %v91_v3 }
  0xed   :  { %v397_v47 = vmul.f32 %v391_v17, %v385_v43  ;;  %v399_v48 = vmul.f32 %v391_v17, %v387_v44  ;;  %v386_v49 = vmax.f32 %v308_v45, 0.0  ;;  %v388_v50 = vmax.f32 %v379_v46, 0.0 }
  0xef   :  { %v409_v51 = vadd.f32 %v403_v26, %v397_v47  ;;  %v411_v52 = vadd.f32 %v403_v26, %v399_v48  ;;  %v398_v53 = vmul.f32 %v391_v17, %v386_v49  ;;  %v400_v54 = vmul.f32 %v391_v17, %v388_v50 }
  0xf1   :  { %417 = vst [vmem:[%s724_s3 + $0x20] sm:$0xff] %v409_v51  ;;  %419 = vst [vmem:[%s724_s3 + $0x30] sm:$0xff] %v411_v52  ;;  %v410_v55 = vadd.f32 %v403_v26, %v398_v53  ;;  %v412_v56 = vadd.f32 %v403_v26, %v400_v54 }
  0xf3   :  { %418 = vst [vmem:[%s724_s3 + $0x28] sm:$0xff] %v410_v55  ;;  %420 = vst [vmem:[%s724_s3 + $0x38] sm:$0xff] %v412_v56 }

// kernel: _lambda_.7
= control target key start
LH: loop header
LB: loop body
LE: loop exit
PB: predicated region body
PF: predicated region fallthrough
CT: control target
= control target key end

     0   :  { %s7355_s1 = inlined_call_operand.vmem [shape: f32[2048,512], index: 1, kind: input, shape index: {}]   ;;  %s7356_s0 = inlined_call_operand.vmem [shape: f32[4,2048], index: 0, kind: input, shape index: {}]   ;;  %s7357_s2 = inlined_call_operand.vmem [shape: f32[1,512], index: 2, kind: input, shape index: {}]   ;;  %s7358_s3 = inlined_call_operand.vmem [shape: f32[512,512], index: 3, kind: input, shape index: {}]   ;;  %s7359_s5 = inlined_call_operand.vmem [shape: f32[512,128], index: 5, kind: input, shape index: {}]   ;;  %s7360_s4 = inlined_call_operand.vmem [shape: f32[1,512], index: 4, kind: input, shape index: {}]   ;;  %s7361_s6 = inlined_call_operand.vmem [shape: f32[1,128], index: 6, kind: input, shape index: {}]   ;;  %s7362_s7 = inlined_call_operand.vmem [shape: f32[4,128], index: 7, kind: output, shape index: {}]  }
   0x1   :  { %v95_v0 = vld [vmem:[%s7355_s1 + $0x1e8] sm:$0xff]  ;;  %v94_v2 = vld [vmem:[%s7355_s1 + $0x1e0] sm:$0xff] }
   0x2   :  { %v223_v1 = vld [vmem:[%s7355_s1 + $0x5e8] sm:$0xff]  ;;  %1104 = vmatprep.subr.mxu0 %v95_v0  ;;  %v222_v3 = vld [vmem:[%s7355_s1 + $0x5e0] sm:$0xff] }
   0x3   :  { %1175 = vmatprep.subr.mxu1 %v223_v1  ;;  %v91_v4 = vld [vmem:[%s7355_s1 + $0x1c8] sm:$0xff]  ;;  %1105 = vmatpush1.msra.mxu0 %v94_v2  ;;  %v90_v6 = vld [vmem:[%s7355_s1 + $0x1c0] sm:$0xff] }
   0x4   :  { %v219_v5 = vld [vmem:[%s7355_s1 + $0x5c8] sm:$0xff]  ;;  %1176 = vmatpush1.msra.mxu1 %v222_v3  ;;  %v218_v7 = vld [vmem:[%s7355_s1 + $0x5c0] sm:$0xff]  ;;  %1106 = vmatprep.subr.mxu0 %v91_v4 }
   0x5   :  { %v87_v8 = vld [vmem:[%s7355_s1 + $0x1a8] sm:$0xff]  ;;  %1177 = vmatprep.subr.mxu1 %v219_v5  ;;  %v86_v10 = vld [vmem:[%s7355_s1 + $0x1a0] sm:$0xff]  ;;  %1107 = vmatpush1.msra.mxu0 %v90_v6 }
   0x6   :  { %v215_v9 = vld [vmem:[%s7355_s1 + $0x5a8] sm:$0xff]  ;;  %v214_v11 = vld [vmem:[%s7355_s1 + $0x5a0] sm:$0xff]  ;;  %1178 = vmatpush1.msra.mxu1 %v218_v7  ;;  %1108 = vmatprep.subr.mxu0 %v87_v8 }
   0x7   :  { %v83_v12 = vld [vmem:[%s7355_s1 + $0x188] sm:$0xff]  ;;  %1179 = vmatprep.subr.mxu1 %v215_v9  ;;  %v82_v14 = vld [vmem:[%s7355_s1 + $0x180] sm:$0xff]  ;;  %1109 = vmatpush1.msra.mxu0 %v86_v10 }
   0x8   :  { %v211_v13 = vld [vmem:[%s7355_s1 + $0x588] sm:$0xff]  ;;  %v210_v15 = vld [vmem:[%s7355_s1 + $0x580] sm:$0xff]  ;;  %1180 = vmatpush1.msra.mxu1 %v214_v11  ;;  %1110 = vmatprep.subr.mxu0 %v83_v12 }
   0x9   :  { %v79_v16 = vld [vmem:[%s7355_s1 + $0x168] sm:$0xff]  ;;  %1181 = vmatprep.subr.mxu1 %v211_v13  ;;  %v78_v18 = vld [vmem:[%s7355_s1 + $0x160] sm:$0xff]  ;;  %1111 = vmatpush1.msra.mxu0 %v82_v14 }
   0xa   :  { %v207_v17 = vld [vmem:[%s7355_s1 + $0x568] sm:$0xff]  ;;  %v206_v19 = vld [vmem:[%s7355_s1 + $0x560] sm:$0xff]  ;;  %1182 = vmatpush1.msra.mxu1 %v210_v15  ;;  %1112 = vmatprep.subr.mxu0 %v79_v16 }
   0xb   :  { %v75_v20 = vld [vmem:[%s7355_s1 + $0x148] sm:$0xff]  ;;  %1183 = vmatprep.subr.mxu1 %v207_v17  ;;  %v74_v22 = vld [vmem:[%s7355_s1 + $0x140] sm:$0xff]  ;;  %1113 = vmatpush1.msra.mxu0 %v78_v18 }
   0xc   :  { %v203_v21 = vld [vmem:[%s7355_s1 + $0x548] sm:$0xff]  ;;  %v202_v23 = vld [vmem:[%s7355_s1 + $0x540] sm:$0xff]  ;;  %1184 = vmatpush1.msra.mxu1 %v206_v19  ;;  %1114 = vmatprep.subr.mxu0 %v75_v20 }
   0xd   :  { %v71_v24 = vld [vmem:[%s7355_s1 + $0x128] sm:$0xff]  ;;  %1185 = vmatprep.subr.mxu1 %v203_v21  ;;  %v70_v26 = vld [vmem:[%s7355_s1 + $0x120] sm:$0xff]  ;;  %1115 = vmatpush1.msra.mxu0 %v74_v22 }
   0xe   :  { %v199_v25 = vld [vmem:[%s7355_s1 + $0x528] sm:$0xff]  ;;  %v198_v27 = vld [vmem:[%s7355_s1 + $0x520] sm:$0xff]  ;;  %1186 = vmatpush1.msra.mxu1 %v202_v23  ;;  %1116 = vmatprep.subr.mxu0 %v71_v24 }
   0xf   :  { %v67_v28 = vld [vmem:[%s7355_s1 + $0x108] sm:$0xff]  ;;  %1187 = vmatprep.subr.mxu1 %v199_v25  ;;  %v66_v30 = vld [vmem:[%s7355_s1 + $0x100] sm:$0xff]  ;;  %1117 = vmatpush1.msra.mxu0 %v70_v26 }
  0x10   :  { %v195_v29 = vld [vmem:[%s7355_s1 + $0x508] sm:$0xff]  ;;  %v194_v31 = vld [vmem:[%s7355_s1 + $0x500] sm:$0xff]  ;;  %1188 = vmatpush1.msra.mxu1 %v198_v27  ;;  %1118 = vmatprep.subr.mxu0 %v67_v28 }
  0x11   :  { %v63_v32 = vld [vmem:[%s7355_s1 + $0xe8] sm:$0xff]  ;;  %1189 = vmatprep.subr.mxu1 %v195_v29  ;;  %v62_v34 = vld [vmem:[%s7355_s1 + $0xe0] sm:$0xff]  ;;  %1119 = vmatpush1.msra.mxu0 %v66_v30 }
  0x12   :  { %v191_v33 = vld [vmem:[%s7355_s1 + $0x4e8] sm:$0xff]  ;;  %v190_v35 = vld [vmem:[%s7355_s1 + $0x4e0] sm:$0xff]  ;;  %1190 = vmatpush1.msra.mxu1 %v194_v31  ;;  %1120 = vmatprep.subr.mxu0 %v63_v32 }
  0x13   :  { %v59_v36 = vld [vmem:[%s7355_s1 + $0xc8] sm:$0xff]  ;;  %1191 = vmatprep.subr.mxu1 %v191_v33  ;;  %v58_v38 = vld [vmem:[%s7355_s1 + $0xc0] sm:$0xff]  ;;  %1121 = vmatpush1.msra.mxu0 %v62_v34 }
  0x14   :  { %v187_v37 = vld [vmem:[%s7355_s1 + $0x4c8] sm:$0xff]  ;;  %v186_v39 = vld [vmem:[%s7355_s1 + $0x4c0] sm:$0xff]  ;;  %1192 = vmatpush1.msra.mxu1 %v190_v35  ;;  %1122 = vmatprep.subr.mxu0 %v59_v36 }
  0x15   :  { %v55_v40 = vld [vmem:[%s7355_s1 + $0xa8] sm:$0xff]  ;;  %1193 = vmatprep.subr.mxu1 %v187_v37  ;;  %v54_v42 = vld [vmem:[%s7355_s1 + $0xa0] sm:$0xff]  ;;  %1123 = vmatpush1.msra.mxu0 %v58_v38 }
  0x16   :  { %v183_v41 = vld [vmem:[%s7355_s1 + $0x4a8] sm:$0xff]  ;;  %v182_v43 = vld [vmem:[%s7355_s1 + $0x4a0] sm:$0xff]  ;;  %1194 = vmatpush1.msra.mxu1 %v186_v39  ;;  %1124 = vmatprep.subr.mxu0 %v55_v40 }
  0x17   :  { %v51_v44 = vld [vmem:[%s7355_s1 + $0x88] sm:$0xff]  ;;  %1195 = vmatprep.subr.mxu1 %v183_v41  ;;  %v50_v46 = vld [vmem:[%s7355_s1 + $0x80] sm:$0xff]  ;;  %1125 = vmatpush1.msra.mxu0 %v54_v42 }
  0x18   :  { %v179_v45 = vld [vmem:[%s7355_s1 + $0x488] sm:$0xff]  ;;  %v178_v47 = vld [vmem:[%s7355_s1 + $0x480] sm:$0xff]  ;;  %1196 = vmatpush1.msra.mxu1 %v182_v43  ;;  %1126 = vmatprep.subr.mxu0 %v51_v44 }
  0x19   :  { %v47_v48 = vld [vmem:[%s7355_s1 + $0x68] sm:$0xff]  ;;  %1197 = vmatprep.subr.mxu1 %v179_v45  ;;  %v46_v50 = vld [vmem:[%s7355_s1 + $0x60] sm:$0xff]  ;;  %1127 = vmatpush1.msra.mxu0 %v50_v46 }
  0x1a   :  { %v175_v49 = vld [vmem:[%s7355_s1 + $0x468] sm:$0xff]  ;;  %v174_v51 = vld [vmem:[%s7355_s1 + $0x460] sm:$0xff]  ;;  %1198 = vmatpush1.msra.mxu1 %v178_v47  ;;  %1128 = vmatprep.subr.mxu0 %v47_v48 }
  0x1b   :  { %v43_v52 = vld [vmem:[%s7355_s1 + $0x48] sm:$0xff]  ;;  %1199 = vmatprep.subr.mxu1 %v175_v49  ;;  %v42_v54 = vld [vmem:[%s7355_s1 + $0x40] sm:$0xff]  ;;  %1129 = vmatpush1.msra.mxu0 %v46_v50 }
  0x1c   :  { %v171_v53 = vld [vmem:[%s7355_s1 + $0x448] sm:$0xff]  ;;  %v170_v55 = vld [vmem:[%s7355_s1 + $0x440] sm:$0xff]  ;;  %1200 = vmatpush1.msra.mxu1 %v174_v51  ;;  %1130 = vmatprep.subr.mxu0 %v43_v52 }
  0x1d   :  { %v39_v56 = vld [vmem:[%s7355_s1 + $0x28] sm:$0xff]  ;;  %1201 = vmatprep.subr.mxu1 %v171_v53  ;;  %v38_v58 = vld [vmem:[%s7355_s1 + $0x20] sm:$0xff]  ;;  %1131 = vmatpush1.msra.mxu0 %v42_v54 }
  0x1e   :  { %v167_v57 = vld [vmem:[%s7355_s1 + $0x428] sm:$0xff]  ;;  %v166_v59 = vld [vmem:[%s7355_s1 + $0x420] sm:$0xff]  ;;  %1202 = vmatpush1.msra.mxu1 %v170_v55  ;;  %1132 = vmatprep.subr.mxu0 %v39_v56 }
  0x1f   :  { %v35_v60 = vld [vmem:[%s7355_s1 + $0x8] sm:$0xff]  ;;  %1203 = vmatprep.subr.mxu1 %v167_v57  ;;  %v34_v62 = vld [vmem:[%s7355_s1] sm:$0xff]  ;;  %1133 = vmatpush1.msra.mxu0 %v38_v58 }
  0x20   :  { %v163_v61 = vld [vmem:[%s7355_s1 + $0x408] sm:$0xff]  ;;  %v162_v63 = vld [vmem:[%s7355_s1 + $0x400] sm:$0xff]  ;;  %1204 = vmatpush1.msra.mxu1 %v166_v59  ;;  %1134 = vmatprep.subr.mxu0 %v35_v60 }
  0x21   :  { %v159_v0 = vld [vmem:[%s7355_s1 + $0x3e8] sm:$0xff]  ;;  %1205 = vmatprep.subr.mxu1 %v163_v61  ;;  %v158_v2 = vld [vmem:[%s7355_s1 + $0x3e0] sm:$0xff]  ;;  %1135 = vmatpush1.msra.mxu0 %v34_v62 }
  0x22   :  { %v287_v1 = vld [vmem:[%s7355_s1 + $0x7e8] sm:$0xff]  ;;  %v286_v3 = vld [vmem:[%s7355_s1 + $0x7e0] sm:$0xff]  ;;  %1206 = vmatpush1.msra.mxu1 %v162_v63  ;;  %1136 = vmatprep.subr.mxu0 %v159_v0 }
  0x23   :  { %v155_v4 = vld [vmem:[%s7355_s1 + $0x3c8] sm:$0xff]  ;;  %1207 = vmatprep.subr.mxu1 %v287_v1  ;;  %v154_v6 = vld [vmem:[%s7355_s1 + $0x3c0] sm:$0xff]  ;;  %1137 = vmatpush2.msra.mxu0 %v158_v2 }
  0x24   :  { %v283_v5 = vld [vmem:[%s7355_s1 + $0x7c8] sm:$0xff]  ;;  %v282_v7 = vld [vmem:[%s7355_s1 + $0x7c0] sm:$0xff]  ;;  %1208 = vmatpush2.msra.mxu1 %v286_v3  ;;  %1138 = vmatprep.subr.mxu0 %v155_v4 }
  0x25   :  { %v151_v8 = vld [vmem:[%s7355_s1 + $0x3a8] sm:$0xff]  ;;  %1209 = vmatprep.subr.mxu1 %v283_v5  ;;  %v150_v10 = vld [vmem:[%s7355_s1 + $0x3a0] sm:$0xff]  ;;  %1139 = vmatpush2.msra.mxu0 %v154_v6 }
  0x26   :  { %v279_v9 = vld [vmem:[%s7355_s1 + $0x7a8] sm:$0xff]  ;;  %v278_v11 = vld [vmem:[%s7355_s1 + $0x7a0] sm:$0xff]  ;;  %1210 = vmatpush2.msra.mxu1 %v282_v7  ;;  %1140 = vmatprep.subr.mxu0 %v151_v8 }
  0x27   :  { %v147_v12 = vld [vmem:[%s7355_s1 + $0x388] sm:$0xff]  ;;  %1211 = vmatprep.subr.mxu1 %v279_v9  ;;  %v146_v14 = vld [vmem:[%s7355_s1 + $0x380] sm:$0xff]  ;;  %1141 = vmatpush2.msra.mxu0 %v150_v10 }
  0x28   :  { %v275_v13 = vld [vmem:[%s7355_s1 + $0x788] sm:$0xff]  ;;  %v274_v15 = vld [vmem:[%s7355_s1 + $0x780] sm:$0xff]  ;;  %1212 = vmatpush2.msra.mxu1 %v278_v11  ;;  %1142 = vmatprep.subr.mxu0 %v147_v12 }
  0x29   :  { %v143_v16 = vld [vmem:[%s7355_s1 + $0x368] sm:$0xff]  ;;  %1213 = vmatprep.subr.mxu1 %v275_v13  ;;  %v142_v18 = vld [vmem:[%s7355_s1 + $0x360] sm:$0xff]  ;;  %1143 = vmatpush2.msra.mxu0 %v146_v14 }
  0x2a   :  { %v271_v17 = vld [vmem:[%s7355_s1 + $0x768] sm:$0xff]  ;;  %v270_v19 = vld [vmem:[%s7355_s1 + $0x760] sm:$0xff]  ;;  %1214 = vmatpush2.msra.mxu1 %v274_v15  ;;  %1144 = vmatprep.subr.mxu0 %v143_v16 }
  0x2b   :  { %v139_v20 = vld [vmem:[%s7355_s1 + $0x348] sm:$0xff]  ;;  %1215 = vmatprep.subr.mxu1 %v271_v17  ;;  %v138_v22 = vld [vmem:[%s7355_s1 + $0x340] sm:$0xff]  ;;  %1145 = vmatpush2.msra.mxu0 %v142_v18 }
  0x2c   :  { %v267_v21 = vld [vmem:[%s7355_s1 + $0x748] sm:$0xff]  ;;  %v266_v23 = vld [vmem:[%s7355_s1 + $0x740] sm:$0xff]  ;;  %1216 = vmatpush2.msra.mxu1 %v270_v19  ;;  %1146 = vmatprep.subr.mxu0 %v139_v20 }
  0x2d   :  { %v135_v24 = vld [vmem:[%s7355_s1 + $0x328] sm:$0xff]  ;;  %1217 = vmatprep.subr.mxu1 %v267_v21  ;;  %v134_v26 = vld [vmem:[%s7355_s1 + $0x320] sm:$0xff]  ;;  %1147 = vmatpush2.msra.mxu0 %v138_v22 }
  0x2e   :  { %v263_v25 = vld [vmem:[%s7355_s1 + $0x728] sm:$0xff]  ;;  %v262_v27 = vld [vmem:[%s7355_s1 + $0x720] sm:$0xff]  ;;  %1218 = vmatpush2.msra.mxu1 %v266_v23  ;;  %1148 = vmatprep.subr.mxu0 %v135_v24 }
  0x2f   :  { %v131_v28 = vld [vmem:[%s7355_s1 + $0x308] sm:$0xff]  ;;  %1219 = vmatprep.subr.mxu1 %v263_v25  ;;  %v130_v30 = vld [vmem:[%s7355_s1 + $0x300] sm:$0xff]  ;;  %1149 = vmatpush2.msra.mxu0 %v134_v26 }
  0x30   :  { %v259_v29 = vld [vmem:[%s7355_s1 + $0x708] sm:$0xff]  ;;  %v258_v31 = vld [vmem:[%s7355_s1 + $0x700] sm:$0xff]  ;;  %1220 = vmatpush2.msra.mxu1 %v262_v27  ;;  %1150 = vmatprep.subr.mxu0 %v131_v28 }
  0x31   :  { %v127_v32 = vld [vmem:[%s7355_s1 + $0x2e8] sm:$0xff]  ;;  %1221 = vmatprep.subr.mxu1 %v259_v29  ;;  %v126_v34 = vld [vmem:[%s7355_s1 + $0x2e0] sm:$0xff]  ;;  %1151 = vmatpush2.msra.mxu0 %v130_v30 }
  0x32   :  { %v255_v33 = vld [vmem:[%s7355_s1 + $0x6e8] sm:$0xff]  ;;  %v254_v35 = vld [vmem:[%s7355_s1 + $0x6e0] sm:$0xff]  ;;  %1222 = vmatpush2.msra.mxu1 %v258_v31  ;;  %1152 = vmatprep.subr.mxu0 %v127_v32 }
  0x33   :  { %v123_v36 = vld [vmem:[%s7355_s1 + $0x2c8] sm:$0xff]  ;;  %1223 = vmatprep.subr.mxu1 %v255_v33  ;;  %v122_v38 = vld [vmem:[%s7355_s1 + $0x2c0] sm:$0xff]  ;;  %1153 = vmatpush2.msra.mxu0 %v126_v34 }
  0x34   :  { %v251_v37 = vld [vmem:[%s7355_s1 + $0x6c8] sm:$0xff]  ;;  %v250_v39 = vld [vmem:[%s7355_s1 + $0x6c0] sm:$0xff]  ;;  %1224 = vmatpush2.msra.mxu1 %v254_v35  ;;  %1154 = vmatprep.subr.mxu0 %v123_v36 }
  0x35   :  { %v119_v40 = vld [vmem:[%s7355_s1 + $0x2a8] sm:$0xff]  ;;  %1225 = vmatprep.subr.mxu1 %v251_v37  ;;  %v118_v42 = vld [vmem:[%s7355_s1 + $0x2a0] sm:$0xff]  ;;  %1155 = vmatpush2.msra.mxu0 %v122_v38 }
  0x36   :  { %v247_v41 = vld [vmem:[%s7355_s1 + $0x6a8] sm:$0xff]  ;;  %v246_v43 = vld [vmem:[%s7355_s1 + $0x6a0] sm:$0xff]  ;;  %1226 = vmatpush2.msra.mxu1 %v250_v39  ;;  %1156 = vmatprep.subr.mxu0 %v119_v40 }
  0x37   :  { %v115_v44 = vld [vmem:[%s7355_s1 + $0x288] sm:$0xff]  ;;  %1227 = vmatprep.subr.mxu1 %v247_v41  ;;  %v114_v46 = vld [vmem:[%s7355_s1 + $0x280] sm:$0xff]  ;;  %1157 = vmatpush2.msra.mxu0 %v118_v42 }
  0x38   :  { %v243_v45 = vld [vmem:[%s7355_s1 + $0x688] sm:$0xff]  ;;  %v242_v47 = vld [vmem:[%s7355_s1 + $0x680] sm:$0xff]  ;;  %1228 = vmatpush2.msra.mxu1 %v246_v43  ;;  %1158 = vmatprep.subr.mxu0 %v115_v44 }
  0x39   :  { %v111_v48 = vld [vmem:[%s7355_s1 + $0x268] sm:$0xff]  ;;  %1229 = vmatprep.subr.mxu1 %v243_v45  ;;  %v110_v50 = vld [vmem:[%s7355_s1 + $0x260] sm:$0xff]  ;;  %1159 = vmatpush2.msra.mxu0 %v114_v46 }
  0x3a   :  { %v239_v49 = vld [vmem:[%s7355_s1 + $0x668] sm:$0xff]  ;;  %v238_v51 = vld [vmem:[%s7355_s1 + $0x660] sm:$0xff]  ;;  %1230 = vmatpush2.msra.mxu1 %v242_v47  ;;  %1160 = vmatprep.subr.mxu0 %v111_v48 }
  0x3b   :  { %v107_v52 = vld [vmem:[%s7355_s1 + $0x248] sm:$0xff]  ;;  %1231 = vmatprep.subr.mxu1 %v239_v49  ;;  %v106_v54 = vld [vmem:[%s7355_s1 + $0x240] sm:$0xff]  ;;  %1161 = vmatpush2.msra.mxu0 %v110_v50 }
  0x3c   :  { %v235_v53 = vld [vmem:[%s7355_s1 + $0x648] sm:$0xff]  ;;  %v234_v55 = vld [vmem:[%s7355_s1 + $0x640] sm:$0xff]  ;;  %1232 = vmatpush2.msra.mxu1 %v238_v51  ;;  %1162 = vmatprep.subr.mxu0 %v107_v52 }
  0x3d   :  { %v26_v56 = vld [vmem:[%s7356_s0] sm:$0xff]  ;;  %v103_v57 = vld [vmem:[%s7355_s1 + $0x228] sm:$0xff]  ;;  %1233 = vmatprep.subr.mxu1 %v235_v53  ;;  %1163 = vmatpush2.msra.mxu0 %v106_v54 }
  0x3e   :  { %v231_v58 = vld [vmem:[%s7355_s1 + $0x628] sm:$0xff]  ;;  %v102_v59 = vld [vmem:[%s7355_s1 + $0x220] sm:$0xff]  ;;  %1234 = vmatpush2.msra.mxu1 %v234_v55  ;;  %v3539_v0 = vcombine.high %v26_v56, %v26_v56  ;;  %1164 = vmatprep.subr.mxu0 %v103_v57 }
  0x3f   :  { %v230_v60 = vld [vmem:[%s7355_s1 + $0x620] sm:$0xff]  ;;  %v27_v61 = vld [vmem:[%s7356_s0 + $0x8] sm:$0xff]  ;;  %1235 = vmatprep.subr.mxu1 %v231_v58  ;;  %1165 = vmatpush2.msra.mxu0 %v102_v59 }
  0x40   :  { %v99_v62 = vld [vmem:[%s7355_s1 + $0x208] sm:$0xff]  ;;  %v98_v1 = vld [vmem:[%s7355_s1 + $0x200] sm:$0xff]  ;;  %1236 = vmatpush2.msra.mxu1 %v230_v60  ;;  %v3547_v3 = vcombine.high %v27_v61, %v27_v61  ;;  %1168 = vmatprep.mubr.f32.mxu0 %v3539_v0 }
  0x41   :  { %v227_v63 = vld [vmem:[%s7355_s1 + $0x608] sm:$0xff]  ;;  %v226_v2 = vld [vmem:[%s7355_s1 + $0x600] sm:$0xff]  ;;  %1166 = vmatprep.subr.mxu0 %v99_v62 }
  0x42   :  { %1237 = vmatprep.subr.mxu1 %v227_v63  ;;  %v351_v4 = vld [vmem:[%s7355_s1 + $0x9e8] sm:$0xff]  ;;  %1167 = vmatpush2.msra.mxu0 %v98_v1  ;;  %v350_v6 = vld [vmem:[%s7355_s1 + $0x9e0] sm:$0xff] }
  0x43   :  { %v479_v5 = vld [vmem:[%s7355_s1 + $0xde8] sm:$0xff]  ;;  %1238 = vmatpush2.msra.mxu1 %v226_v2  ;;  %1169 = vmatmul.mubr.f32.vlgmr.msra.gmra.mxu0 %v26_v56  ;;  %v478_v7 = vld [vmem:[%s7355_s1 + $0xde0] sm:$0xff] }
  0x44   :  { %1239 = vmatprep.mubr.f32.mxu1 %v3547_v3  ;;  %1246 = vmatprep.subr.mxu0 %v351_v4  ;;  %v347_v8 = vld [vmem:[%s7355_s1 + $0x9c8] sm:$0xff]  ;;  %v346_v10 = vld [vmem:[%s7355_s1 + $0x9c0] sm:$0xff] }
  0x45   :  { %v475_v9 = vld [vmem:[%s7355_s1 + $0xdc8] sm:$0xff]  ;;  %1317 = vmatprep.subr.mxu1 %v479_v5  ;;  %1240 = vmatmul.mubr.f32.vlgmr.msra.gmra.mxu1 %v27_v61  ;;  %v474_v11 = vld [vmem:[%s7355_s1 + $0xdc0] sm:$0xff] }
  0x46   :  { %1247 = vmatpush1.msra.mxu0 %v350_v6  ;;  %1318 = vmatpush1.msra.mxu1 %v478_v7  ;;  %v343_v12 = vld [vmem:[%s7355_s1 + $0x9a8] sm:$0xff]  ;;  %v342_v14 = vld [vmem:[%s7355_s1 + $0x9a0] sm:$0xff] }
  0x47   :  { %v471_v13 = vld [vmem:[%s7355_s1 + $0xda8] sm:$0xff]  ;;  %1248 = vmatprep.subr.mxu0 %v347_v8  ;;  %1319 = vmatprep.subr.mxu1 %v475_v9  ;;  %v470_v15 = vld [vmem:[%s7355_s1 + $0xda0] sm:$0xff] }
  0x48   :  { %1249 = vmatpush1.msra.mxu0 %v346_v10  ;;  %1320 = vmatpush1.msra.mxu1 %v474_v11  ;;  %v339_v16 = vld [vmem:[%s7355_s1 + $0x988] sm:$0xff]  ;;  %v338_v18 = vld [vmem:[%s7355_s1 + $0x980] sm:$0xff] }
  0x49   :  { %v467_v17 = vld [vmem:[%s7355_s1 + $0xd88] sm:$0xff]  ;;  %1250 = vmatprep.subr.mxu0 %v343_v12  ;;  %1321 = vmatprep.subr.mxu1 %v471_v13  ;;  %v466_v19 = vld [vmem:[%s7355_s1 + $0xd80] sm:$0xff] }
  0x4a   :  { %1251 = vmatpush1.msra.mxu0 %v342_v14  ;;  %1322 = vmatpush1.msra.mxu1 %v470_v15  ;;  %v335_v20 = vld [vmem:[%s7355_s1 + $0x968] sm:$0xff]  ;;  %v334_v22 = vld [vmem:[%s7355_s1 + $0x960] sm:$0xff] }
  0x4b   :  { %v463_v21 = vld [vmem:[%s7355_s1 + $0xd68] sm:$0xff]  ;;  %1252 = vmatprep.subr.mxu0 %v339_v16  ;;  %1323 = vmatprep.subr.mxu1 %v467_v17  ;;  %v462_v23 = vld [vmem:[%s7355_s1 + $0xd60] sm:$0xff] }
  0x4c   :  { %1253 = vmatpush1.msra.mxu0 %v338_v18  ;;  %1324 = vmatpush1.msra.mxu1 %v466_v19  ;;  %v331_v24 = vld [vmem:[%s7355_s1 + $0x948] sm:$0xff]  ;;  %v330_v26 = vld [vmem:[%s7355_s1 + $0x940] sm:$0xff] }
  0x4d   :  { %v459_v25 = vld [vmem:[%s7355_s1 + $0xd48] sm:$0xff]  ;;  %1254 = vmatprep.subr.mxu0 %v335_v20  ;;  %1325 = vmatprep.subr.mxu1 %v463_v21  ;;  %v458_v27 = vld [vmem:[%s7355_s1 + $0xd40] sm:$0xff] }
  0x4e   :  { %1255 = vmatpush1.msra.mxu0 %v334_v22  ;;  %1326 = vmatpush1.msra.mxu1 %v462_v23  ;;  %v327_v28 = vld [vmem:[%s7355_s1 + $0x928] sm:$0xff]  ;;  %v326_v30 = vld [vmem:[%s7355_s1 + $0x920] sm:$0xff] }
  0x4f   :  { %v455_v29 = vld [vmem:[%s7355_s1 + $0xd28] sm:$0xff]  ;;  %1256 = vmatprep.subr.mxu0 %v331_v24  ;;  %1327 = vmatprep.subr.mxu1 %v459_v25  ;;  %v454_v31 = vld [vmem:[%s7355_s1 + $0xd20] sm:$0xff] }
  0x50   :  { %1257 = vmatpush1.msra.mxu0 %v330_v26  ;;  %1328 = vmatpush1.msra.mxu1 %v458_v27  ;;  %v323_v32 = vld [vmem:[%s7355_s1 + $0x908] sm:$0xff]  ;;  %v322_v34 = vld [vmem:[%s7355_s1 + $0x900] sm:$0xff] }
  0x51   :  { %v451_v33 = vld [vmem:[%s7355_s1 + $0xd08] sm:$0xff]  ;;  %1258 = vmatprep.subr.mxu0 %v327_v28  ;;  %1329 = vmatprep.subr.mxu1 %v455_v29  ;;  %v450_v35 = vld [vmem:[%s7355_s1 + $0xd00] sm:$0xff] }
  0x52   :  { %1259 = vmatpush1.msra.mxu0 %v326_v30  ;;  %1330 = vmatpush1.msra.mxu1 %v454_v31  ;;  %v319_v36 = vld [vmem:[%s7355_s1 + $0x8e8] sm:$0xff]  ;;  %v318_v38 = vld [vmem:[%s7355_s1 + $0x8e0] sm:$0xff] }
  0x53   :  { %v447_v37 = vld [vmem:[%s7355_s1 + $0xce8] sm:$0xff]  ;;  %1260 = vmatprep.subr.mxu0 %v323_v32  ;;  %1331 = vmatprep.subr.mxu1 %v451_v33  ;;  %v446_v39 = vld [vmem:[%s7355_s1 + $0xce0] sm:$0xff] }
  0x54   :  { %1261 = vmatpush1.msra.mxu0 %v322_v34  ;;  %1332 = vmatpush1.msra.mxu1 %v450_v35  ;;  %v315_v40 = vld [vmem:[%s7355_s1 + $0x8c8] sm:$0xff]  ;;  %v314_v42 = vld [vmem:[%s7355_s1 + $0x8c0] sm:$0xff] }
  0x55   :  { %v443_v41 = vld [vmem:[%s7355_s1 + $0xcc8] sm:$0xff]  ;;  %1262 = vmatprep.subr.mxu0 %v319_v36  ;;  %1333 = vmatprep.subr.mxu1 %v447_v37  ;;  %v442_v43 = vld [vmem:[%s7355_s1 + $0xcc0] sm:$0xff] }
  0x56   :  { %1263 = vmatpush1.msra.mxu0 %v318_v38  ;;  %1334 = vmatpush1.msra.mxu1 %v446_v39  ;;  %v311_v44 = vld [vmem:[%s7355_s1 + $0x8a8] sm:$0xff]  ;;  %v310_v46 = vld [vmem:[%s7355_s1 + $0x8a0] sm:$0xff] }
  0x57   :  { %v439_v45 = vld [vmem:[%s7355_s1 + $0xca8] sm:$0xff]  ;;  %1264 = vmatprep.subr.mxu0 %v315_v40  ;;  %1335 = vmatprep.subr.mxu1 %v443_v41  ;;  %v438_v47 = vld [vmem:[%s7355_s1 + $0xca0] sm:$0xff] }
  0x58   :  { %1265 = vmatpush1.msra.mxu0 %v314_v42  ;;  %1336 = vmatpush1.msra.mxu1 %v442_v43  ;;  %v307_v48 = vld [vmem:[%s7355_s1 + $0x888] sm:$0xff]  ;;  %v306_v50 = vld [vmem:[%s7355_s1 + $0x880] sm:$0xff] }
  0x59   :  { %v435_v49 = vld [vmem:[%s7355_s1 + $0xc88] sm:$0xff]  ;;  %1266 = vmatprep.subr.mxu0 %v311_v44  ;;  %1337 = vmatprep.subr.mxu1 %v439_v45  ;;  %v434_v51 = vld [vmem:[%s7355_s1 + $0xc80] sm:$0xff] }
  0x5a   :  { %1267 = vmatpush1.msra.mxu0 %v310_v46  ;;  %1338 = vmatpush1.msra.mxu1 %v438_v47  ;;  %v303_v52 = vld [vmem:[%s7355_s1 + $0x868] sm:$0xff]  ;;  %v302_v54 = vld [vmem:[%s7355_s1 + $0x860] sm:$0xff] }
  0x5b   :  { %v431_v53 = vld [vmem:[%s7355_s1 + $0xc68] sm:$0xff]  ;;  %1268 = vmatprep.subr.mxu0 %v307_v48  ;;  %1339 = vmatprep.subr.mxu1 %v435_v49  ;;  %v430_v55 = vld [vmem:[%s7355_s1 + $0xc60] sm:$0xff] }
  0x5c   :  { %1269 = vmatpush1.msra.mxu0 %v306_v50  ;;  %1340 = vmatpush1.msra.mxu1 %v434_v51  ;;  %v299_v56 = vld [vmem:[%s7355_s1 + $0x848] sm:$0xff]  ;;  %v298_v58 = vld [vmem:[%s7355_s1 + $0x840] sm:$0xff] }
  0x5d   :  { %v427_v57 = vld [vmem:[%s7355_s1 + $0xc48] sm:$0xff]  ;;  %1270 = vmatprep.subr.mxu0 %v303_v52  ;;  %1341 = vmatprep.subr.mxu1 %v431_v53  ;;  %v426_v59 = vld [vmem:[%s7355_s1 + $0xc40] sm:$0xff] }
  0x5e   :  { %1271 = vmatpush1.msra.mxu0 %v302_v54  ;;  %1342 = vmatpush1.msra.mxu1 %v430_v55  ;;  %v295_v60 = vld [vmem:[%s7355_s1 + $0x828] sm:$0xff]  ;;  %v294_v62 = vld [vmem:[%s7355_s1 + $0x820] sm:$0xff] }
  0x5f   :  { %v423_v61 = vld [vmem:[%s7355_s1 + $0xc28] sm:$0xff]  ;;  %1272 = vmatprep.subr.mxu0 %v299_v56  ;;  %1343 = vmatprep.subr.mxu1 %v427_v57  ;;  %v422_v63 = vld [vmem:[%s7355_s1 + $0xc20] sm:$0xff] }
  0x60   :  { %1273 = vmatpush1.msra.mxu0 %v298_v58  ;;  %1344 = vmatpush1.msra.mxu1 %v426_v59  ;;  %v291_v1 = vld [vmem:[%s7355_s1 + $0x808] sm:$0xff]  ;;  %v290_v4 = vld [vmem:[%s7355_s1 + $0x800] sm:$0xff] }
  0x61   :  { %v419_v2 = vld [vmem:[%s7355_s1 + $0xc08] sm:$0xff]  ;;  %1274 = vmatprep.subr.mxu0 %v295_v60  ;;  %1345 = vmatprep.subr.mxu1 %v423_v61  ;;  %v418_v5 = vld [vmem:[%s7355_s1 + $0xc00] sm:$0xff] }
  0x62   :  { %1275 = vmatpush1.msra.mxu0 %v294_v62  ;;  %1346 = vmatpush1.msra.mxu1 %v422_v63  ;;  %v415_v6 = vld [vmem:[%s7355_s1 + $0xbe8] sm:$0xff]  ;;  %v414_v8 = vld [vmem:[%s7355_s1 + $0xbe0] sm:$0xff]  ;;  %v28_v62 = vld [vmem:[%s7356_s0 + $0x10] sm:$0xff] }
  0x63   :  { %v543_v7 = vld [vmem:[%s7355_s1 + $0xfe8] sm:$0xff]  ;;  %1276 = vmatprep.subr.mxu0 %v291_v1  ;;  %1347 = vmatprep.subr.mxu1 %v419_v2  ;;  %v542_v9 = vld [vmem:[%s7355_s1 + $0xfe0] sm:$0xff] }
  0x64   :  { %1277 = vmatpush1.msra.mxu0 %v290_v4  ;;  %1348 = vmatpush1.msra.mxu1 %v418_v5  ;;  %v411_v10 = vld [vmem:[%s7355_s1 + $0xbc8] sm:$0xff]  ;;  %v410_v12 = vld [vmem:[%s7355_s1 + $0xbc0] sm:$0xff]  ;;  %v29_v5 = vld [vmem:[%s7356_s0 + $0x18] sm:$0xff] }
  0x65   :  { %v539_v11 = vld [vmem:[%s7355_s1 + $0xfc8] sm:$0xff]  ;;  %1278 = vmatprep.subr.mxu0 %v415_v6  ;;  %1349 = vmatprep.subr.mxu1 %v543_v7  ;;  %v538_v13 = vld [vmem:[%s7355_s1 + $0xfc0] sm:$0xff] }
  0x66   :  { %1279 = vmatpush2.msra.mxu0 %v414_v8  ;;  %1350 = vmatpush2.msra.mxu1 %v542_v9  ;;  %v407_v14 = vld [vmem:[%s7355_s1 + $0xba8] sm:$0xff]  ;;  %v406_v16 = vld [vmem:[%s7355_s1 + $0xba0] sm:$0xff]  ;;  %v3935_v8 = vcombine.high %v28_v62, %v28_v62 }
  0x67   :  { %v535_v15 = vld [vmem:[%s7355_s1 + $0xfa8] sm:$0xff]  ;;  %1280 = vmatprep.subr.mxu0 %v411_v10  ;;  %1351 = vmatprep.subr.mxu1 %v539_v11  ;;  %v534_v17 = vld [vmem:[%s7355_s1 + $0xfa0] sm:$0xff]  ;;  %v3943_v11 = vcombine.high %v29_v5, %v29_v5 }
  0x68   :  { %1281 = vmatpush2.msra.mxu0 %v410_v12  ;;  %1352 = vmatpush2.msra.mxu1 %v538_v13  ;;  %v403_v18 = vld [vmem:[%s7355_s1 + $0xb88] sm:$0xff]  ;;  %v402_v20 = vld [vmem:[%s7355_s1 + $0xb80] sm:$0xff] }
  0x69   :  { %v531_v19 = vld [vmem:[%s7355_s1 + $0xf88] sm:$0xff]  ;;  %1282 = vmatprep.subr.mxu0 %v407_v14  ;;  %1353 = vmatprep.subr.mxu1 %v535_v15  ;;  %v530_v21 = vld [vmem:[%s7355_s1 + $0xf80] sm:$0xff] }
  0x6a   :  { %1283 = vmatpush2.msra.mxu0 %v406_v16  ;;  %1354 = vmatpush2.msra.mxu1 %v534_v17  ;;  %v399_v22 = vld [vmem:[%s7355_s1 + $0xb68] sm:$0xff]  ;;  %v398_v24 = vld [vmem:[%s7355_s1 + $0xb60] sm:$0xff] }
  0x6b   :  { %v527_v23 = vld [vmem:[%s7355_s1 + $0xf68] sm:$0xff]  ;;  %1284 = vmatprep.subr.mxu0 %v403_v18  ;;  %1355 = vmatprep.subr.mxu1 %v531_v19  ;;  %v526_v25 = vld [vmem:[%s7355_s1 + $0xf60] sm:$0xff] }
  0x6c   :  { %1285 = vmatpush2.msra.mxu0 %v402_v20  ;;  %1356 = vmatpush2.msra.mxu1 %v530_v21  ;;  %v395_v26 = vld [vmem:[%s7355_s1 + $0xb48] sm:$0xff]  ;;  %v394_v28 = vld [vmem:[%s7355_s1 + $0xb40] sm:$0xff] }
  0x6d   :  { %v523_v27 = vld [vmem:[%s7355_s1 + $0xf48] sm:$0xff]  ;;  %1286 = vmatprep.subr.mxu0 %v399_v22  ;;  %1357 = vmatprep.subr.mxu1 %v527_v23  ;;  %v522_v29 = vld [vmem:[%s7355_s1 + $0xf40] sm:$0xff] }
  0x6e   :  { %1287 = vmatpush2.msra.mxu0 %v398_v24  ;;  %1358 = vmatpush2.msra.mxu1 %v526_v25  ;;  %v391_v30 = vld [vmem:[%s7355_s1 + $0xb28] sm:$0xff]  ;;  %v390_v32 = vld [vmem:[%s7355_s1 + $0xb20] sm:$0xff] }
  0x6f   :  { %v519_v31 = vld [vmem:[%s7355_s1 + $0xf28] sm:$0xff]  ;;  %1288 = vmatprep.subr.mxu0 %v395_v26  ;;  %1359 = vmatprep.subr.mxu1 %v523_v27  ;;  %v518_v33 = vld [vmem:[%s7355_s1 + $0xf20] sm:$0xff] }
  0x70   :  { %1289 = vmatpush2.msra.mxu0 %v394_v28  ;;  %1360 = vmatpush2.msra.mxu1 %v522_v29  ;;  %v387_v34 = vld [vmem:[%s7355_s1 + $0xb08] sm:$0xff]  ;;  %v386_v36 = vld [vmem:[%s7355_s1 + $0xb00] sm:$0xff] }
  0x71   :  { %v515_v35 = vld [vmem:[%s7355_s1 + $0xf08] sm:$0xff]  ;;  %1290 = vmatprep.subr.mxu0 %v391_v30  ;;  %1361 = vmatprep.subr.mxu1 %v519_v31  ;;  %v514_v37 = vld [vmem:[%s7355_s1 + $0xf00] sm:$0xff] }
  0x72   :  { %1291 = vmatpush2.msra.mxu0 %v390_v32  ;;  %1362 = vmatpush2.msra.mxu1 %v518_v33  ;;  %v383_v38 = vld [vmem:[%s7355_s1 + $0xae8] sm:$0xff]  ;;  %v382_v40 = vld [vmem:[%s7355_s1 + $0xae0] sm:$0xff] }
  0x73   :  { %v511_v39 = vld [vmem:[%s7355_s1 + $0xee8] sm:$0xff]  ;;  %1292 = vmatprep.subr.mxu0 %v387_v34  ;;  %1363 = vmatprep.subr.mxu1 %v515_v35  ;;  %v510_v41 = vld [vmem:[%s7355_s1 + $0xee0] sm:$0xff] }
  0x74   :  { %1293 = vmatpush2.msra.mxu0 %v386_v36  ;;  %1364 = vmatpush2.msra.mxu1 %v514_v37  ;;  %v379_v42 = vld [vmem:[%s7355_s1 + $0xac8] sm:$0xff]  ;;  %v378_v44 = vld [vmem:[%s7355_s1 + $0xac0] sm:$0xff] }
  0x75   :  { %v507_v43 = vld [vmem:[%s7355_s1 + $0xec8] sm:$0xff]  ;;  %1294 = vmatprep.subr.mxu0 %v383_v38  ;;  %1365 = vmatprep.subr.mxu1 %v511_v39  ;;  %v506_v45 = vld [vmem:[%s7355_s1 + $0xec0] sm:$0xff] }
  0x76   :  { %1295 = vmatpush2.msra.mxu0 %v382_v40  ;;  %1366 = vmatpush2.msra.mxu1 %v510_v41  ;;  %v375_v46 = vld [vmem:[%s7355_s1 + $0xaa8] sm:$0xff]  ;;  %v374_v48 = vld [vmem:[%s7355_s1 + $0xaa0] sm:$0xff] }
  0x77   :  { %v503_v47 = vld [vmem:[%s7355_s1 + $0xea8] sm:$0xff]  ;;  %1296 = vmatprep.subr.mxu0 %v379_v42  ;;  %1367 = vmatprep.subr.mxu1 %v507_v43  ;;  %v502_v49 = vld [vmem:[%s7355_s1 + $0xea0] sm:$0xff] }
  0x78   :  { %1297 = vmatpush2.msra.mxu0 %v378_v44  ;;  %1368 = vmatpush2.msra.mxu1 %v506_v45  ;;  %v371_v50 = vld [vmem:[%s7355_s1 + $0xa88] sm:$0xff]  ;;  %v370_v52 = vld [vmem:[%s7355_s1 + $0xa80] sm:$0xff] }
  0x79   :  { %v499_v51 = vld [vmem:[%s7355_s1 + $0xe88] sm:$0xff]  ;;  %1298 = vmatprep.subr.mxu0 %v375_v46  ;;  %1369 = vmatprep.subr.mxu1 %v503_v47  ;;  %v498_v53 = vld [vmem:[%s7355_s1 + $0xe80] sm:$0xff] }
  0x7a   :  { %1299 = vmatpush2.msra.mxu0 %v374_v48  ;;  %1370 = vmatpush2.msra.mxu1 %v502_v49  ;;  %v367_v54 = vld [vmem:[%s7355_s1 + $0xa68] sm:$0xff]  ;;  %v366_v56 = vld [vmem:[%s7355_s1 + $0xa60] sm:$0xff] }
  0x7b   :  { %v495_v55 = vld [vmem:[%s7355_s1 + $0xe68] sm:$0xff]  ;;  %1300 = vmatprep.subr.mxu0 %v371_v50  ;;  %1371 = vmatprep.subr.mxu1 %v499_v51  ;;  %v494_v57 = vld [vmem:[%s7355_s1 + $0xe60] sm:$0xff] }
  0x7c   :  { %1301 = vmatpush2.msra.mxu0 %v370_v52  ;;  %1372 = vmatpush2.msra.mxu1 %v498_v53  ;;  %v363_v58 = vld [vmem:[%s7355_s1 + $0xa48] sm:$0xff]  ;;  %v362_v60 = vld [vmem:[%s7355_s1 + $0xa40] sm:$0xff] }
  0x7d   :  { %v491_v59 = vld [vmem:[%s7355_s1 + $0xe48] sm:$0xff]  ;;  %1302 = vmatprep.subr.mxu0 %v367_v54  ;;  %1373 = vmatprep.subr.mxu1 %v495_v55  ;;  %v490_v61 = vld [vmem:[%s7355_s1 + $0xe40] sm:$0xff] }
  0x7e   :  { %1303 = vmatpush2.msra.mxu0 %v366_v56  ;;  %1374 = vmatpush2.msra.mxu1 %v494_v57  ;;  %v359_v63 = vld [vmem:[%s7355_s1 + $0xa28] sm:$0xff]  ;;  %v358_v2 = vld [vmem:[%s7355_s1 + $0xa20] sm:$0xff] }
  0x7f   :  { %v487_v1 = vld [vmem:[%s7355_s1 + $0xe28] sm:$0xff]  ;;  %1304 = vmatprep.subr.mxu0 %v363_v58  ;;  %1375 = vmatprep.subr.mxu1 %v491_v59  ;;  %v486_v4 = vld [vmem:[%s7355_s1 + $0xe20] sm:$0xff] }
  0x80   :  { %1305 = vmatpush2.msra.mxu0 %v362_v60  ;;  %1376 = vmatpush2.msra.mxu1 %v490_v61  ;;  %v355_v6 = vld [vmem:[%s7355_s1 + $0xa08] sm:$0xff]  ;;  %v354_v9 = vld [vmem:[%s7355_s1 + $0xa00] sm:$0xff] }
  0x81   :  { %v483_v7 = vld [vmem:[%s7355_s1 + $0xe08] sm:$0xff]  ;;  %1306 = vmatprep.subr.mxu0 %v359_v63  ;;  %1377 = vmatprep.subr.mxu1 %v487_v1  ;;  %v482_v10 = vld [vmem:[%s7355_s1 + $0xe00] sm:$0xff] }
  0x82   :  { %1307 = vmatpush2.msra.mxu0 %v358_v2  ;;  %1378 = vmatpush2.msra.mxu1 %v486_v4  ;;  %v607_v12 = vld [vmem:[%s7355_s1 + $0x11e8] sm:$0xff]  ;;  %v606_v14 = vld [vmem:[%s7355_s1 + $0x11e0] sm:$0xff] }
  0x83   :  { %1308 = vmatprep.subr.mxu0 %v355_v6  ;;  %1379 = vmatprep.subr.mxu1 %v483_v7  ;;  %v735_v13 = vld [vmem:[%s7355_s1 + $0x15e8] sm:$0xff]  ;;  %v734_v15 = vld [vmem:[%s7355_s1 + $0x15e0] sm:$0xff] }
  0x84   :  { %1309 = vmatpush2.msra.mxu0 %v354_v9  ;;  %1310 = vmatprep.mubr.f32.mxu0 %v3935_v8  ;;  %v603_v16 = vld [vmem:[%s7355_s1 + $0x11c8] sm:$0xff]  ;;  %v602_v18 = vld [vmem:[%s7355_s1 + $0x11c0] sm:$0xff] }
  0x85   :  { %1380 = vmatpush2.msra.mxu1 %v482_v10  ;;  %1311 = vmatmul.mubr.f32.vlgmr.msra.gmra.mxu0 %v28_v62  ;;  %v731_v17 = vld [vmem:[%s7355_s1 + $0x15c8] sm:$0xff]  ;;  %v730_v19 = vld [vmem:[%s7355_s1 + $0x15c0] sm:$0xff] }
  0x86   :  { %1381 = vmatprep.mubr.f32.mxu1 %v3943_v11  ;;  %1388 = vmatprep.subr.mxu0 %v607_v12  ;;  %v599_v20 = vld [vmem:[%s7355_s1 + $0x11a8] sm:$0xff]  ;;  %v598_v22 = vld [vmem:[%s7355_s1 + $0x11a0] sm:$0xff] }
  0x87   :  { %1459 = vmatprep.subr.mxu1 %v735_v13  ;;  %1382 = vmatmul.mubr.f32.vlgmr.msra.gmra.mxu1 %v29_v5  ;;  %v727_v21 = vld [vmem:[%s7355_s1 + $0x15a8] sm:$0xff]  ;;  %v726_v23 = vld [vmem:[%s7355_s1 + $0x15a0] sm:$0xff] }
  0x88   :  { %1389 = vmatpush1.msra.mxu0 %v606_v14  ;;  %1460 = vmatpush1.msra.mxu1 %v734_v15  ;;  %v595_v24 = vld [vmem:[%s7355_s1 + $0x1188] sm:$0xff]  ;;  %v594_v26 = vld [vmem:[%s7355_s1 + $0x1180] sm:$0xff] }
  0x89   :  { %1390 = vmatprep.subr.mxu0 %v603_v16  ;;  %1461 = vmatprep.subr.mxu1 %v731_v17  ;;  %v723_v25 = vld [vmem:[%s7355_s1 + $0x1588] sm:$0xff]  ;;  %v722_v27 = vld [vmem:[%s7355_s1 + $0x1580] sm:$0xff] }
  0x8a   :  { %1391 = vmatpush1.msra.mxu0 %v602_v18  ;;  %1462 = vmatpush1.msra.mxu1 %v730_v19  ;;  %v591_v28 = vld [vmem:[%s7355_s1 + $0x1168] sm:$0xff]  ;;  %v590_v30 = vld [vmem:[%s7355_s1 + $0x1160] sm:$0xff] }
  0x8b   :  { %1392 = vmatprep.subr.mxu0 %v599_v20  ;;  %1463 = vmatprep.subr.mxu1 %v727_v21  ;;  %v719_v29 = vld [vmem:[%s7355_s1 + $0x1568] sm:$0xff]  ;;  %v718_v31 = vld [vmem:[%s7355_s1 + $0x1560] sm:$0xff] }
  0x8c   :  { %1393 = vmatpush1.msra.mxu0 %v598_v22  ;;  %1464 = vmatpush1.msra.mxu1 %v726_v23  ;;  %v587_v32 = vld [vmem:[%s7355_s1 + $0x1148] sm:$0xff]  ;;  %v586_v34 = vld [vmem:[%s7355_s1 + $0x1140] sm:$0xff] }
  0x8d   :  { %1394 = vmatprep.subr.mxu0 %v595_v24  ;;  %1465 = vmatprep.subr.mxu1 %v723_v25  ;;  %v715_v33 = vld [vmem:[%s7355_s1 + $0x1548] sm:$0xff]  ;;  %v714_v35 = vld [vmem:[%s7355_s1 + $0x1540] sm:$0xff] }
  0x8e   :  { %1395 = vmatpush1.msra.mxu0 %v594_v26  ;;  %1466 = vmatpush1.msra.mxu1 %v722_v27  ;;  %v583_v36 = vld [vmem:[%s7355_s1 + $0x1128] sm:$0xff]  ;;  %v582_v38 = vld [vmem:[%s7355_s1 + $0x1120] sm:$0xff] }
  0x8f   :  { %1396 = vmatprep.subr.mxu0 %v591_v28  ;;  %1467 = vmatprep.subr.mxu1 %v719_v29  ;;  %v711_v37 = vld [vmem:[%s7355_s1 + $0x1528] sm:$0xff]  ;;  %v710_v39 = vld [vmem:[%s7355_s1 + $0x1520] sm:$0xff] }
  0x90   :  { %1397 = vmatpush1.msra.mxu0 %v590_v30  ;;  %1468 = vmatpush1.msra.mxu1 %v718_v31  ;;  %v579_v40 = vld [vmem:[%s7355_s1 + $0x1108] sm:$0xff]  ;;  %v578_v42 = vld [vmem:[%s7355_s1 + $0x1100] sm:$0xff] }
  0x91   :  { %1398 = vmatprep.subr.mxu0 %v587_v32  ;;  %1469 = vmatprep.subr.mxu1 %v715_v33  ;;  %v707_v41 = vld [vmem:[%s7355_s1 + $0x1508] sm:$0xff]  ;;  %v706_v43 = vld [vmem:[%s7355_s1 + $0x1500] sm:$0xff] }
  0x92   :  { %1399 = vmatpush1.msra.mxu0 %v586_v34  ;;  %1470 = vmatpush1.msra.mxu1 %v714_v35  ;;  %v575_v44 = vld [vmem:[%s7355_s1 + $0x10e8] sm:$0xff]  ;;  %v574_v46 = vld [vmem:[%s7355_s1 + $0x10e0] sm:$0xff] }
  0x93   :  { %1400 = vmatprep.subr.mxu0 %v583_v36  ;;  %1471 = vmatprep.subr.mxu1 %v711_v37  ;;  %v703_v45 = vld [vmem:[%s7355_s1 + $0x14e8] sm:$0xff]  ;;  %v702_v47 = vld [vmem:[%s7355_s1 + $0x14e0] sm:$0xff] }
  0x94   :  { %1401 = vmatpush1.msra.mxu0 %v582_v38  ;;  %1472 = vmatpush1.msra.mxu1 %v710_v39  ;;  %v571_v48 = vld [vmem:[%s7355_s1 + $0x10c8] sm:$0xff]  ;;  %v570_v50 = vld [vmem:[%s7355_s1 + $0x10c0] sm:$0xff] }
  0x95   :  { %1402 = vmatprep.subr.mxu0 %v579_v40  ;;  %1473 = vmatprep.subr.mxu1 %v707_v41  ;;  %v699_v49 = vld [vmem:[%s7355_s1 + $0x14c8] sm:$0xff]  ;;  %v698_v51 = vld [vmem:[%s7355_s1 + $0x14c0] sm:$0xff] }
  0x96   :  { %1403 = vmatpush1.msra.mxu0 %v578_v42  ;;  %1474 = vmatpush1.msra.mxu1 %v706_v43  ;;  %v567_v52 = vld [vmem:[%s7355_s1 + $0x10a8] sm:$0xff]  ;;  %v566_v54 = vld [vmem:[%s7355_s1 + $0x10a0] sm:$0xff] }
  0x97   :  { %1404 = vmatprep.subr.mxu0 %v575_v44  ;;  %1475 = vmatprep.subr.mxu1 %v703_v45  ;;  %v695_v53 = vld [vmem:[%s7355_s1 + $0x14a8] sm:$0xff]  ;;  %v694_v55 = vld [vmem:[%s7355_s1 + $0x14a0] sm:$0xff] }
  0x98   :  { %1405 = vmatpush1.msra.mxu0 %v574_v46  ;;  %1476 = vmatpush1.msra.mxu1 %v702_v47  ;;  %v563_v56 = vld [vmem:[%s7355_s1 + $0x1088] sm:$0xff]  ;;  %v562_v58 = vld [vmem:[%s7355_s1 + $0x1080] sm:$0xff] }
  0x99   :  { %1406 = vmatprep.subr.mxu0 %v571_v48  ;;  %1477 = vmatprep.subr.mxu1 %v699_v49  ;;  %v691_v57 = vld [vmem:[%s7355_s1 + $0x1488] sm:$0xff]  ;;  %v690_v59 = vld [vmem:[%s7355_s1 + $0x1480] sm:$0xff] }
  0x9a   :  { %1407 = vmatpush1.msra.mxu0 %v570_v50  ;;  %1478 = vmatpush1.msra.mxu1 %v698_v51  ;;  %v559_v60 = vld [vmem:[%s7355_s1 + $0x1068] sm:$0xff]  ;;  %v558_v62 = vld [vmem:[%s7355_s1 + $0x1060] sm:$0xff] }
  0x9b   :  { %1408 = vmatprep.subr.mxu0 %v567_v52  ;;  %1479 = vmatprep.subr.mxu1 %v695_v53  ;;  %v687_v61 = vld [vmem:[%s7355_s1 + $0x1468] sm:$0xff]  ;;  %v686_v63 = vld [vmem:[%s7355_s1 + $0x1460] sm:$0xff] }
  0x9c   :  { %1409 = vmatpush1.msra.mxu0 %v566_v54  ;;  %1480 = vmatpush1.msra.mxu1 %v694_v55  ;;  %v555_v1 = vld [vmem:[%s7355_s1 + $0x1048] sm:$0xff]  ;;  %v554_v4 = vld [vmem:[%s7355_s1 + $0x1040] sm:$0xff] }
  0x9d   :  { %1410 = vmatprep.subr.mxu0 %v563_v56  ;;  %1481 = vmatprep.subr.mxu1 %v691_v57  ;;  %v683_v2 = vld [vmem:[%s7355_s1 + $0x1448] sm:$0xff]  ;;  %v682_v5 = vld [vmem:[%s7355_s1 + $0x1440] sm:$0xff] }
  0x9e   :  { %1411 = vmatpush1.msra.mxu0 %v562_v58  ;;  %1482 = vmatpush1.msra.mxu1 %v690_v59  ;;  %v551_v6 = vld [vmem:[%s7355_s1 + $0x1028] sm:$0xff]  ;;  %v550_v9 = vld [vmem:[%s7355_s1 + $0x1020] sm:$0xff] }
  0x9f   :  { %1412 = vmatprep.subr.mxu0 %v559_v60  ;;  %1483 = vmatprep.subr.mxu1 %v687_v61  ;;  %v679_v7 = vld [vmem:[%s7355_s1 + $0x1428] sm:$0xff]  ;;  %v678_v10 = vld [vmem:[%s7355_s1 + $0x1420] sm:$0xff] }
  0xa0   :  { %1413 = vmatpush1.msra.mxu0 %v558_v62  ;;  %1484 = vmatpush1.msra.mxu1 %v686_v63  ;;  %v547_v12 = vld [vmem:[%s7355_s1 + $0x1008] sm:$0xff]  ;;  %v546_v14 = vld [vmem:[%s7355_s1 + $0x1000] sm:$0xff] }
  0xa1   :  { %1414 = vmatprep.subr.mxu0 %v555_v1  ;;  %1485 = vmatprep.subr.mxu1 %v683_v2  ;;  %v675_v13 = vld [vmem:[%s7355_s1 + $0x1408] sm:$0xff]  ;;  %v674_v15 = vld [vmem:[%s7355_s1 + $0x1400] sm:$0xff] }
  0xa2   :  { %1415 = vmatpush1.msra.mxu0 %v554_v4  ;;  %1486 = vmatpush1.msra.mxu1 %v682_v5  ;;  %v671_v16 = vld [vmem:[%s7355_s1 + $0x13e8] sm:$0xff]  ;;  %v670_v18 = vld [vmem:[%s7355_s1 + $0x13e0] sm:$0xff] }
  0xa3   :  { %1416 = vmatprep.subr.mxu0 %v551_v6  ;;  %1487 = vmatprep.subr.mxu1 %v679_v7  ;;  %v799_v17 = vld [vmem:[%s7355_s1 + $0x17e8] sm:$0xff]  ;;  %v798_v19 = vld [vmem:[%s7355_s1 + $0x17e0] sm:$0xff] }
  0xa4   :  { %1417 = vmatpush1.msra.mxu0 %v550_v9  ;;  %1488 = vmatpush1.msra.mxu1 %v678_v10  ;;  %v667_v20 = vld [vmem:[%s7355_s1 + $0x13c8] sm:$0xff]  ;;  %v666_v22 = vld [vmem:[%s7355_s1 + $0x13c0] sm:$0xff] }
  0xa5   :  { %1418 = vmatprep.subr.mxu0 %v547_v12  ;;  %1489 = vmatprep.subr.mxu1 %v675_v13  ;;  %v795_v21 = vld [vmem:[%s7355_s1 + $0x17c8] sm:$0xff]  ;;  %v794_v23 = vld [vmem:[%s7355_s1 + $0x17c0] sm:$0xff] }
  0xa6   :  { %1419 = vmatpush1.msra.mxu0 %v546_v14  ;;  %1490 = vmatpush1.msra.mxu1 %v674_v15  ;;  %v663_v24 = vld [vmem:[%s7355_s1 + $0x13a8] sm:$0xff]  ;;  %v662_v26 = vld [vmem:[%s7355_s1 + $0x13a0] sm:$0xff] }
  0xa7   :  { %1420 = vmatprep.subr.mxu0 %v671_v16  ;;  %1491 = vmatprep.subr.mxu1 %v799_v17  ;;  %v791_v25 = vld [vmem:[%s7355_s1 + $0x17a8] sm:$0xff]  ;;  %v790_v27 = vld [vmem:[%s7355_s1 + $0x17a0] sm:$0xff] }
  0xa8   :  { %1421 = vmatpush2.msra.mxu0 %v670_v18  ;;  %1492 = vmatpush2.msra.mxu1 %v798_v19  ;;  %v659_v28 = vld [vmem:[%s7355_s1 + $0x1388] sm:$0xff]  ;;  %v658_v30 = vld [vmem:[%s7355_s1 + $0x1380] sm:$0xff] }
  0xa9   :  { %1422 = vmatprep.subr.mxu0 %v667_v20  ;;  %1493 = vmatprep.subr.mxu1 %v795_v21  ;;  %v787_v29 = vld [vmem:[%s7355_s1 + $0x1788] sm:$0xff]  ;;  %v786_v31 = vld [vmem:[%s7355_s1 + $0x1780] sm:$0xff] }
  0xaa   :  { %1423 = vmatpush2.msra.mxu0 %v666_v22  ;;  %1494 = vmatpush2.msra.mxu1 %v794_v23  ;;  %v655_v32 = vld [vmem:[%s7355_s1 + $0x1368] sm:$0xff]  ;;  %v654_v34 = vld [vmem:[%s7355_s1 + $0x1360] sm:$0xff] }
  0xab   :  { %1424 = vmatprep.subr.mxu0 %v663_v24  ;;  %1495 = vmatprep.subr.mxu1 %v791_v25  ;;  %v783_v33 = vld [vmem:[%s7355_s1 + $0x1768] sm:$0xff]  ;;  %v782_v35 = vld [vmem:[%s7355_s1 + $0x1760] sm:$0xff] }
  0xac   :  { %1425 = vmatpush2.msra.mxu0 %v662_v26  ;;  %1496 = vmatpush2.msra.mxu1 %v790_v27  ;;  %v651_v36 = vld [vmem:[%s7355_s1 + $0x1348] sm:$0xff]  ;;  %v650_v38 = vld [vmem:[%s7355_s1 + $0x1340] sm:$0xff] }
  0xad   :  { %1426 = vmatprep.subr.mxu0 %v659_v28  ;;  %1497 = vmatprep.subr.mxu1 %v787_v29  ;;  %v779_v37 = vld [vmem:[%s7355_s1 + $0x1748] sm:$0xff]  ;;  %v778_v39 = vld [vmem:[%s7355_s1 + $0x1740] sm:$0xff] }
  0xae   :  { %1427 = vmatpush2.msra.mxu0 %v658_v30  ;;  %1498 = vmatpush2.msra.mxu1 %v786_v31  ;;  %v647_v40 = vld [vmem:[%s7355_s1 + $0x1328] sm:$0xff]  ;;  %v646_v42 = vld [vmem:[%s7355_s1 + $0x1320] sm:$0xff] }
  0xaf   :  { %1428 = vmatprep.subr.mxu0 %v655_v32  ;;  %1499 = vmatprep.subr.mxu1 %v783_v33  ;;  %v775_v41 = vld [vmem:[%s7355_s1 + $0x1728] sm:$0xff]  ;;  %v774_v43 = vld [vmem:[%s7355_s1 + $0x1720] sm:$0xff] }
  0xb0   :  { %1429 = vmatpush2.msra.mxu0 %v654_v34  ;;  %1500 = vmatpush2.msra.mxu1 %v782_v35  ;;  %v643_v44 = vld [vmem:[%s7355_s1 + $0x1308] sm:$0xff]  ;;  %v642_v46 = vld [vmem:[%s7355_s1 + $0x1300] sm:$0xff] }
  0xb1   :  { %1430 = vmatprep.subr.mxu0 %v651_v36  ;;  %1501 = vmatprep.subr.mxu1 %v779_v37  ;;  %v771_v45 = vld [vmem:[%s7355_s1 + $0x1708] sm:$0xff]  ;;  %v770_v47 = vld [vmem:[%s7355_s1 + $0x1700] sm:$0xff] }
  0xb2   :  { %1431 = vmatpush2.msra.mxu0 %v650_v38  ;;  %1502 = vmatpush2.msra.mxu1 %v778_v39  ;;  %v639_v48 = vld [vmem:[%s7355_s1 + $0x12e8] sm:$0xff]  ;;  %v638_v50 = vld [vmem:[%s7355_s1 + $0x12e0] sm:$0xff] }
  0xb3   :  { %1432 = vmatprep.subr.mxu0 %v647_v40  ;;  %1503 = vmatprep.subr.mxu1 %v775_v41  ;;  %v767_v49 = vld [vmem:[%s7355_s1 + $0x16e8] sm:$0xff]  ;;  %v766_v51 = vld [vmem:[%s7355_s1 + $0x16e0] sm:$0xff] }
  0xb4   :  { %1433 = vmatpush2.msra.mxu0 %v646_v42  ;;  %1504 = vmatpush2.msra.mxu1 %v774_v43  ;;  %v635_v52 = vld [vmem:[%s7355_s1 + $0x12c8] sm:$0xff]  ;;  %v634_v54 = vld [vmem:[%s7355_s1 + $0x12c0] sm:$0xff] }
  0xb5   :  { %1434 = vmatprep.subr.mxu0 %v643_v44  ;;  %1505 = vmatprep.subr.mxu1 %v771_v45  ;;  %v763_v53 = vld [vmem:[%s7355_s1 + $0x16c8] sm:$0xff]  ;;  %v762_v55 = vld [vmem:[%s7355_s1 + $0x16c0] sm:$0xff] }
  0xb6   :  { %1435 = vmatpush2.msra.mxu0 %v642_v46  ;;  %1506 = vmatpush2.msra.mxu1 %v770_v47  ;;  %v631_v56 = vld [vmem:[%s7355_s1 + $0x12a8] sm:$0xff]  ;;  %v630_v58 = vld [vmem:[%s7355_s1 + $0x12a0] sm:$0xff] }
  0xb7   :  { %1436 = vmatprep.subr.mxu0 %v639_v48  ;;  %1507 = vmatprep.subr.mxu1 %v767_v49  ;;  %v759_v57 = vld [vmem:[%s7355_s1 + $0x16a8] sm:$0xff]  ;;  %v758_v59 = vld [vmem:[%s7355_s1 + $0x16a0] sm:$0xff] }
  0xb8   :  { %1437 = vmatpush2.msra.mxu0 %v638_v50  ;;  %1508 = vmatpush2.msra.mxu1 %v766_v51  ;;  %v627_v60 = vld [vmem:[%s7355_s1 + $0x1288] sm:$0xff]  ;;  %v626_v62 = vld [vmem:[%s7355_s1 + $0x1280] sm:$0xff] }
  0xb9   :  { %1438 = vmatprep.subr.mxu0 %v635_v52  ;;  %1509 = vmatprep.subr.mxu1 %v763_v53  ;;  %v755_v61 = vld [vmem:[%s7355_s1 + $0x1688] sm:$0xff]  ;;  %v754_v63 = vld [vmem:[%s7355_s1 + $0x1680] sm:$0xff] }
  0xba   :  { %1439 = vmatpush2.msra.mxu0 %v634_v54  ;;  %1510 = vmatpush2.msra.mxu1 %v762_v55  ;;  %v623_v1 = vld [vmem:[%s7355_s1 + $0x1268] sm:$0xff]  ;;  %v622_v4 = vld [vmem:[%s7355_s1 + $0x1260] sm:$0xff] }
  0xbb   :  { %1440 = vmatprep.subr.mxu0 %v631_v56  ;;  %1511 = vmatprep.subr.mxu1 %v759_v57  ;;  %v751_v2 = vld [vmem:[%s7355_s1 + $0x1668] sm:$0xff]  ;;  %v750_v5 = vld [vmem:[%s7355_s1 + $0x1660] sm:$0xff] }
  0xbc   :  { %1441 = vmatpush2.msra.mxu0 %v630_v58  ;;  %1512 = vmatpush2.msra.mxu1 %v758_v59  ;;  %v619_v6 = vld [vmem:[%s7355_s1 + $0x1248] sm:$0xff]  ;;  %v618_v9 = vld [vmem:[%s7355_s1 + $0x1240] sm:$0xff] }
  0xbd   :  { %1442 = vmatprep.subr.mxu0 %v627_v60  ;;  %1513 = vmatprep.subr.mxu1 %v755_v61  ;;  %v747_v7 = vld [vmem:[%s7355_s1 + $0x1648] sm:$0xff]  ;;  %v746_v10 = vld [vmem:[%s7355_s1 + $0x1640] sm:$0xff] }
  0xbe   :  { %1443 = vmatpush2.msra.mxu0 %v626_v62  ;;  %1514 = vmatpush2.msra.mxu1 %v754_v63  ;;  %v30_v12 = vld [vmem:[%s7356_s0 + $0x20] sm:$0xff]  ;;  %v615_v13 = vld [vmem:[%s7355_s1 + $0x1228] sm:$0xff] }
  0xbf   :  { %1444 = vmatprep.subr.mxu0 %v623_v1  ;;  %1515 = vmatprep.subr.mxu1 %v751_v2  ;;  %v743_v14 = vld [vmem:[%s7355_s1 + $0x1628] sm:$0xff]  ;;  %v614_v15 = vld [vmem:[%s7355_s1 + $0x1220] sm:$0xff]  ;;  %v4331_v20 = vcombine.high %v30_v12, %v30_v12 }
  0xc0   :  { %1445 = vmatpush2.msra.mxu0 %v622_v4  ;;  %1516 = vmatpush2.msra.mxu1 %v750_v5  ;;  %v742_v16 = vld [vmem:[%s7355_s1 + $0x1620] sm:$0xff]  ;;  %v31_v17 = vld [vmem:[%s7356_s0 + $0x28] sm:$0xff] }
  0xc1   :  { %1446 = vmatprep.subr.mxu0 %v619_v6  ;;  %1517 = vmatprep.subr.mxu1 %v747_v7  ;;  %v611_v18 = vld [vmem:[%s7355_s1 + $0x1208] sm:$0xff]  ;;  %v610_v21 = vld [vmem:[%s7355_s1 + $0x1200] sm:$0xff]  ;;  %v4339_v23 = vcombine.high %v31_v17, %v31_v17 }
  0xc2   :  { %1447 = vmatpush2.msra.mxu0 %v618_v9  ;;  %1518 = vmatpush2.msra.mxu1 %v746_v10  ;;  %v739_v19 = vld [vmem:[%s7355_s1 + $0x1608] sm:$0xff]  ;;  %v738_v22 = vld [vmem:[%s7355_s1 + $0x1600] sm:$0xff] }
  0xc3   :  { %1448 = vmatprep.subr.mxu0 %v615_v13  ;;  %1519 = vmatprep.subr.mxu1 %v743_v14  ;;  %v863_v24 = vld [vmem:[%s7355_s1 + $0x19e8] sm:$0xff]  ;;  %v862_v26 = vld [vmem:[%s7355_s1 + $0x19e0] sm:$0xff] }
  0xc4   :  { %1449 = vmatpush2.msra.mxu0 %v614_v15  ;;  %1520 = vmatpush2.msra.mxu1 %v742_v16  ;;  %v991_v25 = vld [vmem:[%s7355_s1 + $0x1de8] sm:$0xff]  ;;  %v990_v27 = vld [vmem:[%s7355_s1 + $0x1de0] sm:$0xff] }
  0xc5   :  { %1450 = vmatprep.subr.mxu0 %v611_v18  ;;  %1521 = vmatprep.subr.mxu1 %v739_v19  ;;  %v859_v28 = vld [vmem:[%s7355_s1 + $0x19c8] sm:$0xff]  ;;  %v858_v30 = vld [vmem:[%s7355_s1 + $0x19c0] sm:$0xff] }
  0xc6   :  { %1451 = vmatpush2.msra.mxu0 %v610_v21  ;;  %1452 = vmatprep.mubr.f32.mxu0 %v4331_v20  ;;  %v987_v29 = vld [vmem:[%s7355_s1 + $0x1dc8] sm:$0xff]  ;;  %v986_v31 = vld [vmem:[%s7355_s1 + $0x1dc0] sm:$0xff] }
  0xc7   :  { %1522 = vmatpush2.msra.mxu1 %v738_v22  ;;  %1453 = vmatmul.mubr.f32.vlgmr.msra.gmra.mxu0 %v30_v12  ;;  %v855_v32 = vld [vmem:[%s7355_s1 + $0x19a8] sm:$0xff]  ;;  %v854_v34 = vld [vmem:[%s7355_s1 + $0x19a0] sm:$0xff] }
  0xc8   :  { %1523 = vmatprep.mubr.f32.mxu1 %v4339_v23  ;;  %1530 = vmatprep.subr.mxu0 %v863_v24  ;;  %v983_v33 = vld [vmem:[%s7355_s1 + $0x1da8] sm:$0xff]  ;;  %v982_v35 = vld [vmem:[%s7355_s1 + $0x1da0] sm:$0xff] }
  0xc9   :  { %1601 = vmatprep.subr.mxu1 %v991_v25  ;;  %1524 = vmatmul.mubr.f32.vlgmr.msra.gmra.mxu1 %v31_v17  ;;  %v851_v36 = vld [vmem:[%s7355_s1 + $0x1988] sm:$0xff]  ;;  %v850_v38 = vld [vmem:[%s7355_s1 + $0x1980] sm:$0xff] }
  0xca   :  { %1531 = vmatpush1.msra.mxu0 %v862_v26  ;;  %1602 = vmatpush1.msra.mxu1 %v990_v27  ;;  %v979_v37 = vld [vmem:[%s7355_s1 + $0x1d88] sm:$0xff]  ;;  %v978_v39 = vld [vmem:[%s7355_s1 + $0x1d80] sm:$0xff] }
  0xcb   :  { %1532 = vmatprep.subr.mxu0 %v859_v28  ;;  %1603 = vmatprep.subr.mxu1 %v987_v29  ;;  %v847_v40 = vld [vmem:[%s7355_s1 + $0x1968] sm:$0xff]  ;;  %v846_v42 = vld [vmem:[%s7355_s1 + $0x1960] sm:$0xff] }
  0xcc   :  { %1533 = vmatpush1.msra.mxu0 %v858_v30  ;;  %1604 = vmatpush1.msra.mxu1 %v986_v31  ;;  %v975_v41 = vld [vmem:[%s7355_s1 + $0x1d68] sm:$0xff]  ;;  %v974_v43 = vld [vmem:[%s7355_s1 + $0x1d60] sm:$0xff] }
  0xcd   :  { %1534 = vmatprep.subr.mxu0 %v855_v32  ;;  %1605 = vmatprep.subr.mxu1 %v983_v33  ;;  %v843_v44 = vld [vmem:[%s7355_s1 + $0x1948] sm:$0xff]  ;;  %v842_v46 = vld [vmem:[%s7355_s1 + $0x1940] sm:$0xff] }
  0xce   :  { %1535 = vmatpush1.msra.mxu0 %v854_v34  ;;  %1606 = vmatpush1.msra.mxu1 %v982_v35  ;;  %v971_v45 = vld [vmem:[%s7355_s1 + $0x1d48] sm:$0xff]  ;;  %v970_v47 = vld [vmem:[%s7355_s1 + $0x1d40] sm:$0xff] }
  0xcf   :  { %1536 = vmatprep.subr.mxu0 %v851_v36  ;;  %1607 = vmatprep.subr.mxu1 %v979_v37  ;;  %v839_v48 = vld [vmem:[%s7355_s1 + $0x1928] sm:$0xff]  ;;  %v838_v50 = vld [vmem:[%s7355_s1 + $0x1920] sm:$0xff] }
  0xd0   :  { %1537 = vmatpush1.msra.mxu0 %v850_v38  ;;  %1608 = vmatpush1.msra.mxu1 %v978_v39  ;;  %v967_v49 = vld [vmem:[%s7355_s1 + $0x1d28] sm:$0xff]  ;;  %v966_v51 = vld [vmem:[%s7355_s1 + $0x1d20] sm:$0xff] }
  0xd1   :  { %1538 = vmatprep.subr.mxu0 %v847_v40  ;;  %1609 = vmatprep.subr.mxu1 %v975_v41  ;;  %v835_v52 = vld [vmem:[%s7355_s1 + $0x1908] sm:$0xff]  ;;  %v834_v54 = vld [vmem:[%s7355_s1 + $0x1900] sm:$0xff] }
  0xd2   :  { %1539 = vmatpush1.msra.mxu0 %v846_v42  ;;  %1610 = vmatpush1.msra.mxu1 %v974_v43  ;;  %v963_v53 = vld [vmem:[%s7355_s1 + $0x1d08] sm:$0xff]  ;;  %v962_v55 = vld [vmem:[%s7355_s1 + $0x1d00] sm:$0xff] }
  0xd3   :  { %1540 = vmatprep.subr.mxu0 %v843_v44  ;;  %1611 = vmatprep.subr.mxu1 %v971_v45  ;;  %v831_v56 = vld [vmem:[%s7355_s1 + $0x18e8] sm:$0xff]  ;;  %v830_v58 = vld [vmem:[%s7355_s1 + $0x18e0] sm:$0xff] }
  0xd4   :  { %1541 = vmatpush1.msra.mxu0 %v842_v46  ;;  %1612 = vmatpush1.msra.mxu1 %v970_v47  ;;  %v959_v57 = vld [vmem:[%s7355_s1 + $0x1ce8] sm:$0xff]  ;;  %v958_v59 = vld [vmem:[%s7355_s1 + $0x1ce0] sm:$0xff] }
  0xd5   :  { %1542 = vmatprep.subr.mxu0 %v839_v48  ;;  %1613 = vmatprep.subr.mxu1 %v967_v49  ;;  %v827_v60 = vld [vmem:[%s7355_s1 + $0x18c8] sm:$0xff]  ;;  %v826_v62 = vld [vmem:[%s7355_s1 + $0x18c0] sm:$0xff] }
  0xd6   :  { %1543 = vmatpush1.msra.mxu0 %v838_v50  ;;  %1614 = vmatpush1.msra.mxu1 %v966_v51  ;;  %v955_v61 = vld [vmem:[%s7355_s1 + $0x1cc8] sm:$0xff]  ;;  %v954_v63 = vld [vmem:[%s7355_s1 + $0x1cc0] sm:$0xff] }
  0xd7   :  { %1544 = vmatprep.subr.mxu0 %v835_v52  ;;  %1615 = vmatprep.subr.mxu1 %v963_v53  ;;  %v823_v1 = vld [vmem:[%s7355_s1 + $0x18a8] sm:$0xff]  ;;  %v822_v4 = vld [vmem:[%s7355_s1 + $0x18a0] sm:$0xff] }
  0xd8   :  { %1545 = vmatpush1.msra.mxu0 %v834_v54  ;;  %1616 = vmatpush1.msra.mxu1 %v962_v55  ;;  %v951_v2 = vld [vmem:[%s7355_s1 + $0x1ca8] sm:$0xff]  ;;  %v950_v5 = vld [vmem:[%s7355_s1 + $0x1ca0] sm:$0xff] }
  0xd9   :  { %1546 = vmatprep.subr.mxu0 %v831_v56  ;;  %1617 = vmatprep.subr.mxu1 %v959_v57  ;;  %v819_v6 = vld [vmem:[%s7355_s1 + $0x1888] sm:$0xff]  ;;  %v818_v9 = vld [vmem:[%s7355_s1 + $0x1880] sm:$0xff] }
  0xda   :  { %1547 = vmatpush1.msra.mxu0 %v830_v58  ;;  %1618 = vmatpush1.msra.mxu1 %v958_v59  ;;  %v947_v7 = vld [vmem:[%s7355_s1 + $0x1c88] sm:$0xff]  ;;  %v946_v10 = vld [vmem:[%s7355_s1 + $0x1c80] sm:$0xff] }
  0xdb   :  { %1548 = vmatprep.subr.mxu0 %v827_v60  ;;  %1619 = vmatprep.subr.mxu1 %v955_v61  ;;  %v815_v12 = vld [vmem:[%s7355_s1 + $0x1868] sm:$0xff]  ;;  %v814_v14 = vld [vmem:[%s7355_s1 + $0x1860] sm:$0xff]  ;;  %v1060_v60 = vlaneseq }
  0xdc   :  { %1549 = vmatpush1.msra.mxu0 %v826_v62  ;;  %1620 = vmatpush1.msra.mxu1 %v954_v63  ;;  %v943_v13 = vld [vmem:[%s7355_s1 + $0x1c68] sm:$0xff]  ;;  %v942_v15 = vld [vmem:[%s7355_s1 + $0x1c60] sm:$0xff] }
  0xdd   :  { %1550 = vmatprep.subr.mxu0 %v823_v1  ;;  %1621 = vmatprep.subr.mxu1 %v951_v2  ;;  %v811_v16 = vld [vmem:[%s7355_s1 + $0x1848] sm:$0xff]  ;;  %v810_v18 = vld [vmem:[%s7355_s1 + $0x1840] sm:$0xff] }
  0xde   :  { %1551 = vmatpush1.msra.mxu0 %v822_v4  ;;  %1622 = vmatpush1.msra.mxu1 %v950_v5  ;;  %v939_v17 = vld [vmem:[%s7355_s1 + $0x1c48] sm:$0xff]  ;;  %v938_v19 = vld [vmem:[%s7355_s1 + $0x1c40] sm:$0xff] }
  0xdf   :  { %1552 = vmatprep.subr.mxu0 %v819_v6  ;;  %1623 = vmatprep.subr.mxu1 %v947_v7  ;;  %v807_v21 = vld [vmem:[%s7355_s1 + $0x1828] sm:$0xff]  ;;  %v806_v24 = vld [vmem:[%s7355_s1 + $0x1820] sm:$0xff]  ;;  %v4649_v7 = vshrl.u32 %v1060_v60, 7  ;;  %v216_v60 = vld [vmem:[%s7355_s1 + $0x5b0] sm:$0xff] }
  0xe0   :  { %1553 = vmatpush1.msra.mxu0 %v818_v9  ;;  %1624 = vmatpush1.msra.mxu1 %v946_v10  ;;  %v935_v22 = vld [vmem:[%s7355_s1 + $0x1c28] sm:$0xff]  ;;  %v934_v25 = vld [vmem:[%s7355_s1 + $0x1c20] sm:$0xff] }
  0xe1   :  { %1554 = vmatprep.subr.mxu0 %v815_v12  ;;  %1625 = vmatprep.subr.mxu1 %v943_v13  ;;  %v803_v26 = vld [vmem:[%s7355_s1 + $0x1808] sm:$0xff]  ;;  %v802_v28 = vld [vmem:[%s7355_s1 + $0x1800] sm:$0xff] }
  0xe2   :  { %1555 = vmatpush1.msra.mxu0 %v814_v14  ;;  %1626 = vmatpush1.msra.mxu1 %v942_v15  ;;  %v931_v27 = vld [vmem:[%s7355_s1 + $0x1c08] sm:$0xff]  ;;  %v930_v29 = vld [vmem:[%s7355_s1 + $0x1c00] sm:$0xff] }
  0xe3   :  { %1556 = vmatprep.subr.mxu0 %v811_v16  ;;  %1627 = vmatprep.subr.mxu1 %v939_v17  ;;  %v927_v30 = vld [vmem:[%s7355_s1 + $0x1be8] sm:$0xff]  ;;  %v926_v32 = vld [vmem:[%s7355_s1 + $0x1be0] sm:$0xff] }
  0xe4   :  { %1557 = vmatpush1.msra.mxu0 %v810_v18  ;;  %1628 = vmatpush1.msra.mxu1 %v938_v19  ;;  %v1055_v31 = vld [vmem:[%s7355_s1 + $0x1fe8] sm:$0xff]  ;;  %v1054_v33 = vld [vmem:[%s7355_s1 + $0x1fe0] sm:$0xff]  ;;  %v1062_v18 = vsub.s32 0, %v4649_v7 }
  0xe5   :  { %1558 = vmatprep.subr.mxu0 %v807_v21  ;;  %1629 = vmatprep.subr.mxu1 %v935_v22  ;;  %v923_v34 = vld [vmem:[%s7355_s1 + $0x1bc8] sm:$0xff]  ;;  %v922_v36 = vld [vmem:[%s7355_s1 + $0x1bc0] sm:$0xff] }
  0xe6   :  { %1559 = vmatpush1.msra.mxu0 %v806_v24  ;;  %1630 = vmatpush1.msra.mxu1 %v934_v25  ;;  %v1051_v35 = vld [vmem:[%s7355_s1 + $0x1fc8] sm:$0xff]  ;;  %v1050_v37 = vld [vmem:[%s7355_s1 + $0x1fc0] sm:$0xff] }
  0xe7   :  { %1560 = vmatprep.subr.mxu0 %v803_v26  ;;  %1631 = vmatprep.subr.mxu1 %v931_v27  ;;  %v919_v38 = vld [vmem:[%s7355_s1 + $0x1ba8] sm:$0xff]  ;;  %v918_v40 = vld [vmem:[%s7355_s1 + $0x1ba0] sm:$0xff] }
  0xe8   :  { %1561 = vmatpush1.msra.mxu0 %v802_v28  ;;  %1632 = vmatpush1.msra.mxu1 %v930_v29  ;;  %v1047_v39 = vld [vmem:[%s7355_s1 + $0x1fa8] sm:$0xff]  ;;  %v1046_v41 = vld [vmem:[%s7355_s1 + $0x1fa0] sm:$0xff] }
  0xe9   :  { %1562 = vmatprep.subr.mxu0 %v927_v30  ;;  %1633 = vmatprep.subr.mxu1 %v1055_v31  ;;  %v915_v42 = vld [vmem:[%s7355_s1 + $0x1b88] sm:$0xff]  ;;  %v914_v44 = vld [vmem:[%s7355_s1 + $0x1b80] sm:$0xff] }
  0xea   :  { %1563 = vmatpush2.msra.mxu0 %v926_v32  ;;  %1634 = vmatpush2.msra.mxu1 %v1054_v33  ;;  %v1043_v43 = vld [vmem:[%s7355_s1 + $0x1f88] sm:$0xff]  ;;  %v1042_v45 = vld [vmem:[%s7355_s1 + $0x1f80] sm:$0xff]  ;;  %v32_v33 = vld [vmem:[%s7356_s0 + $0x30] sm:$0xff] }
  0xeb   :  { %1564 = vmatprep.subr.mxu0 %v923_v34  ;;  %1635 = vmatprep.subr.mxu1 %v1051_v35  ;;  %v911_v46 = vld [vmem:[%s7355_s1 + $0x1b68] sm:$0xff]  ;;  %v910_v48 = vld [vmem:[%s7355_s1 + $0x1b60] sm:$0xff] }
  0xec   :  { %1565 = vmatpush2.msra.mxu0 %v922_v36  ;;  %1636 = vmatpush2.msra.mxu1 %v1050_v37  ;;  %v1039_v47 = vld [vmem:[%s7355_s1 + $0x1f68] sm:$0xff]  ;;  %v1038_v49 = vld [vmem:[%s7355_s1 + $0x1f60] sm:$0xff] }
  0xed   :  { %1566 = vmatprep.subr.mxu0 %v919_v38  ;;  %1637 = vmatprep.subr.mxu1 %v1047_v39  ;;  %v907_v50 = vld [vmem:[%s7355_s1 + $0x1b48] sm:$0xff]  ;;  %v906_v52 = vld [vmem:[%s7355_s1 + $0x1b40] sm:$0xff]  ;;  %v33_v39 = vld [vmem:[%s7356_s0 + $0x38] sm:$0xff] }
  0xee   :  { %1567 = vmatpush2.msra.mxu0 %v918_v40  ;;  %1638 = vmatpush2.msra.mxu1 %v1046_v41  ;;  %v1035_v51 = vld [vmem:[%s7355_s1 + $0x1f48] sm:$0xff]  ;;  %v1034_v53 = vld [vmem:[%s7355_s1 + $0x1f40] sm:$0xff] }
  0xef   :  { %1568 = vmatprep.subr.mxu0 %v915_v42  ;;  %1639 = vmatprep.subr.mxu1 %v1043_v43  ;;  %v903_v54 = vld [vmem:[%s7355_s1 + $0x1b28] sm:$0xff]  ;;  %v902_v56 = vld [vmem:[%s7355_s1 + $0x1b20] sm:$0xff]  ;;  %v4735_v42 = vcombine.high %v32_v33, %v32_v33 }
  0xf0   :  { %1569 = vmatpush2.msra.mxu0 %v914_v44  ;;  %1640 = vmatpush2.msra.mxu1 %v1042_v45  ;;  %v1031_v55 = vld [vmem:[%s7355_s1 + $0x1f28] sm:$0xff]  ;;  %v1030_v57 = vld [vmem:[%s7355_s1 + $0x1f20] sm:$0xff] }
  0xf1   :  { %1570 = vmatprep.subr.mxu0 %v911_v46  ;;  %1641 = vmatprep.subr.mxu1 %v1039_v47  ;;  %v899_v58 = vld [vmem:[%s7355_s1 + $0x1b08] sm:$0xff]  ;;  %v898_v61 = vld [vmem:[%s7355_s1 + $0x1b00] sm:$0xff]  ;;  %v4743_v47 = vcombine.high %v33_v39, %v33_v39 }
  0xf2   :  { %1571 = vmatpush2.msra.mxu0 %v910_v48  ;;  %1642 = vmatpush2.msra.mxu1 %v1038_v49  ;;  %v1027_v59 = vld [vmem:[%s7355_s1 + $0x1f08] sm:$0xff]  ;;  %v1026_v62 = vld [vmem:[%s7355_s1 + $0x1f00] sm:$0xff]  ;;  %v97_v49 = vld [vmem:[%s7355_s1 + $0x1f8] sm:$0xff] }
  0xf3   :  { %1572 = vmatprep.subr.mxu0 %v907_v50  ;;  %1643 = vmatprep.subr.mxu1 %v1035_v51  ;;  %v895_v63 = vld [vmem:[%s7355_s1 + $0x1ae8] sm:$0xff]  ;;  %v894_v2 = vld [vmem:[%s7355_s1 + $0x1ae0] sm:$0xff]  ;;  %v225_v50 = vld [vmem:[%s7355_s1 + $0x5f8] sm:$0xff] }
  0xf4   :  { %1573 = vmatpush2.msra.mxu0 %v906_v52  ;;  %1644 = vmatpush2.msra.mxu1 %v1034_v53  ;;  %v1023_v1 = vld [vmem:[%s7355_s1 + $0x1ee8] sm:$0xff]  ;;  %v1022_v4 = vld [vmem:[%s7355_s1 + $0x1ee0] sm:$0xff]  ;;  %v96_v51 = vld [vmem:[%s7355_s1 + $0x1f0] sm:$0xff] }
  0xf5   :  { %1574 = vmatprep.subr.mxu0 %v903_v54  ;;  %1645 = vmatprep.subr.mxu1 %v1031_v55  ;;  %v891_v5 = vld [vmem:[%s7355_s1 + $0x1ac8] sm:$0xff]  ;;  %v890_v9 = vld [vmem:[%s7355_s1 + $0x1ac0] sm:$0xff]  ;;  %v224_v52 = vld [vmem:[%s7355_s1 + $0x5f0] sm:$0xff] }
  0xf6   :  { %1575 = vmatpush2.msra.mxu0 %v902_v56  ;;  %1646 = vmatpush2.msra.mxu1 %v1030_v57  ;;  %v1019_v6 = vld [vmem:[%s7355_s1 + $0x1ec8] sm:$0xff]  ;;  %v1018_v10 = vld [vmem:[%s7355_s1 + $0x1ec0] sm:$0xff]  ;;  %v93_v53 = vld [vmem:[%s7355_s1 + $0x1d8] sm:$0xff] }
  0xf7   :  { %1576 = vmatprep.subr.mxu0 %v899_v58  ;;  %1647 = vmatprep.subr.mxu1 %v1027_v59  ;;  %v887_v12 = vld [vmem:[%s7355_s1 + $0x1aa8] sm:$0xff]  ;;  %v886_v14 = vld [vmem:[%s7355_s1 + $0x1aa0] sm:$0xff]  ;;  %v221_v54 = vld [vmem:[%s7355_s1 + $0x5d8] sm:$0xff] }
  0xf8   :  { %1577 = vmatpush2.msra.mxu0 %v898_v61  ;;  %1648 = vmatpush2.msra.mxu1 %v1026_v62  ;;  %v1015_v13 = vld [vmem:[%s7355_s1 + $0x1ea8] sm:$0xff]  ;;  %v1014_v15 = vld [vmem:[%s7355_s1 + $0x1ea0] sm:$0xff]  ;;  %v92_v55 = vld [vmem:[%s7355_s1 + $0x1d0] sm:$0xff] }
  0xf9   :  { %1578 = vmatprep.subr.mxu0 %v895_v63  ;;  %1649 = vmatprep.subr.mxu1 %v1023_v1  ;;  %v883_v16 = vld [vmem:[%s7355_s1 + $0x1a88] sm:$0xff]  ;;  %v882_v19 = vld [vmem:[%s7355_s1 + $0x1a80] sm:$0xff]  ;;  %v220_v56 = vld [vmem:[%s7355_s1 + $0x5d0] sm:$0xff] }
  0xfa   :  { %1579 = vmatpush2.msra.mxu0 %v894_v2  ;;  %1650 = vmatpush2.msra.mxu1 %v1022_v4  ;;  %v1011_v17 = vld [vmem:[%s7355_s1 + $0x1e88] sm:$0xff]  ;;  %v1010_v21 = vld [vmem:[%s7355_s1 + $0x1e80] sm:$0xff]  ;;  %v89_v57 = vld [vmem:[%s7355_s1 + $0x1b8] sm:$0xff] }
  0xfb   :  { %1580 = vmatprep.subr.mxu0 %v891_v5  ;;  %1651 = vmatprep.subr.mxu1 %v1019_v6  ;;  %v1058_v22 = vld [vmem:[%s7357_s2] sm:$0xf]  ;;  %v879_v24 = vld [vmem:[%s7355_s1 + $0x1a68] sm:$0xff]  ;;  %v217_v58 = vld [vmem:[%s7355_s1 + $0x5b8] sm:$0xff] }
  0xfc   :  { %1581 = vmatpush2.msra.mxu0 %v890_v9  ;;  %1652 = vmatpush2.msra.mxu1 %v1018_v10  ;;  %v1007_v25 = vld [vmem:[%s7355_s1 + $0x1e68] sm:$0xff]  ;;  %v878_v26 = vld [vmem:[%s7355_s1 + $0x1a60] sm:$0xff]  ;;  %v1063_v30 = vrot.slane %v1058_v22, %v1062_v18  ;;  %v88_v59 = vld [vmem:[%s7355_s1 + $0x1b0] sm:$0xff] }
  0xfd   :  { %1582 = vmatprep.subr.mxu0 %v887_v12  ;;  %1653 = vmatprep.subr.mxu1 %v1015_v13  ;;  %v1006_v27 = vld [vmem:[%s7355_s1 + $0x1e60] sm:$0xff]  ;;  %v875_v28 = vld [vmem:[%s7355_s1 + $0x1a48] sm:$0xff]  ;;  %v85_v61 = vld [vmem:[%s7355_s1 + $0x198] sm:$0xff] }
  0xfe   :  { %1583 = vmatpush2.msra.mxu0 %v886_v14  ;;  %1654 = vmatpush2.msra.mxu1 %v1014_v15  ;;  %v1003_v29 = vld [vmem:[%s7355_s1 + $0x1e48] sm:$0xff]  ;;  %v874_v31 = vld [vmem:[%s7355_s1 + $0x1a40] sm:$0xff]  ;;  %v213_v62 = vld [vmem:[%s7355_s1 + $0x598] sm:$0xff] }
  0xff   :  { %1584 = vmatprep.subr.mxu0 %v883_v16  ;;  %1655 = vmatprep.subr.mxu1 %v1011_v17  ;;  %v1002_v32 = vld [vmem:[%s7355_s1 + $0x1e40] sm:$0xff]  ;;  %v871_v34 = vld [vmem:[%s7355_s1 + $0x1a28] sm:$0xff]  ;;  %v84_v63 = vld [vmem:[%s7355_s1 + $0x190] sm:$0xff] }
 0x100   :  { %1585 = vmatpush2.msra.mxu0 %v882_v19  ;;  %1656 = vmatpush2.msra.mxu1 %v1010_v21  ;;  %v999_v35 = vld [vmem:[%s7355_s1 + $0x1e28] sm:$0xff]  ;;  %v870_v36 = vld [vmem:[%s7355_s1 + $0x1a20] sm:$0xff]  ;;  %v212_v1 = vld [vmem:[%s7355_s1 + $0x590] sm:$0xff] }
 0x101   :  { %1586 = vmatprep.subr.mxu0 %v879_v24  ;;  %1657 = vmatprep.subr.mxu1 %v1007_v25  ;;  %v998_v37 = vld [vmem:[%s7355_s1 + $0x1e20] sm:$0xff]  ;;  %v867_v40 = vld [vmem:[%s7355_s1 + $0x1a08] sm:$0xff]  ;;  %v81_v2 = vld [vmem:[%s7355_s1 + $0x178] sm:$0xff] }
 0x102   :  { %1587 = vmatpush2.msra.mxu0 %v878_v26  ;;  %1658 = vmatpush2.msra.mxu1 %v1006_v27  ;;  %v995_v41 = vld [vmem:[%s7355_s1 + $0x1e08] sm:$0xff]  ;;  %v866_v44 = vld [vmem:[%s7355_s1 + $0x1a00] sm:$0xff]  ;;  %v209_v4 = vld [vmem:[%s7355_s1 + $0x578] sm:$0xff] }
 0x103   :  { %1588 = vmatprep.subr.mxu0 %v875_v28  ;;  %1659 = vmatprep.subr.mxu1 %v1003_v29  ;;  %v1170_v38 = vpop.f32.mrf.mxu0  ;;  %v994_v46 = vld [vmem:[%s7355_s1 + $0x1e00] sm:$0xff]  ;;  %v80_v5 = vld [vmem:[%s7355_s1 + $0x170] sm:$0xff]  ;;  %v77_v9 = vld [vmem:[%s7355_s1 + $0x158] sm:$0xff] }
 0x104   :  { %1589 = vmatpush2.msra.mxu0 %v874_v31  ;;  %1660 = vmatpush2.msra.mxu1 %v1002_v32  ;;  %v1171_v43 = vadd.f32 %v1170_v38, %v1063_v30  ;;  %v208_v6 = vld [vmem:[%s7355_s1 + $0x570] sm:$0xff]  ;;  %v205_v10 = vld [vmem:[%s7355_s1 + $0x558] sm:$0xff] }
 0x105   :  { %1590 = vmatprep.subr.mxu0 %v871_v34  ;;  %1661 = vmatprep.subr.mxu1 %v999_v35  ;;  %v1241_v45 = vpop.f32.mrf.mxu1  ;;  %v76_v12 = vld [vmem:[%s7355_s1 + $0x150] sm:$0xff]  ;;  %v73_v14 = vld [vmem:[%s7355_s1 + $0x138] sm:$0xff] }
 0x106   :  { %1591 = vmatpush2.msra.mxu0 %v870_v36  ;;  %1662 = vmatpush2.msra.mxu1 %v998_v37  ;;  %v4745_v48 = vadd.f32 %v1241_v45, %v1171_v43  ;;  %v204_v13 = vld [vmem:[%s7355_s1 + $0x550] sm:$0xff]  ;;  %v201_v15 = vld [vmem:[%s7355_s1 + $0x538] sm:$0xff] }
 0x107   :  { %1592 = vmatprep.subr.mxu0 %v867_v40  ;;  %1663 = vmatprep.subr.mxu1 %v995_v41  ;;  %v72_v16 = vld [vmem:[%s7355_s1 + $0x130] sm:$0xff]  ;;  %v69_v19 = vld [vmem:[%s7355_s1 + $0x118] sm:$0xff] }
 0x108   :  { %1593 = vmatpush2.msra.mxu0 %v866_v44  ;;  %1594 = vmatprep.mubr.f32.mxu0 %v4735_v42  ;;  %v200_v17 = vld [vmem:[%s7355_s1 + $0x530] sm:$0xff]  ;;  %v197_v21 = vld [vmem:[%s7355_s1 + $0x518] sm:$0xff] }
 0x109   :  { %1664 = vmatpush2.msra.mxu1 %v994_v46  ;;  %1595 = vmatmul.mubr.f32.vlgmr.msra.gmra.mxu0 %v32_v33  ;;  %v68_v22 = vld [vmem:[%s7355_s1 + $0x110] sm:$0xff]  ;;  %v65_v25 = vld [vmem:[%s7355_s1 + $0xf8] sm:$0xff] }
 0x10a   :  { %1665 = vmatprep.mubr.f32.mxu1 %v4743_v47  ;;  %1672 = vmatprep.subr.mxu0 %v97_v49  ;;  %v196_v24 = vld [vmem:[%s7355_s1 + $0x510] sm:$0xff]  ;;  %v193_v26 = vld [vmem:[%s7355_s1 + $0x4f8] sm:$0xff] }
 0x10b   :  { %1743 = vmatprep.subr.mxu1 %v225_v50  ;;  %1666 = vmatmul.mubr.f32.vlgmr.msra.gmra.mxu1 %v33_v39  ;;  %v64_v27 = vld [vmem:[%s7355_s1 + $0xf0] sm:$0xff]  ;;  %v61_v29 = vld [vmem:[%s7355_s1 + $0xd8] sm:$0xff] }
 0x10c   :  { %1673 = vmatpush1.msra.mxu0 %v96_v51  ;;  %1744 = vmatpush1.msra.mxu1 %v224_v52  ;;  %v192_v28 = vld [vmem:[%s7355_s1 + $0x4f0] sm:$0xff]  ;;  %v189_v30 = vld [vmem:[%s7355_s1 + $0x4d8] sm:$0xff] }
 0x10d   :  { %1674 = vmatprep.subr.mxu0 %v93_v53  ;;  %1745 = vmatprep.subr.mxu1 %v221_v54  ;;  %v60_v31 = vld [vmem:[%s7355_s1 + $0xd0] sm:$0xff]  ;;  %v57_v33 = vld [vmem:[%s7355_s1 + $0xb8] sm:$0xff] }
 0x10e   :  { %1675 = vmatpush1.msra.mxu0 %v92_v55  ;;  %1746 = vmatpush1.msra.mxu1 %v220_v56  ;;  %v188_v32 = vld [vmem:[%s7355_s1 + $0x4d0] sm:$0xff]  ;;  %v185_v34 = vld [vmem:[%s7355_s1 + $0x4b8] sm:$0xff] }
 0x10f   :  { %1676 = vmatprep.subr.mxu0 %v89_v57  ;;  %1747 = vmatprep.subr.mxu1 %v217_v58  ;;  %v56_v35 = vld [vmem:[%s7355_s1 + $0xb0] sm:$0xff]  ;;  %v53_v37 = vld [vmem:[%s7355_s1 + $0x98] sm:$0xff] }
 0x110   :  { %1677 = vmatpush1.msra.mxu0 %v88_v59  ;;  %1748 = vmatpush1.msra.mxu1 %v216_v60  ;;  %v184_v36 = vld [vmem:[%s7355_s1 + $0x4b0] sm:$0xff]  ;;  %v181_v38 = vld [vmem:[%s7355_s1 + $0x498] sm:$0xff] }
 0x111   :  { %1678 = vmatprep.subr.mxu0 %v85_v61  ;;  %1749 = vmatprep.subr.mxu1 %v213_v62  ;;  %v52_v39 = vld [vmem:[%s7355_s1 + $0x90] sm:$0xff]  ;;  %v49_v41 = vld [vmem:[%s7355_s1 + $0x78] sm:$0xff] }
 0x112   :  { %1679 = vmatpush1.msra.mxu0 %v84_v63  ;;  %1750 = vmatpush1.msra.mxu1 %v212_v1  ;;  %v180_v40 = vld [vmem:[%s7355_s1 + $0x490] sm:$0xff]  ;;  %v177_v43 = vld [vmem:[%s7355_s1 + $0x478] sm:$0xff] }
 0x113   :  { %1680 = vmatprep.subr.mxu0 %v81_v2  ;;  %1751 = vmatprep.subr.mxu1 %v209_v4  ;;  %v48_v44 = vld [vmem:[%s7355_s1 + $0x70] sm:$0xff]  ;;  %v45_v46 = vld [vmem:[%s7355_s1 + $0x58] sm:$0xff] }
 0x114   :  { %1681 = vmatpush1.msra.mxu0 %v80_v5  ;;  %1752 = vmatpush1.msra.mxu1 %v208_v6  ;;  %v176_v45 = vld [vmem:[%s7355_s1 + $0x470] sm:$0xff]  ;;  %v173_v49 = vld [vmem:[%s7355_s1 + $0x458] sm:$0xff] }
 0x115   :  { %1682 = vmatprep.subr.mxu0 %v77_v9  ;;  %1753 = vmatprep.subr.mxu1 %v205_v10  ;;  %v44_v50 = vld [vmem:[%s7355_s1 + $0x50] sm:$0xff]  ;;  %v41_v52 = vld [vmem:[%s7355_s1 + $0x38] sm:$0xff] }
 0x116   :  { %1683 = vmatpush1.msra.mxu0 %v76_v12  ;;  %1754 = vmatpush1.msra.mxu1 %v204_v13  ;;  %v172_v51 = vld [vmem:[%s7355_s1 + $0x450] sm:$0xff]  ;;  %v169_v53 = vld [vmem:[%s7355_s1 + $0x438] sm:$0xff] }
 0x117   :  { %1684 = vmatprep.subr.mxu0 %v73_v14  ;;  %1755 = vmatprep.subr.mxu1 %v201_v15  ;;  %v40_v54 = vld [vmem:[%s7355_s1 + $0x30] sm:$0xff]  ;;  %v37_v56 = vld [vmem:[%s7355_s1 + $0x18] sm:$0xff] }
 0x118   :  { %1685 = vmatpush1.msra.mxu0 %v72_v16  ;;  %1756 = vmatpush1.msra.mxu1 %v200_v17  ;;  %v168_v55 = vld [vmem:[%s7355_s1 + $0x430] sm:$0xff]  ;;  %v165_v57 = vld [vmem:[%s7355_s1 + $0x418] sm:$0xff] }
 0x119   :  { %1686 = vmatprep.subr.mxu0 %v69_v19  ;;  %1757 = vmatprep.subr.mxu1 %v197_v21  ;;  %v36_v58 = vld [vmem:[%s7355_s1 + $0x10] sm:$0xff]  ;;  %v161_v60 = vld [vmem:[%s7355_s1 + $0x3f8] sm:$0xff] }
 0x11a   :  { %1687 = vmatpush1.msra.mxu0 %v68_v22  ;;  %1758 = vmatpush1.msra.mxu1 %v196_v24  ;;  %v164_v59 = vld [vmem:[%s7355_s1 + $0x410] sm:$0xff]  ;;  %v289_v61 = vld [vmem:[%s7355_s1 + $0x7f8] sm:$0xff] }
 0x11b   :  { %1688 = vmatprep.subr.mxu0 %v65_v25  ;;  %1759 = vmatprep.subr.mxu1 %v193_v26  ;;  %v160_v62 = vld [vmem:[%s7355_s1 + $0x3f0] sm:$0xff]  ;;  %v157_v1 = vld [vmem:[%s7355_s1 + $0x3d8] sm:$0xff] }
 0x11c   :  { %1689 = vmatpush1.msra.mxu0 %v64_v27  ;;  %1760 = vmatpush1.msra.mxu1 %v192_v28  ;;  %v288_v63 = vld [vmem:[%s7355_s1 + $0x7f0] sm:$0xff]  ;;  %v285_v2 = vld [vmem:[%s7355_s1 + $0x7d8] sm:$0xff] }
 0x11d   :  { %1690 = vmatprep.subr.mxu0 %v61_v29  ;;  %1761 = vmatprep.subr.mxu1 %v189_v30  ;;  %v156_v4 = vld [vmem:[%s7355_s1 + $0x3d0] sm:$0xff]  ;;  %v153_v6 = vld [vmem:[%s7355_s1 + $0x3b8] sm:$0xff] }
 0x11e   :  { %1691 = vmatpush1.msra.mxu0 %v60_v31  ;;  %1762 = vmatpush1.msra.mxu1 %v188_v32  ;;  %v284_v5 = vld [vmem:[%s7355_s1 + $0x7d0] sm:$0xff]  ;;  %v281_v9 = vld [vmem:[%s7355_s1 + $0x7b8] sm:$0xff] }
 0x11f   :  { %1692 = vmatprep.subr.mxu0 %v57_v33  ;;  %1763 = vmatprep.subr.mxu1 %v185_v34  ;;  %v152_v10 = vld [vmem:[%s7355_s1 + $0x3b0] sm:$0xff]  ;;  %v149_v13 = vld [vmem:[%s7355_s1 + $0x398] sm:$0xff] }
 0x120   :  { %1693 = vmatpush1.msra.mxu0 %v56_v35  ;;  %1764 = vmatpush1.msra.mxu1 %v184_v36  ;;  %v280_v12 = vld [vmem:[%s7355_s1 + $0x7b0] sm:$0xff]  ;;  %v277_v14 = vld [vmem:[%s7355_s1 + $0x798] sm:$0xff] }
 0x121   :  { %1694 = vmatprep.subr.mxu0 %v53_v37  ;;  %1765 = vmatprep.subr.mxu1 %v181_v38  ;;  %v148_v15 = vld [vmem:[%s7355_s1 + $0x390] sm:$0xff]  ;;  %v145_v17 = vld [vmem:[%s7355_s1 + $0x378] sm:$0xff] }
 0x122   :  { %1695 = vmatpush1.msra.mxu0 %v52_v39  ;;  %1766 = vmatpush1.msra.mxu1 %v180_v40  ;;  %v276_v16 = vld [vmem:[%s7355_s1 + $0x790] sm:$0xff]  ;;  %v273_v19 = vld [vmem:[%s7355_s1 + $0x778] sm:$0xff] }
 0x123   :  { %1696 = vmatprep.subr.mxu0 %v49_v41  ;;  %1767 = vmatprep.subr.mxu1 %v177_v43  ;;  %v144_v21 = vld [vmem:[%s7355_s1 + $0x370] sm:$0xff]  ;;  %v141_v24 = vld [vmem:[%s7355_s1 + $0x358] sm:$0xff] }
 0x124   :  { %1697 = vmatpush1.msra.mxu0 %v48_v44  ;;  %1768 = vmatpush1.msra.mxu1 %v176_v45  ;;  %v272_v22 = vld [vmem:[%s7355_s1 + $0x770] sm:$0xff]  ;;  %v269_v25 = vld [vmem:[%s7355_s1 + $0x758] sm:$0xff] }
 0x125   :  { %1698 = vmatprep.subr.mxu0 %v45_v46  ;;  %1769 = vmatprep.subr.mxu1 %v173_v49  ;;  %v140_v26 = vld [vmem:[%s7355_s1 + $0x350] sm:$0xff]  ;;  %v137_v28 = vld [vmem:[%s7355_s1 + $0x338] sm:$0xff] }
 0x126   :  { %1699 = vmatpush1.msra.mxu0 %v44_v50  ;;  %1770 = vmatpush1.msra.mxu1 %v172_v51  ;;  %v268_v27 = vld [vmem:[%s7355_s1 + $0x750] sm:$0xff]  ;;  %v265_v29 = vld [vmem:[%s7355_s1 + $0x738] sm:$0xff] }
 0x127   :  { %1700 = vmatprep.subr.mxu0 %v41_v52  ;;  %1771 = vmatprep.subr.mxu1 %v169_v53  ;;  %v136_v30 = vld [vmem:[%s7355_s1 + $0x330] sm:$0xff]  ;;  %v133_v32 = vld [vmem:[%s7355_s1 + $0x318] sm:$0xff] }
 0x128   :  { %1701 = vmatpush1.msra.mxu0 %v40_v54  ;;  %1772 = vmatpush1.msra.mxu1 %v168_v55  ;;  %v264_v31 = vld [vmem:[%s7355_s1 + $0x730] sm:$0xff]  ;;  %v261_v33 = vld [vmem:[%s7355_s1 + $0x718] sm:$0xff] }
 0x129   :  { %1702 = vmatprep.subr.mxu0 %v37_v56  ;;  %1773 = vmatprep.subr.mxu1 %v165_v57  ;;  %v132_v34 = vld [vmem:[%s7355_s1 + $0x310] sm:$0xff]  ;;  %v129_v36 = vld [vmem:[%s7355_s1 + $0x2f8] sm:$0xff] }
 0x12a   :  { %1703 = vmatpush1.msra.mxu0 %v36_v58  ;;  %1774 = vmatpush1.msra.mxu1 %v164_v59  ;;  %v260_v35 = vld [vmem:[%s7355_s1 + $0x710] sm:$0xff]  ;;  %v257_v37 = vld [vmem:[%s7355_s1 + $0x6f8] sm:$0xff] }
 0x12b   :  { %1704 = vmatprep.subr.mxu0 %v161_v60  ;;  %1775 = vmatprep.subr.mxu1 %v289_v61  ;;  %v128_v38 = vld [vmem:[%s7355_s1 + $0x2f0] sm:$0xff]  ;;  %v125_v40 = vld [vmem:[%s7355_s1 + $0x2d8] sm:$0xff]  ;;  %v5103_v61 = vpop.f32.mrf.mxu0 }
 0x12c   :  { %1705 = vmatpush2.msra.mxu0 %v160_v62  ;;  %1776 = vmatpush2.msra.mxu1 %v288_v63  ;;  %v256_v39 = vld [vmem:[%s7355_s1 + $0x6f0] sm:$0xff]  ;;  %v253_v41 = vld [vmem:[%s7355_s1 + $0x6d8] sm:$0xff] }
 0x12d   :  { %1706 = vmatprep.subr.mxu0 %v157_v1  ;;  %1777 = vmatprep.subr.mxu1 %v285_v2  ;;  %v124_v43 = vld [vmem:[%s7355_s1 + $0x2d0] sm:$0xff]  ;;  %v121_v45 = vld [vmem:[%s7355_s1 + $0x2b8] sm:$0xff] }
 0x12e   :  { %1707 = vmatpush2.msra.mxu0 %v156_v4  ;;  %1778 = vmatpush2.msra.mxu1 %v284_v5  ;;  %v252_v44 = vld [vmem:[%s7355_s1 + $0x6d0] sm:$0xff]  ;;  %v249_v46 = vld [vmem:[%s7355_s1 + $0x6b8] sm:$0xff]  ;;  %v5117_v4 = vpop.f32.mrf.mxu1 }
 0x12f   :  { %1708 = vmatprep.subr.mxu0 %v153_v6  ;;  %1779 = vmatprep.subr.mxu1 %v281_v9  ;;  %v120_v49 = vld [vmem:[%s7355_s1 + $0x2b0] sm:$0xff]  ;;  %v117_v51 = vld [vmem:[%s7355_s1 + $0x298] sm:$0xff] }
 0x130   :  { %1709 = vmatpush2.msra.mxu0 %v152_v10  ;;  %1780 = vmatpush2.msra.mxu1 %v280_v12  ;;  %v248_v50 = vld [vmem:[%s7355_s1 + $0x6b0] sm:$0xff]  ;;  %v245_v52 = vld [vmem:[%s7355_s1 + $0x698] sm:$0xff] }
 0x131   :  { %1710 = vmatprep.subr.mxu0 %v149_v13  ;;  %1781 = vmatprep.subr.mxu1 %v277_v14  ;;  %v116_v53 = vld [vmem:[%s7355_s1 + $0x290] sm:$0xff]  ;;  %v113_v55 = vld [vmem:[%s7355_s1 + $0x278] sm:$0xff] }
 0x132   :  { %1711 = vmatpush2.msra.mxu0 %v148_v15  ;;  %1782 = vmatpush2.msra.mxu1 %v276_v16  ;;  %v244_v54 = vld [vmem:[%s7355_s1 + $0x690] sm:$0xff]  ;;  %v241_v56 = vld [vmem:[%s7355_s1 + $0x678] sm:$0xff] }
 0x133   :  { %1712 = vmatprep.subr.mxu0 %v145_v17  ;;  %1783 = vmatprep.subr.mxu1 %v273_v19  ;;  %v112_v57 = vld [vmem:[%s7355_s1 + $0x270] sm:$0xff]  ;;  %v109_v59 = vld [vmem:[%s7355_s1 + $0x258] sm:$0xff] }
 0x134   :  { %1713 = vmatpush2.msra.mxu0 %v144_v21  ;;  %1784 = vmatpush2.msra.mxu1 %v272_v22  ;;  %v240_v58 = vld [vmem:[%s7355_s1 + $0x670] sm:$0xff]  ;;  %v237_v60 = vld [vmem:[%s7355_s1 + $0x658] sm:$0xff]  ;;  %v3105_v21 = vld [vmem:[%s7356_s0] sm:$0xff] }
 0x135   :  { %1714 = vmatprep.subr.mxu0 %v141_v24  ;;  %1785 = vmatprep.subr.mxu1 %v269_v25  ;;  %v108_v62 = vld [vmem:[%s7355_s1 + $0x250] sm:$0xff]  ;;  %v105_v1 = vld [vmem:[%s7355_s1 + $0x238] sm:$0xff] }
 0x136   :  { %1715 = vmatpush2.msra.mxu0 %v140_v26  ;;  %1786 = vmatpush2.msra.mxu1 %v268_v27  ;;  %v236_v63 = vld [vmem:[%s7355_s1 + $0x650] sm:$0xff]  ;;  %v233_v2 = vld [vmem:[%s7355_s1 + $0x638] sm:$0xff]  ;;  %v3106_v26 = vld [vmem:[%s7356_s0 + $0x8] sm:$0xff] }
 0x137   :  { %1716 = vmatprep.subr.mxu0 %v137_v28  ;;  %1787 = vmatprep.subr.mxu1 %v265_v29  ;;  %v104_v5 = vld [vmem:[%s7355_s1 + $0x230] sm:$0xff]  ;;  %v101_v10 = vld [vmem:[%s7355_s1 + $0x218] sm:$0xff] }
 0x138   :  { %1717 = vmatpush2.msra.mxu0 %v136_v30  ;;  %1788 = vmatpush2.msra.mxu1 %v264_v31  ;;  %v232_v6 = vld [vmem:[%s7355_s1 + $0x630] sm:$0xff]  ;;  %v229_v12 = vld [vmem:[%s7355_s1 + $0x618] sm:$0xff] }
 0x139   :  { %1718 = vmatprep.subr.mxu0 %v133_v32  ;;  %1789 = vmatprep.subr.mxu1 %v261_v33  ;;  %v100_v14 = vld [vmem:[%s7355_s1 + $0x210] sm:$0xff]  ;;  %v481_v19 = vld [vmem:[%s7355_s1 + $0xdf8] sm:$0xff] }
 0x13a   :  { %1719 = vmatpush2.msra.mxu0 %v132_v34  ;;  %1790 = vmatpush2.msra.mxu1 %v260_v35  ;;  %v228_v16 = vld [vmem:[%s7355_s1 + $0x610] sm:$0xff]  ;;  %v477_v25 = vld [vmem:[%s7355_s1 + $0xdd8] sm:$0xff] }
 0x13b   :  { %1720 = vmatprep.subr.mxu0 %v129_v36  ;;  %1791 = vmatprep.subr.mxu1 %v257_v37  ;;  %v352_v22 = vld [vmem:[%s7355_s1 + $0x9f0] sm:$0xff]  ;;  %v345_v28 = vld [vmem:[%s7355_s1 + $0x9b8] sm:$0xff] }
 0x13c   :  { %1721 = vmatpush2.msra.mxu0 %v128_v38  ;;  %1792 = vmatpush2.msra.mxu1 %v256_v39  ;;  %v480_v24 = vld [vmem:[%s7355_s1 + $0xdf0] sm:$0xff]  ;;  %v473_v29 = vld [vmem:[%s7355_s1 + $0xdb8] sm:$0xff] }
 0x13d   :  { %1722 = vmatprep.subr.mxu0 %v125_v40  ;;  %1793 = vmatprep.subr.mxu1 %v253_v41  ;;  %v348_v27 = vld [vmem:[%s7355_s1 + $0x9d0] sm:$0xff]  ;;  %v341_v32 = vld [vmem:[%s7355_s1 + $0x998] sm:$0xff] }
 0x13e   :  { %1723 = vmatpush2.msra.mxu0 %v124_v43  ;;  %1794 = vmatpush2.msra.mxu1 %v252_v44  ;;  %v344_v30 = vld [vmem:[%s7355_s1 + $0x9b0] sm:$0xff]  ;;  %v469_v33 = vld [vmem:[%s7355_s1 + $0xd98] sm:$0xff] }
 0x13f   :  { %1724 = vmatprep.subr.mxu0 %v121_v45  ;;  %1795 = vmatprep.subr.mxu1 %v249_v46  ;;  %v472_v31 = vld [vmem:[%s7355_s1 + $0xdb0] sm:$0xff]  ;;  %v337_v36 = vld [vmem:[%s7355_s1 + $0x978] sm:$0xff] }
 0x140   :  { %1725 = vmatpush2.msra.mxu0 %v120_v49  ;;  %1796 = vmatpush2.msra.mxu1 %v248_v50  ;;  %v340_v34 = vld [vmem:[%s7355_s1 + $0x990] sm:$0xff]  ;;  %v465_v37 = vld [vmem:[%s7355_s1 + $0xd78] sm:$0xff] }
 0x141   :  { %1726 = vmatprep.subr.mxu0 %v117_v51  ;;  %1797 = vmatprep.subr.mxu1 %v245_v52  ;;  %v468_v35 = vld [vmem:[%s7355_s1 + $0xd90] sm:$0xff]  ;;  %v333_v40 = vld [vmem:[%s7355_s1 + $0x958] sm:$0xff] }
 0x142   :  { %1727 = vmatpush2.msra.mxu0 %v116_v53  ;;  %1798 = vmatpush2.msra.mxu1 %v244_v54  ;;  %v336_v38 = vld [vmem:[%s7355_s1 + $0x970] sm:$0xff]  ;;  %v461_v41 = vld [vmem:[%s7355_s1 + $0xd58] sm:$0xff] }
 0x143   :  { %1728 = vmatprep.subr.mxu0 %v113_v55  ;;  %1799 = vmatprep.subr.mxu1 %v241_v56  ;;  %v464_v39 = vld [vmem:[%s7355_s1 + $0xd70] sm:$0xff]  ;;  %v329_v45 = vld [vmem:[%s7355_s1 + $0x938] sm:$0xff] }
 0x144   :  { %1729 = vmatpush2.msra.mxu0 %v112_v57  ;;  %1800 = vmatpush2.msra.mxu1 %v240_v58  ;;  %v332_v43 = vld [vmem:[%s7355_s1 + $0x950] sm:$0xff]  ;;  %v457_v46 = vld [vmem:[%s7355_s1 + $0xd38] sm:$0xff] }
 0x145   :  { %1730 = vmatprep.subr.mxu0 %v109_v59  ;;  %1801 = vmatprep.subr.mxu1 %v237_v60  ;;  %v1312_v9 = vpop.f32.mrf.mxu0  ;;  %v460_v44 = vld [vmem:[%s7355_s1 + $0xd50] sm:$0xff]  ;;  %v325_v51 = vld [vmem:[%s7355_s1 + $0x918] sm:$0xff] }
 0x146   :  { %1731 = vmatpush2.msra.mxu0 %v108_v62  ;;  %1802 = vmatpush2.msra.mxu1 %v236_v63  ;;  %v1313_v13 = vadd.f32 %v1312_v9, %v4745_v48  ;;  %v353_v48 = vld [vmem:[%s7355_s1 + $0x9f8] sm:$0xff]  ;;  %v328_v49 = vld [vmem:[%s7355_s1 + $0x930] sm:$0xff] }
 0x147   :  { %1732 = vmatprep.subr.mxu0 %v105_v1  ;;  %1803 = vmatprep.subr.mxu1 %v233_v2  ;;  %v1383_v15 = vpop.f32.mrf.mxu1  ;;  %v456_v50 = vld [vmem:[%s7355_s1 + $0xd30] sm:$0xff]  ;;  %v453_v52 = vld [vmem:[%s7355_s1 + $0xd18] sm:$0xff] }
 0x148   :  { %1733 = vmatpush2.msra.mxu0 %v104_v5  ;;  %1804 = vmatpush2.msra.mxu1 %v232_v6  ;;  %v5138_v17 = vadd.f32 %v1383_v15, %v1313_v13  ;;  %v324_v53 = vld [vmem:[%s7355_s1 + $0x910] sm:$0xff]  ;;  %v321_v55 = vld [vmem:[%s7355_s1 + $0x8f8] sm:$0xff] }
 0x149   :  { %1734 = vmatprep.subr.mxu0 %v101_v10  ;;  %1805 = vmatprep.subr.mxu1 %v229_v12  ;;  %v452_v54 = vld [vmem:[%s7355_s1 + $0xd10] sm:$0xff]  ;;  %v449_v56 = vld [vmem:[%s7355_s1 + $0xcf8] sm:$0xff] }
 0x14a   :  { %1735 = vmatpush2.msra.mxu0 %v100_v14  ;;  %1736 = vmatprep.mubr.f32.mxu0 %v3539_v0  ;;  %v349_v0 = vld [vmem:[%s7355_s1 + $0x9d8] sm:$0xff]  ;;  %v320_v57 = vld [vmem:[%s7355_s1 + $0x8f0] sm:$0xff] }
 0x14b   :  { %1806 = vmatpush2.msra.mxu1 %v228_v16  ;;  %1737 = vmatmul.mubr.f32.vlgmr.msra.gmra.mxu0 %v3105_v21  ;;  %v448_v58 = vld [vmem:[%s7355_s1 + $0xcf0] sm:$0xff]  ;;  %v317_v59 = vld [vmem:[%s7355_s1 + $0x8d8] sm:$0xff] }
 0x14c   :  { %1807 = vmatprep.mubr.f32.mxu1 %v3547_v3  ;;  %1814 = vmatprep.subr.mxu0 %v353_v48  ;;  %v476_v3 = vld [vmem:[%s7355_s1 + $0xdd0] sm:$0xff]  ;;  %v445_v60 = vld [vmem:[%s7355_s1 + $0xcd8] sm:$0xff] }
 0x14d   :  { %1885 = vmatprep.subr.mxu1 %v481_v19  ;;  %1808 = vmatmul.mubr.f32.vlgmr.msra.gmra.mxu1 %v3106_v26  ;;  %v316_v62 = vld [vmem:[%s7355_s1 + $0x8d0] sm:$0xff]  ;;  %v313_v1 = vld [vmem:[%s7355_s1 + $0x8b8] sm:$0xff] }
 0x14e   :  { %1815 = vmatpush1.msra.mxu0 %v352_v22  ;;  %1886 = vmatpush1.msra.mxu1 %v480_v24  ;;  %v444_v63 = vld [vmem:[%s7355_s1 + $0xcd0] sm:$0xff]  ;;  %v441_v2 = vld [vmem:[%s7355_s1 + $0xcb8] sm:$0xff] }
 0x14f   :  { %1816 = vmatprep.subr.mxu0 %v349_v0  ;;  %1887 = vmatprep.subr.mxu1 %v477_v25  ;;  %v312_v5 = vld [vmem:[%s7355_s1 + $0x8b0] sm:$0xff]  ;;  %v309_v9 = vld [vmem:[%s7355_s1 + $0x898] sm:$0xff] }
 0x150   :  { %1817 = vmatpush1.msra.mxu0 %v348_v27  ;;  %1888 = vmatpush1.msra.mxu1 %v476_v3  ;;  %v440_v6 = vld [vmem:[%s7355_s1 + $0xcb0] sm:$0xff]  ;;  %v437_v10 = vld [vmem:[%s7355_s1 + $0xc98] sm:$0xff] }
 0x151   :  { %1818 = vmatprep.subr.mxu0 %v345_v28  ;;  %1889 = vmatprep.subr.mxu1 %v473_v29  ;;  %v308_v12 = vld [vmem:[%s7355_s1 + $0x890] sm:$0xff]  ;;  %v305_v14 = vld [vmem:[%s7355_s1 + $0x878] sm:$0xff] }
 0x152   :  { %1819 = vmatpush1.msra.mxu0 %v344_v30  ;;  %1890 = vmatpush1.msra.mxu1 %v472_v31  ;;  %v436_v13 = vld [vmem:[%s7355_s1 + $0xc90] sm:$0xff]  ;;  %v433_v15 = vld [vmem:[%s7355_s1 + $0xc78] sm:$0xff] }
 0x153   :  { %1820 = vmatprep.subr.mxu0 %v341_v32  ;;  %1891 = vmatprep.subr.mxu1 %v469_v33  ;;  %v304_v16 = vld [vmem:[%s7355_s1 + $0x870] sm:$0xff]  ;;  %v301_v19 = vld [vmem:[%s7355_s1 + $0x858] sm:$0xff] }
 0x154   :  { %1821 = vmatpush1.msra.mxu0 %v340_v34  ;;  %1892 = vmatpush1.msra.mxu1 %v468_v35  ;;  %v432_v48 = vld [vmem:[%s7355_s1 + $0xc70] sm:$0xff]  ;;  %v429_v21 = vld [vmem:[%s7355_s1 + $0xc58] sm:$0xff] }
 0x155   :  { %1822 = vmatprep.subr.mxu0 %v337_v36  ;;  %1893 = vmatprep.subr.mxu1 %v465_v37  ;;  %v300_v22 = vld [vmem:[%s7355_s1 + $0x850] sm:$0xff]  ;;  %v297_v0 = vld [vmem:[%s7355_s1 + $0x838] sm:$0xff] }
 0x156   :  { %1823 = vmatpush1.msra.mxu0 %v336_v38  ;;  %1894 = vmatpush1.msra.mxu1 %v464_v39  ;;  %v428_v24 = vld [vmem:[%s7355_s1 + $0xc50] sm:$0xff]  ;;  %v425_v25 = vld [vmem:[%s7355_s1 + $0xc38] sm:$0xff] }
 0x157   :  { %1824 = vmatprep.subr.mxu0 %v333_v40  ;;  %1895 = vmatprep.subr.mxu1 %v461_v41  ;;  %v296_v26 = vld [vmem:[%s7355_s1 + $0x830] sm:$0xff]  ;;  %v293_v3 = vld [vmem:[%s7355_s1 + $0x818] sm:$0xff] }
 0x158   :  { %1825 = vmatpush1.msra.mxu0 %v332_v43  ;;  %1896 = vmatpush1.msra.mxu1 %v460_v44  ;;  %v424_v27 = vld [vmem:[%s7355_s1 + $0xc30] sm:$0xff]  ;;  %v421_v28 = vld [vmem:[%s7355_s1 + $0xc18] sm:$0xff] }
 0x159   :  { %1826 = vmatprep.subr.mxu0 %v329_v45  ;;  %1897 = vmatprep.subr.mxu1 %v457_v46  ;;  %v292_v29 = vld [vmem:[%s7355_s1 + $0x810] sm:$0xff]  ;;  %v417_v31 = vld [vmem:[%s7355_s1 + $0xbf8] sm:$0xff] }
 0x15a   :  { %1827 = vmatpush1.msra.mxu0 %v328_v49  ;;  %1898 = vmatpush1.msra.mxu1 %v456_v50  ;;  %v420_v30 = vld [vmem:[%s7355_s1 + $0xc10] sm:$0xff]  ;;  %v545_v32 = vld [vmem:[%s7355_s1 + $0xff8] sm:$0xff] }
 0x15b   :  { %1828 = vmatprep.subr.mxu0 %v325_v51  ;;  %1899 = vmatprep.subr.mxu1 %v453_v52  ;;  %v416_v33 = vld [vmem:[%s7355_s1 + $0xbf0] sm:$0xff]  ;;  %v413_v35 = vld [vmem:[%s7355_s1 + $0xbd8] sm:$0xff] }
 0x15c   :  { %1829 = vmatpush1.msra.mxu0 %v324_v53  ;;  %1900 = vmatpush1.msra.mxu1 %v452_v54  ;;  %v544_v34 = vld [vmem:[%s7355_s1 + $0xff0] sm:$0xff]  ;;  %v541_v36 = vld [vmem:[%s7355_s1 + $0xfd8] sm:$0xff] }
 0x15d   :  { %1830 = vmatprep.subr.mxu0 %v321_v55  ;;  %1901 = vmatprep.subr.mxu1 %v449_v56  ;;  %v412_v37 = vld [vmem:[%s7355_s1 + $0xbd0] sm:$0xff]  ;;  %v409_v39 = vld [vmem:[%s7355_s1 + $0xbb8] sm:$0xff] }
 0x15e   :  { %1831 = vmatpush1.msra.mxu0 %v320_v57  ;;  %1902 = vmatpush1.msra.mxu1 %v448_v58  ;;  %v540_v38 = vld [vmem:[%s7355_s1 + $0xfd0] sm:$0xff]  ;;  %v537_v40 = vld [vmem:[%s7355_s1 + $0xfb8] sm:$0xff] }
 0x15f   :  { %1832 = vmatprep.subr.mxu0 %v317_v59  ;;  %1903 = vmatprep.subr.mxu1 %v445_v60  ;;  %v408_v41 = vld [vmem:[%s7355_s1 + $0xbb0] sm:$0xff]  ;;  %v405_v44 = vld [vmem:[%s7355_s1 + $0xb98] sm:$0xff] }
 0x160   :  { %1833 = vmatpush1.msra.mxu0 %v316_v62  ;;  %1904 = vmatpush1.msra.mxu1 %v444_v63  ;;  %v536_v43 = vld [vmem:[%s7355_s1 + $0xfb0] sm:$0xff]  ;;  %v533_v45 = vld [vmem:[%s7355_s1 + $0xf98] sm:$0xff] }
 0x161   :  { %1834 = vmatprep.subr.mxu0 %v313_v1  ;;  %1905 = vmatprep.subr.mxu1 %v441_v2  ;;  %v404_v46 = vld [vmem:[%s7355_s1 + $0xb90] sm:$0xff]  ;;  %v401_v50 = vld [vmem:[%s7355_s1 + $0xb78] sm:$0xff] }
 0x162   :  { %1835 = vmatpush1.msra.mxu0 %v312_v5  ;;  %1906 = vmatpush1.msra.mxu1 %v440_v6  ;;  %v532_v49 = vld [vmem:[%s7355_s1 + $0xf90] sm:$0xff]  ;;  %v529_v51 = vld [vmem:[%s7355_s1 + $0xf78] sm:$0xff] }
 0x163   :  { %1836 = vmatprep.subr.mxu0 %v309_v9  ;;  %1907 = vmatprep.subr.mxu1 %v437_v10  ;;  %v400_v52 = vld [vmem:[%s7355_s1 + $0xb70] sm:$0xff]  ;;  %v397_v54 = vld [vmem:[%s7355_s1 + $0xb58] sm:$0xff] }
 0x164   :  { %1837 = vmatpush1.msra.mxu0 %v308_v12  ;;  %1908 = vmatpush1.msra.mxu1 %v436_v13  ;;  %v528_v53 = vld [vmem:[%s7355_s1 + $0xf70] sm:$0xff]  ;;  %v525_v55 = vld [vmem:[%s7355_s1 + $0xf58] sm:$0xff] }
 0x165   :  { %1838 = vmatprep.subr.mxu0 %v305_v14  ;;  %1909 = vmatprep.subr.mxu1 %v433_v15  ;;  %v396_v56 = vld [vmem:[%s7355_s1 + $0xb50] sm:$0xff]  ;;  %v393_v58 = vld [vmem:[%s7355_s1 + $0xb38] sm:$0xff] }
 0x166   :  { %1839 = vmatpush1.msra.mxu0 %v304_v16  ;;  %1910 = vmatpush1.msra.mxu1 %v432_v48  ;;  %v524_v57 = vld [vmem:[%s7355_s1 + $0xf50] sm:$0xff]  ;;  %v521_v59 = vld [vmem:[%s7355_s1 + $0xf38] sm:$0xff] }
 0x167   :  { %1840 = vmatprep.subr.mxu0 %v301_v19  ;;  %1911 = vmatprep.subr.mxu1 %v429_v21  ;;  %v392_v60 = vld [vmem:[%s7355_s1 + $0xb30] sm:$0xff]  ;;  %v389_v63 = vld [vmem:[%s7355_s1 + $0xb18] sm:$0xff] }
 0x168   :  { %1841 = vmatpush1.msra.mxu0 %v300_v22  ;;  %1912 = vmatpush1.msra.mxu1 %v428_v24  ;;  %v520_v62 = vld [vmem:[%s7355_s1 + $0xf30] sm:$0xff]  ;;  %v517_v1 = vld [vmem:[%s7355_s1 + $0xf18] sm:$0xff] }
 0x169   :  { %1842 = vmatprep.subr.mxu0 %v297_v0  ;;  %1913 = vmatprep.subr.mxu1 %v425_v25  ;;  %v388_v2 = vld [vmem:[%s7355_s1 + $0xb10] sm:$0xff]  ;;  %v385_v6 = vld [vmem:[%s7355_s1 + $0xaf8] sm:$0xff] }
 0x16a   :  { %1843 = vmatpush1.msra.mxu0 %v296_v26  ;;  %1914 = vmatpush1.msra.mxu1 %v424_v27  ;;  %v516_v5 = vld [vmem:[%s7355_s1 + $0xf10] sm:$0xff]  ;;  %v513_v9 = vld [vmem:[%s7355_s1 + $0xef8] sm:$0xff] }
 0x16b   :  { %1844 = vmatprep.subr.mxu0 %v293_v3  ;;  %1915 = vmatprep.subr.mxu1 %v421_v28  ;;  %v384_v10 = vld [vmem:[%s7355_s1 + $0xaf0] sm:$0xff]  ;;  %v381_v13 = vld [vmem:[%s7355_s1 + $0xad8] sm:$0xff] }
 0x16c   :  { %1845 = vmatpush1.msra.mxu0 %v292_v29  ;;  %1916 = vmatpush1.msra.mxu1 %v420_v30  ;;  %v512_v12 = vld [vmem:[%s7355_s1 + $0xef0] sm:$0xff]  ;;  %v509_v14 = vld [vmem:[%s7355_s1 + $0xed8] sm:$0xff] }
 0x16d   :  { %1846 = vmatprep.subr.mxu0 %v417_v31  ;;  %1917 = vmatprep.subr.mxu1 %v545_v32  ;;  %v380_v15 = vld [vmem:[%s7355_s1 + $0xad0] sm:$0xff]  ;;  %v377_v48 = vld [vmem:[%s7355_s1 + $0xab8] sm:$0xff]  ;;  %v5502_v32 = vpop.f32.mrf.mxu0 }
 0x16e   :  { %1847 = vmatpush2.msra.mxu0 %v416_v33  ;;  %1918 = vmatpush2.msra.mxu1 %v544_v34  ;;  %v508_v16 = vld [vmem:[%s7355_s1 + $0xed0] sm:$0xff]  ;;  %v505_v19 = vld [vmem:[%s7355_s1 + $0xeb8] sm:$0xff] }
 0x16f   :  { %1848 = vmatprep.subr.mxu0 %v413_v35  ;;  %1919 = vmatprep.subr.mxu1 %v541_v36  ;;  %v376_v21 = vld [vmem:[%s7355_s1 + $0xab0] sm:$0xff]  ;;  %v373_v24 = vld [vmem:[%s7355_s1 + $0xa98] sm:$0xff] }
 0x170   :  { %1849 = vmatpush2.msra.mxu0 %v412_v37  ;;  %1920 = vmatpush2.msra.mxu1 %v540_v38  ;;  %v504_v22 = vld [vmem:[%s7355_s1 + $0xeb0] sm:$0xff]  ;;  %v501_v0 = vld [vmem:[%s7355_s1 + $0xe98] sm:$0xff]  ;;  %v5516_v37 = vpop.f32.mrf.mxu1 }
 0x171   :  { %1850 = vmatprep.subr.mxu0 %v409_v39  ;;  %1921 = vmatprep.subr.mxu1 %v537_v40  ;;  %v372_v25 = vld [vmem:[%s7355_s1 + $0xa90] sm:$0xff]  ;;  %v369_v27 = vld [vmem:[%s7355_s1 + $0xa78] sm:$0xff] }
 0x172   :  { %1851 = vmatpush2.msra.mxu0 %v408_v41  ;;  %1922 = vmatpush2.msra.mxu1 %v536_v43  ;;  %v500_v26 = vld [vmem:[%s7355_s1 + $0xe90] sm:$0xff]  ;;  %v497_v3 = vld [vmem:[%s7355_s1 + $0xe78] sm:$0xff] }
 0x173   :  { %1852 = vmatprep.subr.mxu0 %v405_v44  ;;  %1923 = vmatprep.subr.mxu1 %v533_v45  ;;  %v368_v28 = vld [vmem:[%s7355_s1 + $0xa70] sm:$0xff]  ;;  %v365_v30 = vld [vmem:[%s7355_s1 + $0xa58] sm:$0xff] }
 0x174   :  { %1853 = vmatpush2.msra.mxu0 %v404_v46  ;;  %1924 = vmatpush2.msra.mxu1 %v532_v49  ;;  %v496_v29 = vld [vmem:[%s7355_s1 + $0xe70] sm:$0xff]  ;;  %v493_v31 = vld [vmem:[%s7355_s1 + $0xe58] sm:$0xff] }
 0x175   :  { %1854 = vmatprep.subr.mxu0 %v401_v50  ;;  %1925 = vmatprep.subr.mxu1 %v529_v51  ;;  %v364_v33 = vld [vmem:[%s7355_s1 + $0xa50] sm:$0xff]  ;;  %v361_v35 = vld [vmem:[%s7355_s1 + $0xa38] sm:$0xff] }
 0x176   :  { %1855 = vmatpush2.msra.mxu0 %v400_v52  ;;  %1926 = vmatpush2.msra.mxu1 %v528_v53  ;;  %v492_v34 = vld [vmem:[%s7355_s1 + $0xe50] sm:$0xff]  ;;  %v489_v36 = vld [vmem:[%s7355_s1 + $0xe38] sm:$0xff] }
 0x177   :  { %1856 = vmatprep.subr.mxu0 %v397_v54  ;;  %1927 = vmatprep.subr.mxu1 %v525_v55  ;;  %v360_v38 = vld [vmem:[%s7355_s1 + $0xa30] sm:$0xff]  ;;  %v357_v41 = vld [vmem:[%s7355_s1 + $0xa18] sm:$0xff] }
 0x178   :  { %1857 = vmatpush2.msra.mxu0 %v396_v56  ;;  %1928 = vmatpush2.msra.mxu1 %v524_v57  ;;  %v488_v39 = vld [vmem:[%s7355_s1 + $0xe30] sm:$0xff]  ;;  %v485_v43 = vld [vmem:[%s7355_s1 + $0xe18] sm:$0xff] }
 0x179   :  { %1858 = vmatprep.subr.mxu0 %v393_v58  ;;  %1929 = vmatprep.subr.mxu1 %v521_v59  ;;  %v356_v45 = vld [vmem:[%s7355_s1 + $0xa10] sm:$0xff]  ;;  %v737_v51 = vld [vmem:[%s7355_s1 + $0x15f8] sm:$0xff] }
 0x17a   :  { %1859 = vmatpush2.msra.mxu0 %v392_v60  ;;  %1930 = vmatpush2.msra.mxu1 %v520_v62  ;;  %v484_v49 = vld [vmem:[%s7355_s1 + $0xe10] sm:$0xff]  ;;  %v733_v55 = vld [vmem:[%s7355_s1 + $0x15d8] sm:$0xff] }
 0x17b   :  { %1860 = vmatprep.subr.mxu0 %v389_v63  ;;  %1931 = vmatprep.subr.mxu1 %v517_v1  ;;  %v3107_v52 = vld [vmem:[%s7356_s0 + $0x10] sm:$0xff]  ;;  %v3108_v56 = vld [vmem:[%s7356_s0 + $0x18] sm:$0xff] }
 0x17c   :  { %1861 = vmatpush2.msra.mxu0 %v388_v2  ;;  %1932 = vmatpush2.msra.mxu1 %v516_v5  ;;  %v608_v53 = vld [vmem:[%s7355_s1 + $0x11f0] sm:$0xff]  ;;  %v601_v58 = vld [vmem:[%s7355_s1 + $0x11b8] sm:$0xff] }
 0x17d   :  { %1862 = vmatprep.subr.mxu0 %v385_v6  ;;  %1933 = vmatprep.subr.mxu1 %v513_v9  ;;  %v736_v54 = vld [vmem:[%s7355_s1 + $0x15f0] sm:$0xff]  ;;  %v729_v59 = vld [vmem:[%s7355_s1 + $0x15b8] sm:$0xff] }
 0x17e   :  { %1863 = vmatpush2.msra.mxu0 %v384_v10  ;;  %1934 = vmatpush2.msra.mxu1 %v512_v12  ;;  %v604_v57 = vld [vmem:[%s7355_s1 + $0x11d0] sm:$0xff]  ;;  %v597_v63 = vld [vmem:[%s7355_s1 + $0x1198] sm:$0xff] }
 0x17f   :  { %1864 = vmatprep.subr.mxu0 %v381_v13  ;;  %1935 = vmatprep.subr.mxu1 %v509_v14  ;;  %v600_v60 = vld [vmem:[%s7355_s1 + $0x11b0] sm:$0xff]  ;;  %v725_v1 = vld [vmem:[%s7355_s1 + $0x1598] sm:$0xff] }
 0x180   :  { %1865 = vmatpush2.msra.mxu0 %v380_v15  ;;  %1936 = vmatpush2.msra.mxu1 %v508_v16  ;;  %v728_v62 = vld [vmem:[%s7355_s1 + $0x15b0] sm:$0xff]  ;;  %v593_v6 = vld [vmem:[%s7355_s1 + $0x1178] sm:$0xff] }
 0x181   :  { %1866 = vmatprep.subr.mxu0 %v377_v48  ;;  %1937 = vmatprep.subr.mxu1 %v505_v19  ;;  %v596_v2 = vld [vmem:[%s7355_s1 + $0x1190] sm:$0xff]  ;;  %v721_v9 = vld [vmem:[%s7355_s1 + $0x1578] sm:$0xff] }
 0x182   :  { %1867 = vmatpush2.msra.mxu0 %v376_v21  ;;  %1938 = vmatpush2.msra.mxu1 %v504_v22  ;;  %v724_v5 = vld [vmem:[%s7355_s1 + $0x1590] sm:$0xff]  ;;  %v589_v13 = vld [vmem:[%s7355_s1 + $0x1158] sm:$0xff] }
 0x183   :  { %1868 = vmatprep.subr.mxu0 %v373_v24  ;;  %1939 = vmatprep.subr.mxu1 %v501_v0  ;;  %v592_v10 = vld [vmem:[%s7355_s1 + $0x1170] sm:$0xff]  ;;  %v717_v14 = vld [vmem:[%s7355_s1 + $0x1558] sm:$0xff] }
 0x184   :  { %1869 = vmatpush2.msra.mxu0 %v372_v25  ;;  %1940 = vmatpush2.msra.mxu1 %v500_v26  ;;  %v720_v12 = vld [vmem:[%s7355_s1 + $0x1570] sm:$0xff]  ;;  %v585_v48 = vld [vmem:[%s7355_s1 + $0x1138] sm:$0xff] }
 0x185   :  { %1870 = vmatprep.subr.mxu0 %v369_v27  ;;  %1941 = vmatprep.subr.mxu1 %v497_v3  ;;  %v588_v15 = vld [vmem:[%s7355_s1 + $0x1150] sm:$0xff]  ;;  %v713_v19 = vld [vmem:[%s7355_s1 + $0x1538] sm:$0xff] }
 0x186   :  { %1871 = vmatpush2.msra.mxu0 %v368_v28  ;;  %1942 = vmatpush2.msra.mxu1 %v496_v29  ;;  %v716_v16 = vld [vmem:[%s7355_s1 + $0x1550] sm:$0xff]  ;;  %v581_v24 = vld [vmem:[%s7355_s1 + $0x1118] sm:$0xff] }
 0x187   :  { %1872 = vmatprep.subr.mxu0 %v365_v30  ;;  %1943 = vmatprep.subr.mxu1 %v493_v31  ;;  %v1454_v40 = vpop.f32.mrf.mxu0  ;;  %v584_v21 = vld [vmem:[%s7355_s1 + $0x1130] sm:$0xff]  ;;  %v709_v0 = vld [vmem:[%s7355_s1 + $0x1518] sm:$0xff] }
 0x188   :  { %1873 = vmatpush2.msra.mxu0 %v364_v33  ;;  %1944 = vmatpush2.msra.mxu1 %v492_v34  ;;  %v1455_v44 = vadd.f32 %v1454_v40, %v5138_v17  ;;  %v609_v17 = vld [vmem:[%s7355_s1 + $0x11f8] sm:$0xff]  ;;  %v712_v22 = vld [vmem:[%s7355_s1 + $0x1530] sm:$0xff] }
 0x189   :  { %1874 = vmatprep.subr.mxu0 %v361_v35  ;;  %1945 = vmatprep.subr.mxu1 %v489_v36  ;;  %v1525_v46 = vpop.f32.mrf.mxu1  ;;  %v580_v25 = vld [vmem:[%s7355_s1 + $0x1110] sm:$0xff]  ;;  %v577_v27 = vld [vmem:[%s7355_s1 + $0x10f8] sm:$0xff] }
 0x18a   :  { %1875 = vmatpush2.msra.mxu0 %v360_v38  ;;  %1946 = vmatpush2.msra.mxu1 %v488_v39  ;;  %v5537_v50 = vadd.f32 %v1525_v46, %v1455_v44  ;;  %v708_v26 = vld [vmem:[%s7355_s1 + $0x1510] sm:$0xff]  ;;  %v705_v3 = vld [vmem:[%s7355_s1 + $0x14f8] sm:$0xff] }
 0x18b   :  { %1876 = vmatprep.subr.mxu0 %v357_v41  ;;  %1947 = vmatprep.subr.mxu1 %v485_v43  ;;  %v576_v28 = vld [vmem:[%s7355_s1 + $0x10f0] sm:$0xff]  ;;  %v573_v30 = vld [vmem:[%s7355_s1 + $0x10d8] sm:$0xff] }
 0x18c   :  { %1877 = vmatpush2.msra.mxu0 %v356_v45  ;;  %1878 = vmatprep.mubr.f32.mxu0 %v3935_v8  ;;  %v605_v8 = vld [vmem:[%s7355_s1 + $0x11d8] sm:$0xff]  ;;  %v704_v29 = vld [vmem:[%s7355_s1 + $0x14f0] sm:$0xff] }
 0x18d   :  { %1948 = vmatpush2.msra.mxu1 %v484_v49  ;;  %1879 = vmatmul.mubr.f32.vlgmr.msra.gmra.mxu0 %v3107_v52  ;;  %v701_v31 = vld [vmem:[%s7355_s1 + $0x14d8] sm:$0xff]  ;;  %v572_v33 = vld [vmem:[%s7355_s1 + $0x10d0] sm:$0xff] }
 0x18e   :  { %1949 = vmatprep.mubr.f32.mxu1 %v3943_v11  ;;  %1956 = vmatprep.subr.mxu0 %v609_v17  ;;  %v732_v11 = vld [vmem:[%s7355_s1 + $0x15d0] sm:$0xff]  ;;  %v569_v35 = vld [vmem:[%s7355_s1 + $0x10b8] sm:$0xff] }
 0x18f   :  { %2027 = vmatprep.subr.mxu1 %v737_v51  ;;  %1950 = vmatmul.mubr.f32.vlgmr.msra.gmra.mxu1 %v3108_v56  ;;  %v700_v34 = vld [vmem:[%s7355_s1 + $0x14d0] sm:$0xff]  ;;  %v697_v36 = vld [vmem:[%s7355_s1 + $0x14b8] sm:$0xff] }
 0x190   :  { %1957 = vmatpush1.msra.mxu0 %v608_v53  ;;  %2028 = vmatpush1.msra.mxu1 %v736_v54  ;;  %v568_v38 = vld [vmem:[%s7355_s1 + $0x10b0] sm:$0xff]  ;;  %v565_v40 = vld [vmem:[%s7355_s1 + $0x1098] sm:$0xff] }
 0x191   :  { %1958 = vmatprep.subr.mxu0 %v605_v8  ;;  %2029 = vmatprep.subr.mxu1 %v733_v55  ;;  %v696_v39 = vld [vmem:[%s7355_s1 + $0x14b0] sm:$0xff]  ;;  %v693_v41 = vld [vmem:[%s7355_s1 + $0x1498] sm:$0xff] }
 0x192   :  { %1959 = vmatpush1.msra.mxu0 %v604_v57  ;;  %2030 = vmatpush1.msra.mxu1 %v732_v11  ;;  %v564_v43 = vld [vmem:[%s7355_s1 + $0x1090] sm:$0xff]  ;;  %v561_v45 = vld [vmem:[%s7355_s1 + $0x1078] sm:$0xff] }
 0x193   :  { %1960 = vmatprep.subr.mxu0 %v601_v58  ;;  %2031 = vmatprep.subr.mxu1 %v729_v59  ;;  %v692_v44 = vld [vmem:[%s7355_s1 + $0x1490] sm:$0xff]  ;;  %v689_v46 = vld [vmem:[%s7355_s1 + $0x1478] sm:$0xff] }
 0x194   :  { %1961 = vmatpush1.msra.mxu0 %v600_v60  ;;  %2032 = vmatpush1.msra.mxu1 %v728_v62  ;;  %v560_v49 = vld [vmem:[%s7355_s1 + $0x1070] sm:$0xff]  ;;  %v557_v51 = vld [vmem:[%s7355_s1 + $0x1058] sm:$0xff] }
 0x195   :  { %1962 = vmatprep.subr.mxu0 %v597_v63  ;;  %2033 = vmatprep.subr.mxu1 %v725_v1  ;;  %v688_v17 = vld [vmem:[%s7355_s1 + $0x1470] sm:$0xff]  ;;  %v685_v52 = vld [vmem:[%s7355_s1 + $0x1458] sm:$0xff] }
 0x196   :  { %1963 = vmatpush1.msra.mxu0 %v596_v2  ;;  %2034 = vmatpush1.msra.mxu1 %v724_v5  ;;  %v556_v53 = vld [vmem:[%s7355_s1 + $0x1050] sm:$0xff]  ;;  %v553_v8 = vld [vmem:[%s7355_s1 + $0x1038] sm:$0xff] }
 0x197   :  { %1964 = vmatprep.subr.mxu0 %v593_v6  ;;  %2035 = vmatprep.subr.mxu1 %v721_v9  ;;  %v684_v54 = vld [vmem:[%s7355_s1 + $0x1450] sm:$0xff]  ;;  %v681_v55 = vld [vmem:[%s7355_s1 + $0x1438] sm:$0xff] }
 0x198   :  { %1965 = vmatpush1.msra.mxu0 %v592_v10  ;;  %2036 = vmatpush1.msra.mxu1 %v720_v12  ;;  %v552_v56 = vld [vmem:[%s7355_s1 + $0x1030] sm:$0xff]  ;;  %v549_v11 = vld [vmem:[%s7355_s1 + $0x1018] sm:$0xff] }
 0x199   :  { %1966 = vmatprep.subr.mxu0 %v589_v13  ;;  %2037 = vmatprep.subr.mxu1 %v717_v14  ;;  %v680_v57 = vld [vmem:[%s7355_s1 + $0x1430] sm:$0xff]  ;;  %v677_v58 = vld [vmem:[%s7355_s1 + $0x1418] sm:$0xff] }
 0x19a   :  { %1967 = vmatpush1.msra.mxu0 %v588_v15  ;;  %2038 = vmatpush1.msra.mxu1 %v716_v16  ;;  %v548_v59 = vld [vmem:[%s7355_s1 + $0x1010] sm:$0xff]  ;;  %v673_v62 = vld [vmem:[%s7355_s1 + $0x13f8] sm:$0xff] }
 0x19b   :  { %1968 = vmatprep.subr.mxu0 %v585_v48  ;;  %2039 = vmatprep.subr.mxu1 %v713_v19  ;;  %v676_v60 = vld [vmem:[%s7355_s1 + $0x1410] sm:$0xff]  ;;  %v801_v63 = vld [vmem:[%s7355_s1 + $0x17f8] sm:$0xff] }
 0x19c   :  { %1969 = vmatpush1.msra.mxu0 %v584_v21  ;;  %2040 = vmatpush1.msra.mxu1 %v712_v22  ;;  %v672_v1 = vld [vmem:[%s7355_s1 + $0x13f0] sm:$0xff]  ;;  %v669_v5 = vld [vmem:[%s7355_s1 + $0x13d8] sm:$0xff] }
 0x19d   :  { %1970 = vmatprep.subr.mxu0 %v581_v24  ;;  %2041 = vmatprep.subr.mxu1 %v709_v0  ;;  %v800_v2 = vld [vmem:[%s7355_s1 + $0x17f0] sm:$0xff]  ;;  %v797_v6 = vld [vmem:[%s7355_s1 + $0x17d8] sm:$0xff] }
 0x19e   :  { %1971 = vmatpush1.msra.mxu0 %v580_v25  ;;  %2042 = vmatpush1.msra.mxu1 %v708_v26  ;;  %v668_v9 = vld [vmem:[%s7355_s1 + $0x13d0] sm:$0xff]  ;;  %v665_v12 = vld [vmem:[%s7355_s1 + $0x13b8] sm:$0xff] }
 0x19f   :  { %1972 = vmatprep.subr.mxu0 %v577_v27  ;;  %2043 = vmatprep.subr.mxu1 %v705_v3  ;;  %v796_v10 = vld [vmem:[%s7355_s1 + $0x17d0] sm:$0xff]  ;;  %v793_v13 = vld [vmem:[%s7355_s1 + $0x17b8] sm:$0xff] }
 0x1a0   :  { %1973 = vmatpush1.msra.mxu0 %v576_v28  ;;  %2044 = vmatpush1.msra.mxu1 %v704_v29  ;;  %v664_v14 = vld [vmem:[%s7355_s1 + $0x13b0] sm:$0xff]  ;;  %v661_v16 = vld [vmem:[%s7355_s1 + $0x1398] sm:$0xff] }
 0x1a1   :  { %1974 = vmatprep.subr.mxu0 %v573_v30  ;;  %2045 = vmatprep.subr.mxu1 %v701_v31  ;;  %v792_v15 = vld [vmem:[%s7355_s1 + $0x17b0] sm:$0xff]  ;;  %v789_v48 = vld [vmem:[%s7355_s1 + $0x1798] sm:$0xff] }
 0x1a2   :  { %1975 = vmatpush1.msra.mxu0 %v572_v33  ;;  %2046 = vmatpush1.msra.mxu1 %v700_v34  ;;  %v660_v19 = vld [vmem:[%s7355_s1 + $0x1390] sm:$0xff]  ;;  %v657_v22 = vld [vmem:[%s7355_s1 + $0x1378] sm:$0xff] }
 0x1a3   :  { %1976 = vmatprep.subr.mxu0 %v569_v35  ;;  %2047 = vmatprep.subr.mxu1 %v697_v36  ;;  %v788_v21 = vld [vmem:[%s7355_s1 + $0x1790] sm:$0xff]  ;;  %v785_v24 = vld [vmem:[%s7355_s1 + $0x1778] sm:$0xff] }
 0x1a4   :  { %1977 = vmatpush1.msra.mxu0 %v568_v38  ;;  %2048 = vmatpush1.msra.mxu1 %v696_v39  ;;  %v656_v0 = vld [vmem:[%s7355_s1 + $0x1370] sm:$0xff]  ;;  %v653_v26 = vld [vmem:[%s7355_s1 + $0x1358] sm:$0xff] }
 0x1a5   :  { %1978 = vmatprep.subr.mxu0 %v565_v40  ;;  %2049 = vmatprep.subr.mxu1 %v693_v41  ;;  %v784_v25 = vld [vmem:[%s7355_s1 + $0x1770] sm:$0xff]  ;;  %v781_v27 = vld [vmem:[%s7355_s1 + $0x1758] sm:$0xff] }
 0x1a6   :  { %1979 = vmatpush1.msra.mxu0 %v564_v43  ;;  %2050 = vmatpush1.msra.mxu1 %v692_v44  ;;  %v652_v3 = vld [vmem:[%s7355_s1 + $0x1350] sm:$0xff]  ;;  %v649_v29 = vld [vmem:[%s7355_s1 + $0x1338] sm:$0xff] }
 0x1a7   :  { %1980 = vmatprep.subr.mxu0 %v561_v45  ;;  %2051 = vmatprep.subr.mxu1 %v689_v46  ;;  %v780_v28 = vld [vmem:[%s7355_s1 + $0x1750] sm:$0xff]  ;;  %v777_v30 = vld [vmem:[%s7355_s1 + $0x1738] sm:$0xff] }
 0x1a8   :  { %1981 = vmatpush1.msra.mxu0 %v560_v49  ;;  %2052 = vmatpush1.msra.mxu1 %v688_v17  ;;  %v648_v31 = vld [vmem:[%s7355_s1 + $0x1330] sm:$0xff]  ;;  %v645_v34 = vld [vmem:[%s7355_s1 + $0x1318] sm:$0xff] }
 0x1a9   :  { %1982 = vmatprep.subr.mxu0 %v557_v51  ;;  %2053 = vmatprep.subr.mxu1 %v685_v52  ;;  %v776_v33 = vld [vmem:[%s7355_s1 + $0x1730] sm:$0xff]  ;;  %v773_v35 = vld [vmem:[%s7355_s1 + $0x1718] sm:$0xff] }
 0x1aa   :  { %1983 = vmatpush1.msra.mxu0 %v556_v53  ;;  %2054 = vmatpush1.msra.mxu1 %v684_v54  ;;  %v644_v36 = vld [vmem:[%s7355_s1 + $0x1310] sm:$0xff]  ;;  %v641_v39 = vld [vmem:[%s7355_s1 + $0x12f8] sm:$0xff] }
 0x1ab   :  { %1984 = vmatprep.subr.mxu0 %v553_v8  ;;  %2055 = vmatprep.subr.mxu1 %v681_v55  ;;  %v772_v38 = vld [vmem:[%s7355_s1 + $0x1710] sm:$0xff]  ;;  %v769_v40 = vld [vmem:[%s7355_s1 + $0x16f8] sm:$0xff] }
 0x1ac   :  { %1985 = vmatpush1.msra.mxu0 %v552_v56  ;;  %2056 = vmatpush1.msra.mxu1 %v680_v57  ;;  %v640_v41 = vld [vmem:[%s7355_s1 + $0x12f0] sm:$0xff]  ;;  %v637_v44 = vld [vmem:[%s7355_s1 + $0x12d8] sm:$0xff] }
 0x1ad   :  { %1986 = vmatprep.subr.mxu0 %v549_v11  ;;  %2057 = vmatprep.subr.mxu1 %v677_v58  ;;  %v768_v43 = vld [vmem:[%s7355_s1 + $0x16f0] sm:$0xff]  ;;  %v765_v45 = vld [vmem:[%s7355_s1 + $0x16d8] sm:$0xff] }
 0x1ae   :  { %1987 = vmatpush1.msra.mxu0 %v548_v59  ;;  %2058 = vmatpush1.msra.mxu1 %v676_v60  ;;  %v636_v46 = vld [vmem:[%s7355_s1 + $0x12d0] sm:$0xff]  ;;  %v633_v17 = vld [vmem:[%s7355_s1 + $0x12b8] sm:$0xff] }
 0x1af   :  { %1988 = vmatprep.subr.mxu0 %v673_v62  ;;  %2059 = vmatprep.subr.mxu1 %v801_v63  ;;  %v764_v49 = vld [vmem:[%s7355_s1 + $0x16d0] sm:$0xff]  ;;  %v761_v51 = vld [vmem:[%s7355_s1 + $0x16b8] sm:$0xff]  ;;  %v5901_v63 = vpop.f32.mrf.mxu0 }
 0x1b0   :  { %1989 = vmatpush2.msra.mxu0 %v672_v1  ;;  %2060 = vmatpush2.msra.mxu1 %v800_v2  ;;  %v632_v52 = vld [vmem:[%s7355_s1 + $0x12b0] sm:$0xff]  ;;  %v629_v54 = vld [vmem:[%s7355_s1 + $0x1298] sm:$0xff] }
 0x1b1   :  { %1990 = vmatprep.subr.mxu0 %v669_v5  ;;  %2061 = vmatprep.subr.mxu1 %v797_v6  ;;  %v760_v53 = vld [vmem:[%s7355_s1 + $0x16b0] sm:$0xff]  ;;  %v757_v8 = vld [vmem:[%s7355_s1 + $0x1698] sm:$0xff] }
 0x1b2   :  { %1991 = vmatpush2.msra.mxu0 %v668_v9  ;;  %2062 = vmatpush2.msra.mxu1 %v796_v10  ;;  %v628_v55 = vld [vmem:[%s7355_s1 + $0x1290] sm:$0xff]  ;;  %v625_v57 = vld [vmem:[%s7355_s1 + $0x1278] sm:$0xff]  ;;  %v5915_v9 = vpop.f32.mrf.mxu1 }
 0x1b3   :  { %1992 = vmatprep.subr.mxu0 %v665_v12  ;;  %2063 = vmatprep.subr.mxu1 %v793_v13  ;;  %v756_v56 = vld [vmem:[%s7355_s1 + $0x1690] sm:$0xff]  ;;  %v753_v11 = vld [vmem:[%s7355_s1 + $0x1678] sm:$0xff] }
 0x1b4   :  { %1993 = vmatpush2.msra.mxu0 %v664_v14  ;;  %2064 = vmatpush2.msra.mxu1 %v792_v15  ;;  %v624_v58 = vld [vmem:[%s7355_s1 + $0x1270] sm:$0xff]  ;;  %v621_v60 = vld [vmem:[%s7355_s1 + $0x1258] sm:$0xff] }
 0x1b5   :  { %1994 = vmatprep.subr.mxu0 %v661_v16  ;;  %2065 = vmatprep.subr.mxu1 %v789_v48  ;;  %v752_v59 = vld [vmem:[%s7355_s1 + $0x1670] sm:$0xff]  ;;  %v749_v62 = vld [vmem:[%s7355_s1 + $0x1658] sm:$0xff] }
 0x1b6   :  { %1995 = vmatpush2.msra.mxu0 %v660_v19  ;;  %2066 = vmatpush2.msra.mxu1 %v788_v21  ;;  %v620_v1 = vld [vmem:[%s7355_s1 + $0x1250] sm:$0xff]  ;;  %v617_v5 = vld [vmem:[%s7355_s1 + $0x1238] sm:$0xff] }
 0x1b7   :  { %1996 = vmatprep.subr.mxu0 %v657_v22  ;;  %2067 = vmatprep.subr.mxu1 %v785_v24  ;;  %v748_v2 = vld [vmem:[%s7355_s1 + $0x1650] sm:$0xff]  ;;  %v745_v6 = vld [vmem:[%s7355_s1 + $0x1638] sm:$0xff] }
 0x1b8   :  { %1997 = vmatpush2.msra.mxu0 %v656_v0  ;;  %2068 = vmatpush2.msra.mxu1 %v784_v25  ;;  %v616_v10 = vld [vmem:[%s7355_s1 + $0x1230] sm:$0xff]  ;;  %v613_v14 = vld [vmem:[%s7355_s1 + $0x1218] sm:$0xff]  ;;  %v3109_v0 = vld [vmem:[%s7356_s0 + $0x20] sm:$0xff] }
 0x1b9   :  { %1998 = vmatprep.subr.mxu0 %v653_v26  ;;  %2069 = vmatprep.subr.mxu1 %v781_v27  ;;  %v744_v12 = vld [vmem:[%s7355_s1 + $0x1630] sm:$0xff]  ;;  %v741_v15 = vld [vmem:[%s7355_s1 + $0x1618] sm:$0xff] }
 0x1ba   :  { %1999 = vmatpush2.msra.mxu0 %v652_v3  ;;  %2070 = vmatpush2.msra.mxu1 %v780_v28  ;;  %v612_v48 = vld [vmem:[%s7355_s1 + $0x1210] sm:$0xff]  ;;  %v993_v24 = vld [vmem:[%s7355_s1 + $0x1df8] sm:$0xff]  ;;  %v3110_v3 = vld [vmem:[%s7356_s0 + $0x28] sm:$0xff] }
 0x1bb   :  { %2000 = vmatprep.subr.mxu0 %v649_v29  ;;  %2071 = vmatprep.subr.mxu1 %v777_v30  ;;  %v740_v21 = vld [vmem:[%s7355_s1 + $0x1610] sm:$0xff]  ;;  %v989_v27 = vld [vmem:[%s7355_s1 + $0x1dd8] sm:$0xff] }
 0x1bc   :  { %2001 = vmatpush2.msra.mxu0 %v648_v31  ;;  %2072 = vmatpush2.msra.mxu1 %v776_v33  ;;  %v864_v25 = vld [vmem:[%s7355_s1 + $0x19f0] sm:$0xff]  ;;  %v857_v29 = vld [vmem:[%s7355_s1 + $0x19b8] sm:$0xff] }
 0x1bd   :  { %2002 = vmatprep.subr.mxu0 %v645_v34  ;;  %2073 = vmatprep.subr.mxu1 %v773_v35  ;;  %v992_v26 = vld [vmem:[%s7355_s1 + $0x1df0] sm:$0xff]  ;;  %v985_v30 = vld [vmem:[%s7355_s1 + $0x1db8] sm:$0xff] }
 0x1be   :  { %2003 = vmatpush2.msra.mxu0 %v644_v36  ;;  %2074 = vmatpush2.msra.mxu1 %v772_v38  ;;  %v860_v28 = vld [vmem:[%s7355_s1 + $0x19d0] sm:$0xff]  ;;  %v853_v34 = vld [vmem:[%s7355_s1 + $0x1998] sm:$0xff] }
 0x1bf   :  { %2004 = vmatprep.subr.mxu0 %v641_v39  ;;  %2075 = vmatprep.subr.mxu1 %v769_v40  ;;  %v856_v31 = vld [vmem:[%s7355_s1 + $0x19b0] sm:$0xff]  ;;  %v981_v35 = vld [vmem:[%s7355_s1 + $0x1d98] sm:$0xff] }
 0x1c0   :  { %2005 = vmatpush2.msra.mxu0 %v640_v41  ;;  %2076 = vmatpush2.msra.mxu1 %v768_v43  ;;  %v984_v33 = vld [vmem:[%s7355_s1 + $0x1db0] sm:$0xff]  ;;  %v849_v39 = vld [vmem:[%s7355_s1 + $0x1978] sm:$0xff] }
 0x1c1   :  { %2006 = vmatprep.subr.mxu0 %v637_v44  ;;  %2077 = vmatprep.subr.mxu1 %v765_v45  ;;  %v852_v36 = vld [vmem:[%s7355_s1 + $0x1990] sm:$0xff]  ;;  %v977_v40 = vld [vmem:[%s7355_s1 + $0x1d78] sm:$0xff] }
 0x1c2   :  { %2007 = vmatpush2.msra.mxu0 %v636_v46  ;;  %2078 = vmatpush2.msra.mxu1 %v764_v49  ;;  %v980_v38 = vld [vmem:[%s7355_s1 + $0x1d90] sm:$0xff]  ;;  %v845_v44 = vld [vmem:[%s7355_s1 + $0x1958] sm:$0xff] }
 0x1c3   :  { %2008 = vmatprep.subr.mxu0 %v633_v17  ;;  %2079 = vmatprep.subr.mxu1 %v761_v51  ;;  %v848_v41 = vld [vmem:[%s7355_s1 + $0x1970] sm:$0xff]  ;;  %v973_v45 = vld [vmem:[%s7355_s1 + $0x1d58] sm:$0xff] }
 0x1c4   :  { %2009 = vmatpush2.msra.mxu0 %v632_v52  ;;  %2080 = vmatpush2.msra.mxu1 %v760_v53  ;;  %v976_v43 = vld [vmem:[%s7355_s1 + $0x1d70] sm:$0xff]  ;;  %v841_v17 = vld [vmem:[%s7355_s1 + $0x1938] sm:$0xff] }
 0x1c5   :  { %2010 = vmatprep.subr.mxu0 %v629_v54  ;;  %2081 = vmatprep.subr.mxu1 %v757_v8  ;;  %v844_v46 = vld [vmem:[%s7355_s1 + $0x1950] sm:$0xff]  ;;  %v969_v51 = vld [vmem:[%s7355_s1 + $0x1d38] sm:$0xff] }
 0x1c6   :  { %2011 = vmatpush2.msra.mxu0 %v628_v55  ;;  %2082 = vmatpush2.msra.mxu1 %v756_v56  ;;  %v972_v49 = vld [vmem:[%s7355_s1 + $0x1d50] sm:$0xff]  ;;  %v837_v54 = vld [vmem:[%s7355_s1 + $0x1918] sm:$0xff] }
 0x1c7   :  { %2012 = vmatprep.subr.mxu0 %v625_v57  ;;  %2083 = vmatprep.subr.mxu1 %v753_v11  ;;  %v840_v52 = vld [vmem:[%s7355_s1 + $0x1930] sm:$0xff]  ;;  %v965_v8 = vld [vmem:[%s7355_s1 + $0x1d18] sm:$0xff] }
 0x1c8   :  { %2013 = vmatpush2.msra.mxu0 %v624_v58  ;;  %2084 = vmatpush2.msra.mxu1 %v752_v59  ;;  %v968_v53 = vld [vmem:[%s7355_s1 + $0x1d30] sm:$0xff]  ;;  %v833_v57 = vld [vmem:[%s7355_s1 + $0x18f8] sm:$0xff] }
 0x1c9   :  { %2014 = vmatprep.subr.mxu0 %v621_v60  ;;  %2085 = vmatprep.subr.mxu1 %v749_v62  ;;  %v1596_v13 = vpop.f32.mrf.mxu0  ;;  %v836_v55 = vld [vmem:[%s7355_s1 + $0x1910] sm:$0xff]  ;;  %v961_v11 = vld [vmem:[%s7355_s1 + $0x1cf8] sm:$0xff] }
 0x1ca   :  { %2015 = vmatpush2.msra.mxu0 %v620_v1  ;;  %2086 = vmatpush2.msra.mxu1 %v748_v2  ;;  %v1597_v16 = vadd.f32 %v1596_v13, %v5537_v50  ;;  %v865_v50 = vld [vmem:[%s7355_s1 + $0x19f8] sm:$0xff]  ;;  %v964_v56 = vld [vmem:[%s7355_s1 + $0x1d10] sm:$0xff] }
 0x1cb   :  { %2016 = vmatprep.subr.mxu0 %v617_v5  ;;  %2087 = vmatprep.subr.mxu1 %v745_v6  ;;  %v1667_v19 = vpop.f32.mrf.mxu1  ;;  %v832_v58 = vld [vmem:[%s7355_s1 + $0x18f0] sm:$0xff]  ;;  %v829_v60 = vld [vmem:[%s7355_s1 + $0x18d8] sm:$0xff] }
 0x1cc   :  { %2017 = vmatpush2.msra.mxu0 %v616_v10  ;;  %2088 = vmatpush2.msra.mxu1 %v744_v12  ;;  %v5936_v22 = vadd.f32 %v1667_v19, %v1597_v16  ;;  %v960_v59 = vld [vmem:[%s7355_s1 + $0x1cf0] sm:$0xff]  ;;  %v957_v62 = vld [vmem:[%s7355_s1 + $0x1cd8] sm:$0xff] }
 0x1cd   :  { %2018 = vmatprep.subr.mxu0 %v613_v14  ;;  %2089 = vmatprep.subr.mxu1 %v741_v15  ;;  %v828_v1 = vld [vmem:[%s7355_s1 + $0x18d0] sm:$0xff]  ;;  %v825_v5 = vld [vmem:[%s7355_s1 + $0x18b8] sm:$0xff] }
 0x1ce   :  { %2019 = vmatpush2.msra.mxu0 %v612_v48  ;;  %2020 = vmatprep.mubr.f32.mxu0 %v4331_v20  ;;  %v861_v20 = vld [vmem:[%s7355_s1 + $0x19d8] sm:$0xff]  ;;  %v956_v2 = vld [vmem:[%s7355_s1 + $0x1cd0] sm:$0xff] }
 0x1cf   :  { %2090 = vmatpush2.msra.mxu1 %v740_v21  ;;  %2021 = vmatmul.mubr.f32.vlgmr.msra.gmra.mxu0 %v3109_v0  ;;  %v953_v6 = vld [vmem:[%s7355_s1 + $0x1cb8] sm:$0xff]  ;;  %v824_v10 = vld [vmem:[%s7355_s1 + $0x18b0] sm:$0xff] }
 0x1d0   :  { %2091 = vmatprep.mubr.f32.mxu1 %v4339_v23  ;;  %2098 = vmatprep.subr.mxu0 %v865_v50  ;;  %v988_v23 = vld [vmem:[%s7355_s1 + $0x1dd0] sm:$0xff]  ;;  %v821_v13 = vld [vmem:[%s7355_s1 + $0x1898] sm:$0xff] }
 0x1d1   :  { %2169 = vmatprep.subr.mxu1 %v993_v24  ;;  %2092 = vmatmul.mubr.f32.vlgmr.msra.gmra.mxu1 %v3110_v3  ;;  %v952_v12 = vld [vmem:[%s7355_s1 + $0x1cb0] sm:$0xff]  ;;  %v949_v14 = vld [vmem:[%s7355_s1 + $0x1c98] sm:$0xff] }
 0x1d2   :  { %2099 = vmatpush1.msra.mxu0 %v864_v25  ;;  %2170 = vmatpush1.msra.mxu1 %v992_v26  ;;  %v820_v15 = vld [vmem:[%s7355_s1 + $0x1890] sm:$0xff]  ;;  %v817_v48 = vld [vmem:[%s7355_s1 + $0x1878] sm:$0xff] }
 0x1d3   :  { %2100 = vmatprep.subr.mxu0 %v861_v20  ;;  %2171 = vmatprep.subr.mxu1 %v989_v27  ;;  %v948_v16 = vld [vmem:[%s7355_s1 + $0x1c90] sm:$0xff]  ;;  %v945_v19 = vld [vmem:[%s7355_s1 + $0x1c78] sm:$0xff] }
 0x1d4   :  { %2101 = vmatpush1.msra.mxu0 %v860_v28  ;;  %2172 = vmatpush1.msra.mxu1 %v988_v23  ;;  %v816_v21 = vld [vmem:[%s7355_s1 + $0x1870] sm:$0xff]  ;;  %v813_v24 = vld [vmem:[%s7355_s1 + $0x1858] sm:$0xff] }
 0x1d5   :  { %2102 = vmatprep.subr.mxu0 %v857_v29  ;;  %2173 = vmatprep.subr.mxu1 %v985_v30  ;;  %v944_v50 = vld [vmem:[%s7355_s1 + $0x1c70] sm:$0xff]  ;;  %v941_v0 = vld [vmem:[%s7355_s1 + $0x1c58] sm:$0xff] }
 0x1d6   :  { %2103 = vmatpush1.msra.mxu0 %v856_v31  ;;  %2174 = vmatpush1.msra.mxu1 %v984_v33  ;;  %v812_v25 = vld [vmem:[%s7355_s1 + $0x1850] sm:$0xff]  ;;  %v809_v20 = vld [vmem:[%s7355_s1 + $0x1838] sm:$0xff] }
 0x1d7   :  { %2104 = vmatprep.subr.mxu0 %v853_v34  ;;  %2175 = vmatprep.subr.mxu1 %v981_v35  ;;  %v940_v26 = vld [vmem:[%s7355_s1 + $0x1c50] sm:$0xff]  ;;  %v937_v27 = vld [vmem:[%s7355_s1 + $0x1c38] sm:$0xff]  ;;  %v1066_v35 = vsub.s32 1, %v4649_v7 }
 0x1d8   :  { %2105 = vmatpush1.msra.mxu0 %v852_v36  ;;  %2176 = vmatpush1.msra.mxu1 %v980_v38  ;;  %v808_v3 = vld [vmem:[%s7355_s1 + $0x1830] sm:$0xff]  ;;  %v805_v23 = vld [vmem:[%s7355_s1 + $0x1818] sm:$0xff] }
 0x1d9   :  { %2106 = vmatprep.subr.mxu0 %v849_v39  ;;  %2177 = vmatprep.subr.mxu1 %v977_v40  ;;  %v936_v28 = vld [vmem:[%s7355_s1 + $0x1c30] sm:$0xff]  ;;  %v933_v29 = vld [vmem:[%s7355_s1 + $0x1c18] sm:$0xff] }
 0x1da   :  { %2107 = vmatpush1.msra.mxu0 %v848_v41  ;;  %2178 = vmatpush1.msra.mxu1 %v976_v43  ;;  %v804_v30 = vld [vmem:[%s7355_s1 + $0x1810] sm:$0xff]  ;;  %v929_v33 = vld [vmem:[%s7355_s1 + $0x1bf8] sm:$0xff] }
 0x1db   :  { %2108 = vmatprep.subr.mxu0 %v845_v44  ;;  %2179 = vmatprep.subr.mxu1 %v973_v45  ;;  %v932_v31 = vld [vmem:[%s7355_s1 + $0x1c10] sm:$0xff]  ;;  %v1057_v34 = vld [vmem:[%s7355_s1 + $0x1ff8] sm:$0xff] }
 0x1dc   :  { %2109 = vmatpush1.msra.mxu0 %v844_v46  ;;  %2180 = vmatpush1.msra.mxu1 %v972_v49  ;;  %v928_v36 = vld [vmem:[%s7355_s1 + $0x1bf0] sm:$0xff]  ;;  %v925_v39 = vld [vmem:[%s7355_s1 + $0x1bd8] sm:$0xff]  ;;  %v3111_v46 = vld [vmem:[%s7357_s2] sm:$0xf] }
 0x1dd   :  { %2110 = vmatprep.subr.mxu0 %v841_v17  ;;  %2181 = vmatprep.subr.mxu1 %v969_v51  ;;  %v1056_v38 = vld [vmem:[%s7355_s1 + $0x1ff0] sm:$0xff]  ;;  %v1053_v40 = vld [vmem:[%s7355_s1 + $0x1fd8] sm:$0xff]  ;;  %v1067_v49 = vrot.slane %v3111_v46, %v1066_v35 }
 0x1de   :  { %2111 = vmatpush1.msra.mxu0 %v840_v52  ;;  %2182 = vmatpush1.msra.mxu1 %v968_v53  ;;  %v924_v41 = vld [vmem:[%s7355_s1 + $0x1bd0] sm:$0xff]  ;;  %v921_v44 = vld [vmem:[%s7355_s1 + $0x1bb8] sm:$0xff] }
 0x1df   :  { %2112 = vmatprep.subr.mxu0 %v837_v54  ;;  %2183 = vmatprep.subr.mxu1 %v965_v8  ;;  %v1052_v43 = vld [vmem:[%s7355_s1 + $0x1fd0] sm:$0xff]  ;;  %v1049_v45 = vld [vmem:[%s7355_s1 + $0x1fb8] sm:$0xff] }
 0x1e0   :  { %2113 = vmatpush1.msra.mxu0 %v836_v55  ;;  %2184 = vmatpush1.msra.mxu1 %v964_v56  ;;  %v920_v17 = vld [vmem:[%s7355_s1 + $0x1bb0] sm:$0xff]  ;;  %v917_v52 = vld [vmem:[%s7355_s1 + $0x1b98] sm:$0xff] }
 0x1e1   :  { %2114 = vmatprep.subr.mxu0 %v833_v57  ;;  %2185 = vmatprep.subr.mxu1 %v961_v11  ;;  %v1048_v51 = vld [vmem:[%s7355_s1 + $0x1fb0] sm:$0xff]  ;;  %v1045_v53 = vld [vmem:[%s7355_s1 + $0x1f98] sm:$0xff]  ;;  %v1173_v57 = vadd.f32 %v5103_v61, %v1067_v49 }
 0x1e2   :  { %2115 = vmatpush1.msra.mxu0 %v832_v58  ;;  %2186 = vmatpush1.msra.mxu1 %v960_v59  ;;  %v916_v54 = vld [vmem:[%s7355_s1 + $0x1b90] sm:$0xff]  ;;  %v913_v55 = vld [vmem:[%s7355_s1 + $0x1b78] sm:$0xff] }
 0x1e3   :  { %2116 = vmatprep.subr.mxu0 %v829_v60  ;;  %2187 = vmatprep.subr.mxu1 %v957_v62  ;;  %v1044_v8 = vld [vmem:[%s7355_s1 + $0x1f90] sm:$0xff]  ;;  %v1041_v56 = vld [vmem:[%s7355_s1 + $0x1f78] sm:$0xff] }
 0x1e4   :  { %2117 = vmatpush1.msra.mxu0 %v828_v1  ;;  %2188 = vmatpush1.msra.mxu1 %v956_v2  ;;  %v912_v11 = vld [vmem:[%s7355_s1 + $0x1b70] sm:$0xff]  ;;  %v909_v59 = vld [vmem:[%s7355_s1 + $0x1b58] sm:$0xff] }
 0x1e5   :  { %2118 = vmatprep.subr.mxu0 %v825_v5  ;;  %2189 = vmatprep.subr.mxu1 %v953_v6  ;;  %v1040_v58 = vld [vmem:[%s7355_s1 + $0x1f70] sm:$0xff]  ;;  %v1037_v61 = vld [vmem:[%s7355_s1 + $0x1f58] sm:$0xff]  ;;  %v1244_v5 = vadd.f32 %v5117_v4, %v1173_v57  ;;  %v2304_v57 = vld [vmem:[%s7358_s3 + $0x1e0] sm:$0xff] }
 0x1e6   :  { %2119 = vmatpush1.msra.mxu0 %v824_v10  ;;  %2190 = vmatpush1.msra.mxu1 %v952_v12  ;;  %v908_v60 = vld [vmem:[%s7355_s1 + $0x1b50] sm:$0xff]  ;;  %v905_v1 = vld [vmem:[%s7355_s1 + $0x1b38] sm:$0xff] }
 0x1e7   :  { %2120 = vmatprep.subr.mxu0 %v821_v13  ;;  %2191 = vmatprep.subr.mxu1 %v949_v14  ;;  %v1036_v62 = vld [vmem:[%s7355_s1 + $0x1f50] sm:$0xff]  ;;  %v1033_v2 = vld [vmem:[%s7355_s1 + $0x1f38] sm:$0xff]  ;;  %v1315_v13 = vadd.f32 %v5502_v32, %v1244_v5  ;;  %v2293_v5 = vld [vmem:[%s7358_s3 + $0x188] sm:$0xff] }
 0x1e8   :  { %2121 = vmatpush1.msra.mxu0 %v820_v15  ;;  %2192 = vmatpush1.msra.mxu1 %v948_v16  ;;  %v904_v6 = vld [vmem:[%s7355_s1 + $0x1b30] sm:$0xff]  ;;  %v901_v12 = vld [vmem:[%s7355_s1 + $0x1b18] sm:$0xff] }
 0x1e9   :  { %2122 = vmatprep.subr.mxu0 %v817_v48  ;;  %2193 = vmatprep.subr.mxu1 %v945_v19  ;;  %v1032_v10 = vld [vmem:[%s7355_s1 + $0x1f30] sm:$0xff]  ;;  %v1029_v4 = vld [vmem:[%s7355_s1 + $0x1f18] sm:$0xff] }
 0x1ea   :  { %2123 = vmatpush1.msra.mxu0 %v816_v21  ;;  %2194 = vmatpush1.msra.mxu1 %v944_v50  ;;  %v900_v14 = vld [vmem:[%s7355_s1 + $0x1b10] sm:$0xff]  ;;  %v897_v16 = vld [vmem:[%s7355_s1 + $0x1af8] sm:$0xff] }
 0x1eb   :  { %2124 = vmatprep.subr.mxu0 %v813_v24  ;;  %2195 = vmatprep.subr.mxu1 %v941_v0  ;;  %v1028_v15 = vld [vmem:[%s7355_s1 + $0x1f10] sm:$0xff]  ;;  %v1025_v32 = vld [vmem:[%s7355_s1 + $0x1ef8] sm:$0xff]  ;;  %v1386_v24 = vadd.f32 %v5516_v37, %v1315_v13  ;;  %v2421_v13 = vld [vmem:[%s7358_s3 + $0x588] sm:$0xff] }
 0x1ec   :  { %2125 = vmatpush1.msra.mxu0 %v812_v25  ;;  %2196 = vmatpush1.msra.mxu1 %v940_v26  ;;  %v896_v48 = vld [vmem:[%s7355_s1 + $0x1af0] sm:$0xff]  ;;  %v893_v21 = vld [vmem:[%s7355_s1 + $0x1ad8] sm:$0xff] }
 0x1ed   :  { %2126 = vmatprep.subr.mxu0 %v809_v20  ;;  %2197 = vmatprep.subr.mxu1 %v937_v27  ;;  %v1024_v19 = vld [vmem:[%s7355_s1 + $0x1ef0] sm:$0xff]  ;;  %v1021_v50 = vld [vmem:[%s7355_s1 + $0x1ed8] sm:$0xff]  ;;  %v1457_v20 = vadd.f32 %v5901_v63, %v1386_v24  ;;  %v2280_v24 = vld [vmem:[%s7358_s3 + $0x120] sm:$0xff] }
 0x1ee   :  { %2127 = vmatpush1.msra.mxu0 %v808_v3  ;;  %2198 = vmatpush1.msra.mxu1 %v936_v28  ;;  %v892_v0 = vld [vmem:[%s7355_s1 + $0x1ad0] sm:$0xff]  ;;  %v889_v26 = vld [vmem:[%s7355_s1 + $0x1ab8] sm:$0xff] }
 0x1ef   :  { %2128 = vmatprep.subr.mxu0 %v805_v23  ;;  %2199 = vmatprep.subr.mxu1 %v933_v29  ;;  %v1020_v25 = vld [vmem:[%s7355_s1 + $0x1ed0] sm:$0xff]  ;;  %v1017_v37 = vld [vmem:[%s7355_s1 + $0x1eb8] sm:$0xff] }
 0x1f0   :  { %2129 = vmatpush1.msra.mxu0 %v804_v30  ;;  %2200 = vmatpush1.msra.mxu1 %v932_v31  ;;  %v888_v27 = vld [vmem:[%s7355_s1 + $0x1ab0] sm:$0xff]  ;;  %v885_v28 = vld [vmem:[%s7355_s1 + $0x1a98] sm:$0xff]  ;;  %v1598_v30 = vpop.f32.mrf.mxu0 }
 0x1f1   :  { %2130 = vmatprep.subr.mxu0 %v929_v33  ;;  %2201 = vmatprep.subr.mxu1 %v1057_v34  ;;  %v1016_v3 = vld [vmem:[%s7355_s1 + $0x1eb0] sm:$0xff]  ;;  %v1013_v63 = vld [vmem:[%s7355_s1 + $0x1e98] sm:$0xff]  ;;  %v1528_v34 = vadd.f32 %v5915_v9, %v1457_v20  ;;  %v2408_v20 = vld [vmem:[%s7358_s3 + $0x520] sm:$0xff] }
 0x1f2   :  { %2131 = vmatpush2.msra.mxu0 %v928_v36  ;;  %2202 = vmatpush2.msra.mxu1 %v1056_v38  ;;  %v884_v23 = vld [vmem:[%s7355_s1 + $0x1a90] sm:$0xff]  ;;  %v881_v31 = vld [vmem:[%s7355_s1 + $0x1a78] sm:$0xff] }
 0x1f3   :  { %2132 = vmatprep.subr.mxu0 %v925_v39  ;;  %2203 = vmatprep.subr.mxu1 %v1053_v40  ;;  %v1012_v29 = vld [vmem:[%s7355_s1 + $0x1e90] sm:$0xff]  ;;  %v1009_v33 = vld [vmem:[%s7355_s1 + $0x1e78] sm:$0xff]  ;;  %v1599_v40 = vadd.f32 %v1598_v30, %v1528_v34  ;;  %v2268_v30 = vld [vmem:[%s7358_s3 + $0xc0] sm:$0xff] }
 0x1f4   :  { %2133 = vmatpush2.msra.mxu0 %v924_v41  ;;  %2204 = vmatpush2.msra.mxu1 %v1052_v43  ;;  %v880_v36 = vld [vmem:[%s7355_s1 + $0x1a70] sm:$0xff]  ;;  %v877_v39 = vld [vmem:[%s7355_s1 + $0x1a58] sm:$0xff]  ;;  %v2397_v34 = vld [vmem:[%s7358_s3 + $0x4c8] sm:$0xff] }
 0x1f5   :  { %2134 = vmatprep.subr.mxu0 %v921_v44  ;;  %2205 = vmatprep.subr.mxu1 %v1049_v45  ;;  %v1008_v38 = vld [vmem:[%s7355_s1 + $0x1e70] sm:$0xff]  ;;  %v1005_v9 = vld [vmem:[%s7355_s1 + $0x1e58] sm:$0xff]  ;;  %v1669_v44 = vpop.f32.mrf.mxu1 }
 0x1f6   :  { %2135 = vmatpush2.msra.mxu0 %v920_v17  ;;  %2206 = vmatpush2.msra.mxu1 %v1048_v51  ;;  %v876_v41 = vld [vmem:[%s7355_s1 + $0x1a50] sm:$0xff]  ;;  %v873_v45 = vld [vmem:[%s7355_s1 + $0x1a38] sm:$0xff] }
 0x1f7   :  { %2136 = vmatprep.subr.mxu0 %v917_v52  ;;  %2207 = vmatprep.subr.mxu1 %v1045_v53  ;;  %v1004_v43 = vld [vmem:[%s7355_s1 + $0x1e50] sm:$0xff]  ;;  %v1001_v46 = vld [vmem:[%s7355_s1 + $0x1e38] sm:$0xff]  ;;  %v6336_v53 = vadd.f32 %v1669_v44, %v1599_v40  ;;  %v2260_v40 = vld [vmem:[%s7358_s3 + $0x80] sm:$0xff] }
 0x1f8   :  { %2137 = vmatpush2.msra.mxu0 %v916_v54  ;;  %2208 = vmatpush2.msra.mxu1 %v1044_v8  ;;  %v872_v49 = vld [vmem:[%s7355_s1 + $0x1a30] sm:$0xff]  ;;  %v869_v51 = vld [vmem:[%s7355_s1 + $0x1a18] sm:$0xff]  ;;  %v2389_v44 = vld [vmem:[%s7358_s3 + $0x488] sm:$0xff] }
 0x1f9   :  { %2138 = vmatprep.subr.mxu0 %v913_v55  ;;  %2209 = vmatprep.subr.mxu1 %v1041_v56  ;;  %v1000_v17 = vld [vmem:[%s7355_s1 + $0x1e30] sm:$0xff]  ;;  %v997_v52 = vld [vmem:[%s7355_s1 + $0x1e18] sm:$0xff]  ;;  %v2305_v55 = vld [vmem:[%s7358_s3 + $0x1e8] sm:$0xff]  ;;  %v2241_v56 = vmax.f32 %v6336_v53, 0.0 }
 0x1fa   :  { %2139 = vmatpush2.msra.mxu0 %v912_v11  ;;  %2210 = vmatpush2.msra.mxu1 %v1040_v58  ;;  %v868_v54 = vld [vmem:[%s7355_s1 + $0x1a10] sm:$0xff]  ;;  %v2301_v58 = vld [vmem:[%s7358_s3 + $0x1c8] sm:$0xff]  ;;  %v2295_v53 = vld [vmem:[%s7358_s3 + $0x198] sm:$0xff] }
 0x1fb   :  { %2140 = vmatprep.subr.mxu0 %v909_v59  ;;  %2211 = vmatprep.subr.mxu1 %v1037_v61  ;;  %v996_v8 = vld [vmem:[%s7355_s1 + $0x1e10] sm:$0xff]  ;;  %v2297_v59 = vld [vmem:[%s7358_s3 + $0x1a8] sm:$0xff] }
 0x1fc   :  { %2141 = vmatpush2.msra.mxu0 %v908_v60  ;;  %2212 = vmatpush2.msra.mxu1 %v1036_v62  ;;  %v3112_v11 = vld [vmem:[%s7356_s0 + $0x30] sm:$0xff]  ;;  %v2433_v61 = vld [vmem:[%s7358_s3 + $0x5e8] sm:$0xff]  ;;  %v2432_v60 = vld [vmem:[%s7358_s3 + $0x5e0] sm:$0xff] }
 0x1fd   :  { %2142 = vmatprep.subr.mxu0 %v905_v1  ;;  %2213 = vmatprep.subr.mxu1 %v1033_v2  ;;  %v2429_v62 = vld [vmem:[%s7358_s3 + $0x5c8] sm:$0xff]  ;;  %v2296_v1 = vld [vmem:[%s7358_s3 + $0x1a0] sm:$0xff] }
 0x1fe   :  { %2143 = vmatpush2.msra.mxu0 %v904_v6  ;;  %2214 = vmatpush2.msra.mxu1 %v1032_v10  ;;  %v2428_v2 = vld [vmem:[%s7358_s3 + $0x5c0] sm:$0xff]  ;;  %v2425_v6 = vld [vmem:[%s7358_s3 + $0x5a8] sm:$0xff] }
 0x1ff   :  { %2144 = vmatprep.subr.mxu0 %v901_v12  ;;  %2215 = vmatprep.subr.mxu1 %v1029_v4  ;;  %v2292_v10 = vld [vmem:[%s7358_s3 + $0x180] sm:$0xff]  ;;  %v2289_v4 = vld [vmem:[%s7358_s3 + $0x168] sm:$0xff] }
 0x200   :  { %2145 = vmatpush2.msra.mxu0 %v900_v14  ;;  %2216 = vmatpush2.msra.mxu1 %v1028_v15  ;;  %v2424_v12 = vld [vmem:[%s7358_s3 + $0x5a0] sm:$0xff] }
 0x201   :  { %2146 = vmatprep.subr.mxu0 %v897_v16  ;;  %2217 = vmatprep.subr.mxu1 %v1025_v32  ;;  %v2288_v14 = vld [vmem:[%s7358_s3 + $0x160] sm:$0xff]  ;;  %v2285_v16 = vld [vmem:[%s7358_s3 + $0x148] sm:$0xff] }
 0x202   :  { %2147 = vmatpush2.msra.mxu0 %v896_v48  ;;  %2218 = vmatpush2.msra.mxu1 %v1024_v19  ;;  %v2420_v15 = vld [vmem:[%s7358_s3 + $0x580] sm:$0xff]  ;;  %v2417_v32 = vld [vmem:[%s7358_s3 + $0x568] sm:$0xff] }
 0x203   :  { %2148 = vmatprep.subr.mxu0 %v893_v21  ;;  %2219 = vmatprep.subr.mxu1 %v1021_v50  ;;  %v2284_v48 = vld [vmem:[%s7358_s3 + $0x140] sm:$0xff]  ;;  %v2281_v21 = vld [vmem:[%s7358_s3 + $0x128] sm:$0xff] }
 0x204   :  { %2149 = vmatpush2.msra.mxu0 %v892_v0  ;;  %2220 = vmatpush2.msra.mxu1 %v1020_v25  ;;  %v2416_v19 = vld [vmem:[%s7358_s3 + $0x560] sm:$0xff]  ;;  %v2413_v50 = vld [vmem:[%s7358_s3 + $0x548] sm:$0xff] }
 0x205   :  { %2150 = vmatprep.subr.mxu0 %v889_v26  ;;  %2221 = vmatprep.subr.mxu1 %v1017_v37  ;;  %v2412_v0 = vld [vmem:[%s7358_s3 + $0x540] sm:$0xff]  ;;  %v2277_v25 = vld [vmem:[%s7358_s3 + $0x108] sm:$0xff] }
 0x206   :  { %2151 = vmatpush2.msra.mxu0 %v888_v27  ;;  %2222 = vmatpush2.msra.mxu1 %v1016_v3  ;;  %v2409_v26 = vld [vmem:[%s7358_s3 + $0x528] sm:$0xff]  ;;  %v2276_v37 = vld [vmem:[%s7358_s3 + $0x100] sm:$0xff] }
 0x207   :  { %2152 = vmatprep.subr.mxu0 %v885_v28  ;;  %2223 = vmatprep.subr.mxu1 %v1013_v63  ;;  %v2273_v27 = vld [vmem:[%s7358_s3 + $0xe8] sm:$0xff]  ;;  %v2272_v28 = vld [vmem:[%s7358_s3 + $0xe0] sm:$0xff] }
 0x208   :  { %2153 = vmatpush2.msra.mxu0 %v884_v23  ;;  %2224 = vmatpush2.msra.mxu1 %v1012_v29  ;;  %v2405_v3 = vld [vmem:[%s7358_s3 + $0x508] sm:$0xff]  ;;  %v2404_v63 = vld [vmem:[%s7358_s3 + $0x500] sm:$0xff] }
 0x209   :  { %2154 = vmatprep.subr.mxu0 %v881_v31  ;;  %2225 = vmatprep.subr.mxu1 %v1009_v33  ;;  %v2269_v23 = vld [vmem:[%s7358_s3 + $0xc8] sm:$0xff]  ;;  %v2400_v31 = vld [vmem:[%s7358_s3 + $0x4e0] sm:$0xff] }
 0x20a   :  { %2155 = vmatpush2.msra.mxu0 %v880_v36  ;;  %2226 = vmatpush2.msra.mxu1 %v1008_v38  ;;  %v2401_v29 = vld [vmem:[%s7358_s3 + $0x4e8] sm:$0xff]  ;;  %v2264_v36 = vld [vmem:[%s7358_s3 + $0xa0] sm:$0xff] }
 0x20b   :  { %2156 = vmatprep.subr.mxu0 %v877_v39  ;;  %2227 = vmatprep.subr.mxu1 %v1005_v9  ;;  %v2265_v33 = vld [vmem:[%s7358_s3 + $0xa8] sm:$0xff]  ;;  %v2396_v38 = vld [vmem:[%s7358_s3 + $0x4c0] sm:$0xff] }
 0x20c   :  { %2157 = vmatpush2.msra.mxu0 %v876_v41  ;;  %2228 = vmatpush2.msra.mxu1 %v1004_v43  ;;  %v2261_v39 = vld [vmem:[%s7358_s3 + $0x88] sm:$0xff]  ;;  %v2392_v41 = vld [vmem:[%s7358_s3 + $0x4a0] sm:$0xff] }
 0x20d   :  { %2158 = vmatprep.subr.mxu0 %v873_v45  ;;  %2229 = vmatprep.subr.mxu1 %v1001_v46  ;;  %v2393_v9 = vld [vmem:[%s7358_s3 + $0x4a8] sm:$0xff]  ;;  %v2256_v45 = vld [vmem:[%s7358_s3 + $0x60] sm:$0xff] }
 0x20e   :  { %2159 = vmatpush2.msra.mxu0 %v872_v49  ;;  %2230 = vmatpush2.msra.mxu1 %v1000_v17  ;;  %v2257_v43 = vld [vmem:[%s7358_s3 + $0x68] sm:$0xff]  ;;  %v2388_v46 = vld [vmem:[%s7358_s3 + $0x480] sm:$0xff] }
 0x20f   :  { %2160 = vmatprep.subr.mxu0 %v869_v51  ;;  %2231 = vmatprep.subr.mxu1 %v997_v52  ;;  %v2253_v49 = vld [vmem:[%s7358_s3 + $0x48] sm:$0xff]  ;;  %v2252_v51 = vld [vmem:[%s7358_s3 + $0x40] sm:$0xff] }
 0x210   :  { %2161 = vmatpush2.msra.mxu0 %v868_v54  ;;  %2162 = vmatprep.mubr.f32.mxu0 %v4735_v42  ;;  %v3113_v42 = vld [vmem:[%s7356_s0 + $0x38] sm:$0xff]  ;;  %v2385_v17 = vld [vmem:[%s7358_s3 + $0x468] sm:$0xff]  ;;  %v2384_v52 = vld [vmem:[%s7358_s3 + $0x460] sm:$0xff] }
 0x211   :  { %2232 = vmatpush2.msra.mxu1 %v996_v8  ;;  %2233 = vmatprep.mubr.f32.mxu1 %v4743_v47  ;;  %v2300_v47 = vld [vmem:[%s7358_s3 + $0x1c0] sm:$0xff]  ;;  %v2249_v54 = vld [vmem:[%s7358_s3 + $0x28] sm:$0xff] }
 0x212   :  { %2163 = vmatmul.mubr.f32.vlgmr.msra.gmra.mxu0 %v3112_v11  ;;  %2234 = vmatmul.mubr.f32.vlgmr.msra.gmra.mxu1 %v3113_v42  ;;  %v2381_v8 = vld [vmem:[%s7358_s3 + $0x448] sm:$0xff] }
 0x213   :  { %2522 = vmatprep.subr.mxu0 %v2305_v55  ;;  %2586 = vmatprep.mubr.f32.mxu0 %v2241_v56  ;;  %v2248_v55 = vld [vmem:[%s7358_s3 + $0x20] sm:$0xff]  ;;  %v2245_v11 = vld [vmem:[%s7358_s3 + $0x8] sm:$0xff] }
 0x214   :  { %2523 = vmatpush1.msra.mxu0 %v2304_v57  ;;  %2593 = vmatprep.subr.mxu1 %v2433_v61  ;;  %v2380_v57 = vld [vmem:[%s7358_s3 + $0x440] sm:$0xff]  ;;  %v2377_v42 = vld [vmem:[%s7358_s3 + $0x428] sm:$0xff] }
 0x215   :  { %2524 = vmatprep.subr.mxu0 %v2301_v58  ;;  %2594 = vmatpush1.msra.mxu1 %v2432_v60  ;;  %v2244_v58 = vld [vmem:[%s7358_s3] sm:$0xff]  ;;  %v2373_v61 = vld [vmem:[%s7358_s3 + $0x408] sm:$0xff] }
 0x216   :  { %2525 = vmatpush1.msra.mxu0 %v2300_v47  ;;  %2595 = vmatprep.subr.mxu1 %v2429_v62  ;;  %v2376_v47 = vld [vmem:[%s7358_s3 + $0x420] sm:$0xff] }
 0x217   :  { %2526 = vmatprep.subr.mxu0 %v2297_v59  ;;  %2596 = vmatpush1.msra.mxu1 %v2428_v2  ;;  %v2369_v59 = vld [vmem:[%s7358_s3 + $0x3e8] sm:$0xff]  ;;  %v2368_v60 = vld [vmem:[%s7358_s3 + $0x3e0] sm:$0xff] }
 0x218   :  { %2527 = vmatpush1.msra.mxu0 %v2296_v1  ;;  %2597 = vmatprep.subr.mxu1 %v2425_v6  ;;  %v2372_v62 = vld [vmem:[%s7358_s3 + $0x400] sm:$0xff]  ;;  %v2365_v1 = vld [vmem:[%s7358_s3 + $0x3c8] sm:$0xff] }
 0x219   :  { %2528 = vmatprep.subr.mxu0 %v2293_v5  ;;  %2598 = vmatpush1.msra.mxu1 %v2424_v12  ;;  %v2497_v2 = vld [vmem:[%s7358_s3 + $0x7e8] sm:$0xff]  ;;  %v2364_v5 = vld [vmem:[%s7358_s3 + $0x3c0] sm:$0xff] }
 0x21a   :  { %2529 = vmatpush1.msra.mxu0 %v2292_v10  ;;  %2599 = vmatprep.subr.mxu1 %v2421_v13  ;;  %v2496_v6 = vld [vmem:[%s7358_s3 + $0x7e0] sm:$0xff]  ;;  %v2361_v10 = vld [vmem:[%s7358_s3 + $0x3a8] sm:$0xff] }
 0x21b   :  { %2530 = vmatprep.subr.mxu0 %v2289_v4  ;;  %2600 = vmatpush1.msra.mxu1 %v2420_v15  ;;  %v2493_v12 = vld [vmem:[%s7358_s3 + $0x7c8] sm:$0xff]  ;;  %v2360_v4 = vld [vmem:[%s7358_s3 + $0x3a0] sm:$0xff] }
 0x21c   :  { %2531 = vmatpush1.msra.mxu0 %v2288_v14  ;;  %2601 = vmatprep.subr.mxu1 %v2417_v32  ;;  %v2492_v13 = vld [vmem:[%s7358_s3 + $0x7c0] sm:$0xff]  ;;  %v2357_v14 = vld [vmem:[%s7358_s3 + $0x388] sm:$0xff] }
 0x21d   :  { %2532 = vmatprep.subr.mxu0 %v2285_v16  ;;  %2602 = vmatpush1.msra.mxu1 %v2416_v19  ;;  %v2489_v15 = vld [vmem:[%s7358_s3 + $0x7a8] sm:$0xff]  ;;  %v2356_v16 = vld [vmem:[%s7358_s3 + $0x380] sm:$0xff] }
 0x21e   :  { %2533 = vmatpush1.msra.mxu0 %v2284_v48  ;;  %2603 = vmatprep.subr.mxu1 %v2413_v50  ;;  %v2488_v32 = vld [vmem:[%s7358_s3 + $0x7a0] sm:$0xff]  ;;  %v2353_v48 = vld [vmem:[%s7358_s3 + $0x368] sm:$0xff] }
 0x21f   :  { %2534 = vmatprep.subr.mxu0 %v2281_v21  ;;  %2604 = vmatpush1.msra.mxu1 %v2412_v0  ;;  %v2485_v19 = vld [vmem:[%s7358_s3 + $0x788] sm:$0xff]  ;;  %v2352_v21 = vld [vmem:[%s7358_s3 + $0x360] sm:$0xff] }
 0x220   :  { %2535 = vmatpush1.msra.mxu0 %v2280_v24  ;;  %2605 = vmatprep.subr.mxu1 %v2409_v26  ;;  %v2484_v50 = vld [vmem:[%s7358_s3 + $0x780] sm:$0xff]  ;;  %v2349_v24 = vld [vmem:[%s7358_s3 + $0x348] sm:$0xff] }
 0x221   :  { %2536 = vmatprep.subr.mxu0 %v2277_v25  ;;  %2606 = vmatpush1.msra.mxu1 %v2408_v20  ;;  %v2481_v0 = vld [vmem:[%s7358_s3 + $0x768] sm:$0xff]  ;;  %v2348_v25 = vld [vmem:[%s7358_s3 + $0x340] sm:$0xff] }
 0x222   :  { %2537 = vmatpush1.msra.mxu0 %v2276_v37  ;;  %2607 = vmatprep.subr.mxu1 %v2405_v3  ;;  %v2480_v26 = vld [vmem:[%s7358_s3 + $0x760] sm:$0xff]  ;;  %v2345_v37 = vld [vmem:[%s7358_s3 + $0x328] sm:$0xff] }
 0x223   :  { %2538 = vmatprep.subr.mxu0 %v2273_v27  ;;  %2608 = vmatpush1.msra.mxu1 %v2404_v63  ;;  %v2477_v20 = vld [vmem:[%s7358_s3 + $0x748] sm:$0xff]  ;;  %v2344_v27 = vld [vmem:[%s7358_s3 + $0x320] sm:$0xff] }
 0x224   :  { %2539 = vmatpush1.msra.mxu0 %v2272_v28  ;;  %2609 = vmatprep.subr.mxu1 %v2401_v29  ;;  %v2476_v3 = vld [vmem:[%s7358_s3 + $0x740] sm:$0xff]  ;;  %v2341_v28 = vld [vmem:[%s7358_s3 + $0x308] sm:$0xff] }
 0x225   :  { %2540 = vmatprep.subr.mxu0 %v2269_v23  ;;  %2610 = vmatpush1.msra.mxu1 %v2400_v31  ;;  %v2473_v63 = vld [vmem:[%s7358_s3 + $0x728] sm:$0xff]  ;;  %v2340_v23 = vld [vmem:[%s7358_s3 + $0x300] sm:$0xff] }
 0x226   :  { %2541 = vmatpush1.msra.mxu0 %v2268_v30  ;;  %2611 = vmatprep.subr.mxu1 %v2397_v34  ;;  %v2472_v29 = vld [vmem:[%s7358_s3 + $0x720] sm:$0xff]  ;;  %v2337_v30 = vld [vmem:[%s7358_s3 + $0x2e8] sm:$0xff] }
 0x227   :  { %2542 = vmatprep.subr.mxu0 %v2265_v33  ;;  %2612 = vmatpush1.msra.mxu1 %v2396_v38  ;;  %v2469_v31 = vld [vmem:[%s7358_s3 + $0x708] sm:$0xff]  ;;  %v2336_v33 = vld [vmem:[%s7358_s3 + $0x2e0] sm:$0xff] }
 0x228   :  { %2543 = vmatpush1.msra.mxu0 %v2264_v36  ;;  %2613 = vmatprep.subr.mxu1 %v2393_v9  ;;  %v2468_v34 = vld [vmem:[%s7358_s3 + $0x700] sm:$0xff]  ;;  %v2333_v36 = vld [vmem:[%s7358_s3 + $0x2c8] sm:$0xff] }
 0x229   :  { %2544 = vmatprep.subr.mxu0 %v2261_v39  ;;  %2614 = vmatpush1.msra.mxu1 %v2392_v41  ;;  %v2465_v38 = vld [vmem:[%s7358_s3 + $0x6e8] sm:$0xff]  ;;  %v2332_v39 = vld [vmem:[%s7358_s3 + $0x2c0] sm:$0xff] }
 0x22a   :  { %2545 = vmatpush1.msra.mxu0 %v2260_v40  ;;  %2615 = vmatprep.subr.mxu1 %v2389_v44  ;;  %v2464_v9 = vld [vmem:[%s7358_s3 + $0x6e0] sm:$0xff]  ;;  %v2329_v40 = vld [vmem:[%s7358_s3 + $0x2a8] sm:$0xff] }
 0x22b   :  { %2546 = vmatprep.subr.mxu0 %v2257_v43  ;;  %2616 = vmatpush1.msra.mxu1 %v2388_v46  ;;  %v2461_v41 = vld [vmem:[%s7358_s3 + $0x6c8] sm:$0xff]  ;;  %v2328_v43 = vld [vmem:[%s7358_s3 + $0x2a0] sm:$0xff] }
 0x22c   :  { %2547 = vmatpush1.msra.mxu0 %v2256_v45  ;;  %2617 = vmatprep.subr.mxu1 %v2385_v17  ;;  %v2460_v44 = vld [vmem:[%s7358_s3 + $0x6c0] sm:$0xff]  ;;  %v2325_v45 = vld [vmem:[%s7358_s3 + $0x288] sm:$0xff] }
 0x22d   :  { %2548 = vmatprep.subr.mxu0 %v2253_v49  ;;  %2618 = vmatpush1.msra.mxu1 %v2384_v52  ;;  %v2457_v46 = vld [vmem:[%s7358_s3 + $0x6a8] sm:$0xff]  ;;  %v2324_v49 = vld [vmem:[%s7358_s3 + $0x280] sm:$0xff] }
 0x22e   :  { %2549 = vmatpush1.msra.mxu0 %v2252_v51  ;;  %2619 = vmatprep.subr.mxu1 %v2381_v8  ;;  %v2456_v17 = vld [vmem:[%s7358_s3 + $0x6a0] sm:$0xff]  ;;  %v2321_v51 = vld [vmem:[%s7358_s3 + $0x268] sm:$0xff] }
 0x22f   :  { %2550 = vmatprep.subr.mxu0 %v2249_v54  ;;  %2620 = vmatpush1.msra.mxu1 %v2380_v57  ;;  %v2453_v52 = vld [vmem:[%s7358_s3 + $0x688] sm:$0xff]  ;;  %v2320_v54 = vld [vmem:[%s7358_s3 + $0x260] sm:$0xff] }
 0x230   :  { %2551 = vmatpush1.msra.mxu0 %v2248_v55  ;;  %2621 = vmatprep.subr.mxu1 %v2377_v42  ;;  %v2317_v8 = vld [vmem:[%s7358_s3 + $0x248] sm:$0xff]  ;;  %v2316_v55 = vld [vmem:[%s7358_s3 + $0x240] sm:$0xff] }
 0x231   :  { %2552 = vmatprep.subr.mxu0 %v2245_v11  ;;  %2622 = vmatpush1.msra.mxu1 %v2376_v47  ;;  %v2313_v57 = vld [vmem:[%s7358_s3 + $0x228] sm:$0xff]  ;;  %v2312_v11 = vld [vmem:[%s7358_s3 + $0x220] sm:$0xff]  ;;  %v2307_v47 = vld [vmem:[%s7358_s3 + $0x1f8] sm:$0xff] }
 0x232   :  { %2553 = vmatpush1.msra.mxu0 %v2244_v58  ;;  %2623 = vmatprep.subr.mxu1 %v2373_v61  ;;  %v2309_v42 = vld [vmem:[%s7358_s3 + $0x208] sm:$0xff]  ;;  %v2308_v58 = vld [vmem:[%s7358_s3 + $0x200] sm:$0xff]  ;;  %v2306_v61 = vld [vmem:[%s7358_s3 + $0x1f0] sm:$0xff] }
 0x233   :  { %2554 = vmatprep.subr.mxu0 %v2369_v59  ;;  %2624 = vmatpush1.msra.mxu1 %v2372_v62  ;;  %v2240_v59 = vmax.f32 %v5936_v22, 0.0  ;;  %v2452_v62 = vld [vmem:[%s7358_s3 + $0x680] sm:$0xff] }
 0x234   :  { %2555 = vmatpush2.msra.mxu0 %v2368_v60  ;;  %2625 = vmatprep.subr.mxu1 %v2497_v2  ;;  %v2303_v60 = vld [vmem:[%s7358_s3 + $0x1d8] sm:$0xff]  ;;  %v2449_v2 = vld [vmem:[%s7358_s3 + $0x668] sm:$0xff] }
 0x235   :  { %2556 = vmatprep.subr.mxu0 %v2365_v1  ;;  %2626 = vmatpush2.msra.mxu1 %v2496_v6  ;;  %v2302_v1 = vld [vmem:[%s7358_s3 + $0x1d0] sm:$0xff]  ;;  %v2448_v6 = vld [vmem:[%s7358_s3 + $0x660] sm:$0xff] }
 0x236   :  { %2557 = vmatpush2.msra.mxu0 %v2364_v5  ;;  %2627 = vmatprep.subr.mxu1 %v2493_v12  ;;  %v2299_v5 = vld [vmem:[%s7358_s3 + $0x1b8] sm:$0xff]  ;;  %v2445_v12 = vld [vmem:[%s7358_s3 + $0x648] sm:$0xff] }
 0x237   :  { %2558 = vmatprep.subr.mxu0 %v2361_v10  ;;  %2628 = vmatpush2.msra.mxu1 %v2492_v13  ;;  %v2298_v10 = vld [vmem:[%s7358_s3 + $0x1b0] sm:$0xff]  ;;  %v2441_v13 = vld [vmem:[%s7358_s3 + $0x628] sm:$0xff] }
 0x238   :  { %2559 = vmatpush2.msra.mxu0 %v2360_v4  ;;  %2629 = vmatprep.subr.mxu1 %v2489_v15  ;;  %v2294_v4 = vld [vmem:[%s7358_s3 + $0x190] sm:$0xff]  ;;  %v2440_v15 = vld [vmem:[%s7358_s3 + $0x620] sm:$0xff] }
 0x239   :  { %2560 = vmatprep.subr.mxu0 %v2357_v14  ;;  %2630 = vmatpush2.msra.mxu1 %v2488_v32  ;;  %v2291_v14 = vld [vmem:[%s7358_s3 + $0x178] sm:$0xff]  ;;  %v2437_v32 = vld [vmem:[%s7358_s3 + $0x608] sm:$0xff] }
 0x23a   :  { %2561 = vmatpush2.msra.mxu0 %v2356_v16  ;;  %2631 = vmatprep.subr.mxu1 %v2485_v19  ;;  %v2290_v16 = vld [vmem:[%s7358_s3 + $0x170] sm:$0xff]  ;;  %v2436_v19 = vld [vmem:[%s7358_s3 + $0x600] sm:$0xff] }
 0x23b   :  { %2562 = vmatprep.subr.mxu0 %v2353_v48  ;;  %2632 = vmatpush2.msra.mxu1 %v2484_v50  ;;  %v2287_v48 = vld [vmem:[%s7358_s3 + $0x158] sm:$0xff] }
 0x23c   :  { %2563 = vmatpush2.msra.mxu0 %v2352_v21  ;;  %2633 = vmatprep.subr.mxu1 %v2481_v0  ;;  %v2286_v21 = vld [vmem:[%s7358_s3 + $0x150] sm:$0xff]  ;;  %v2435_v50 = vld [vmem:[%s7358_s3 + $0x5f8] sm:$0xff] }
 0x23d   :  { %2564 = vmatprep.subr.mxu0 %v2349_v24  ;;  %2634 = vmatpush2.msra.mxu1 %v2480_v26  ;;  %v2283_v24 = vld [vmem:[%s7358_s3 + $0x138] sm:$0xff]  ;;  %v2282_v0 = vld [vmem:[%s7358_s3 + $0x130] sm:$0xff] }
 0x23e   :  { %2565 = vmatpush2.msra.mxu0 %v2348_v25  ;;  %2635 = vmatprep.subr.mxu1 %v2477_v20  ;;  %v2279_v25 = vld [vmem:[%s7358_s3 + $0x118] sm:$0xff]  ;;  %v2278_v26 = vld [vmem:[%s7358_s3 + $0x110] sm:$0xff] }
 0x23f   :  { %2566 = vmatprep.subr.mxu0 %v2345_v37  ;;  %2636 = vmatpush2.msra.mxu1 %v2476_v3  ;;  %v2275_v37 = vld [vmem:[%s7358_s3 + $0xf8] sm:$0xff]  ;;  %v2274_v20 = vld [vmem:[%s7358_s3 + $0xf0] sm:$0xff] }
 0x240   :  { %2567 = vmatpush2.msra.mxu0 %v2344_v27  ;;  %2637 = vmatprep.subr.mxu1 %v2473_v63  ;;  %v2271_v27 = vld [vmem:[%s7358_s3 + $0xd8] sm:$0xff]  ;;  %v2270_v3 = vld [vmem:[%s7358_s3 + $0xd0] sm:$0xff] }
 0x241   :  { %2568 = vmatprep.subr.mxu0 %v2341_v28  ;;  %2638 = vmatpush2.msra.mxu1 %v2472_v29  ;;  %v2267_v28 = vld [vmem:[%s7358_s3 + $0xb8] sm:$0xff]  ;;  %v2266_v63 = vld [vmem:[%s7358_s3 + $0xb0] sm:$0xff] }
 0x242   :  { %2569 = vmatpush2.msra.mxu0 %v2340_v23  ;;  %2639 = vmatprep.subr.mxu1 %v2469_v31  ;;  %v2263_v23 = vld [vmem:[%s7358_s3 + $0x98] sm:$0xff]  ;;  %v2262_v29 = vld [vmem:[%s7358_s3 + $0x90] sm:$0xff] }
 0x243   :  { %2570 = vmatprep.subr.mxu0 %v2337_v30  ;;  %2640 = vmatpush2.msra.mxu1 %v2468_v34  ;;  %v2259_v30 = vld [vmem:[%s7358_s3 + $0x78] sm:$0xff]  ;;  %v2258_v31 = vld [vmem:[%s7358_s3 + $0x70] sm:$0xff] }
 0x244   :  { %2571 = vmatpush2.msra.mxu0 %v2336_v33  ;;  %2641 = vmatprep.subr.mxu1 %v2465_v38  ;;  %v2255_v33 = vld [vmem:[%s7358_s3 + $0x58] sm:$0xff]  ;;  %v2254_v34 = vld [vmem:[%s7358_s3 + $0x50] sm:$0xff] }
 0x245   :  { %2572 = vmatprep.subr.mxu0 %v2333_v36  ;;  %2642 = vmatpush2.msra.mxu1 %v2464_v9  ;;  %v2251_v36 = vld [vmem:[%s7358_s3 + $0x38] sm:$0xff]  ;;  %v2250_v38 = vld [vmem:[%s7358_s3 + $0x30] sm:$0xff] }
 0x246   :  { %2573 = vmatpush2.msra.mxu0 %v2332_v39  ;;  %2643 = vmatprep.subr.mxu1 %v2461_v41  ;;  %v2247_v39 = vld [vmem:[%s7358_s3 + $0x18] sm:$0xff]  ;;  %v2246_v9 = vld [vmem:[%s7358_s3 + $0x10] sm:$0xff] }
 0x247   :  { %2574 = vmatprep.subr.mxu0 %v2329_v40  ;;  %2644 = vmatpush2.msra.mxu1 %v2460_v44  ;;  %v2371_v40 = vld [vmem:[%s7358_s3 + $0x3f8] sm:$0xff]  ;;  %v2370_v41 = vld [vmem:[%s7358_s3 + $0x3f0] sm:$0xff] }
 0x248   :  { %2575 = vmatpush2.msra.mxu0 %v2328_v43  ;;  %2645 = vmatprep.subr.mxu1 %v2457_v46  ;;  %v2367_v43 = vld [vmem:[%s7358_s3 + $0x3d8] sm:$0xff]  ;;  %v2366_v44 = vld [vmem:[%s7358_s3 + $0x3d0] sm:$0xff] }
 0x249   :  { %2576 = vmatprep.subr.mxu0 %v2325_v45  ;;  %2646 = vmatpush2.msra.mxu1 %v2456_v17  ;;  %v2363_v45 = vld [vmem:[%s7358_s3 + $0x3b8] sm:$0xff]  ;;  %v2362_v46 = vld [vmem:[%s7358_s3 + $0x3b0] sm:$0xff] }
 0x24a   :  { %2577 = vmatpush2.msra.mxu0 %v2324_v49  ;;  %2647 = vmatprep.subr.mxu1 %v2453_v52  ;;  %v2359_v49 = vld [vmem:[%s7358_s3 + $0x398] sm:$0xff]  ;;  %v2358_v17 = vld [vmem:[%s7358_s3 + $0x390] sm:$0xff] }
 0x24b   :  { %2578 = vmatprep.subr.mxu0 %v2321_v51  ;;  %2648 = vmatpush2.msra.mxu1 %v2452_v62  ;;  %v2355_v51 = vld [vmem:[%s7358_s3 + $0x378] sm:$0xff]  ;;  %v2354_v52 = vld [vmem:[%s7358_s3 + $0x370] sm:$0xff] }
 0x24c   :  { %2579 = vmatpush2.msra.mxu0 %v2320_v54  ;;  %2649 = vmatprep.subr.mxu1 %v2449_v2  ;;  %v2351_v54 = vld [vmem:[%s7358_s3 + $0x358] sm:$0xff] }
 0x24d   :  { %2580 = vmatprep.subr.mxu0 %v2317_v8  ;;  %2650 = vmatpush2.msra.mxu1 %v2448_v6  ;;  %v2350_v8 = vld [vmem:[%s7358_s3 + $0x350] sm:$0xff]  ;;  %v2331_v62 = vld [vmem:[%s7358_s3 + $0x2b8] sm:$0xff] }
 0x24e   :  { %2581 = vmatpush2.msra.mxu0 %v2316_v55  ;;  %2651 = vmatprep.subr.mxu1 %v2445_v12  ;;  %v2347_v55 = vld [vmem:[%s7358_s3 + $0x338] sm:$0xff] }
 0x24f   :  { %2582 = vmatprep.subr.mxu0 %v2313_v57  ;;  %v2346_v57 = vld [vmem:[%s7358_s3 + $0x330] sm:$0xff]  ;;  %v2327_v2 = vld [vmem:[%s7358_s3 + $0x298] sm:$0xff] }
 0x250   :  { %2583 = vmatpush2.msra.mxu0 %v2312_v11  ;;  %v2343_v11 = vld [vmem:[%s7358_s3 + $0x318] sm:$0xff] }
 0x251   :  { %2584 = vmatprep.subr.mxu0 %v2309_v42  ;;  %v2342_v42 = vld [vmem:[%s7358_s3 + $0x310] sm:$0xff]  ;;  %v2323_v6 = vld [vmem:[%s7358_s3 + $0x278] sm:$0xff] }
 0x252   :  { %2585 = vmatpush2.msra.mxu0 %v2308_v58  ;;  %v2339_v58 = vld [vmem:[%s7358_s3 + $0x2f8] sm:$0xff] }
 0x253   :  { %2587 = vmatmul.mubr.f32.vlgmr.msra.gmra.mxu0 %v2240_v59  ;;  %2664 = vmatprep.subr.mxu0 %v2307_v47  ;;  %v2338_v47 = vld [vmem:[%s7358_s3 + $0x2f0] sm:$0xff]  ;;  %v2319_v12 = vld [vmem:[%s7358_s3 + $0x258] sm:$0xff] }
 0x254   :  { %2665 = vmatpush1.msra.mxu0 %v2306_v61  ;;  %2728 = vmatprep.mubr.f32.mxu0 %v2241_v56  ;;  %v2444_v56 = vld [vmem:[%s7358_s3 + $0x640] sm:$0xff]  ;;  %v2335_v61 = vld [vmem:[%s7358_s3 + $0x2d8] sm:$0xff] }
 0x255   :  { %2666 = vmatprep.subr.mxu0 %v2303_v60  ;;  %2652 = vmatpush2.msra.mxu1 %v2444_v56  ;;  %v2334_v60 = vld [vmem:[%s7358_s3 + $0x2d0] sm:$0xff]  ;;  %v2315_v56 = vld [vmem:[%s7358_s3 + $0x238] sm:$0xff] }
 0x256   :  { %2667 = vmatpush1.msra.mxu0 %v2302_v1  ;;  %2653 = vmatprep.subr.mxu1 %v2441_v13  ;;  %v2330_v1 = vld [vmem:[%s7358_s3 + $0x2b0] sm:$0xff]  ;;  %v2311_v13 = vld [vmem:[%s7358_s3 + $0x218] sm:$0xff] }
 0x257   :  { %2668 = vmatprep.subr.mxu0 %v2299_v5  ;;  %2654 = vmatpush2.msra.mxu1 %v2440_v15  ;;  %v2326_v5 = vld [vmem:[%s7358_s3 + $0x290] sm:$0xff]  ;;  %v1070_v15 = vsub.s32 2, %v4649_v7 }
 0x258   :  { %2669 = vmatpush1.msra.mxu0 %v2298_v10  ;;  %2655 = vmatprep.subr.mxu1 %v2437_v32  ;;  %v2322_v10 = vld [vmem:[%s7358_s3 + $0x270] sm:$0xff]  ;;  %v1738_v32 = vpop.f32.mrf.mxu0 }
 0x259   :  { %2670 = vmatprep.subr.mxu0 %v2295_v53  ;;  %2656 = vmatpush2.msra.mxu1 %v2436_v19  ;;  %v2318_v53 = vld [vmem:[%s7358_s3 + $0x250] sm:$0xff] }
 0x25a   :  { %2671 = vmatpush1.msra.mxu0 %v2294_v4  ;;  %2735 = vmatprep.subr.mxu1 %v2435_v50  ;;  %v2314_v4 = vld [vmem:[%s7358_s3 + $0x230] sm:$0xff]  ;;  %v1809_v50 = vpop.f32.mrf.mxu1 }
 0x25b   :  { %2672 = vmatprep.subr.mxu0 %v2291_v14  ;;  %v2310_v14 = vld [vmem:[%s7358_s3 + $0x210] sm:$0xff] }
 0x25c   :  { %2673 = vmatpush1.msra.mxu0 %v2290_v16  ;;  %v1074_v16 = vsub.s32 3, %v4649_v7 }
 0x25d   :  { %2674 = vmatprep.subr.mxu0 %v2287_v48  ;;  %v3114_v48 = vld [vmem:[%s7357_s2] sm:$0xf] }
 0x25e   :  { %2675 = vmatpush1.msra.mxu0 %v2286_v21  ;;  %v1071_v19 = vrot.slane %v3114_v48, %v1070_v15  ;;  %v1075_v21 = vrot.slane %v3114_v48, %v1074_v16  ;;  %v2819_v48 = vld [vmem:[%s7359_s5 + $0x48] sm:$0xff] }
 0x25f   :  { %2676 = vmatprep.subr.mxu0 %v2283_v24  ;;  %v1740_v24 = vpop.f32.mrf.mxu0 }
 0x260   :  { %2677 = vmatpush1.msra.mxu0 %v2282_v0  ;;  %v1739_v0 = vadd.f32 %v1738_v32, %v1071_v19  ;;  %v2415_v32 = vld [vmem:[%s7358_s3 + $0x558] sm:$0xff]  ;;  %v2414_v19 = vld [vmem:[%s7358_s3 + $0x550] sm:$0xff] }
 0x261   :  { %2678 = vmatprep.subr.mxu0 %v2279_v25  ;;  %v1880_v22 = vpop.f32.mrf.mxu0  ;;  %v1811_v25 = vpop.f32.mrf.mxu1 }
 0x262   :  { %2679 = vmatpush1.msra.mxu0 %v2278_v26  ;;  %v1810_v26 = vadd.f32 %v1809_v50, %v1739_v0  ;;  %v2411_v50 = vld [vmem:[%s7358_s3 + $0x538] sm:$0xff]  ;;  %v2410_v0 = vld [vmem:[%s7358_s3 + $0x530] sm:$0xff] }
 0x263   :  { %2680 = vmatprep.subr.mxu0 %v2275_v37  ;;  %v1951_v37 = vpop.f32.mrf.mxu1 }
 0x264   :  { %2681 = vmatpush1.msra.mxu0 %v2274_v20  ;;  %v1882_v20 = vpop.f32.mrf.mxu0 }
 0x265   :  { %2682 = vmatprep.subr.mxu0 %v2271_v27 }
 0x266   :  { %2683 = vmatpush1.msra.mxu0 %v2270_v3  ;;  %v1881_v3 = vadd.f32 %v1880_v22, %v1810_v26  ;;  %v2833_v22 = vld [vmem:[%s7359_s5 + $0xb8] sm:$0xff]  ;;  %v2406_v26 = vld [vmem:[%s7358_s3 + $0x510] sm:$0xff] }
 0x267   :  { %2684 = vmatprep.subr.mxu0 %v2267_v28 }
 0x268   :  { %2685 = vmatpush1.msra.mxu0 %v2266_v63 }
 0x269   :  { %2686 = vmatprep.subr.mxu0 %v2263_v23  ;;  %v1953_v23 = vpop.f32.mrf.mxu1 }
 0x26a   :  { %2687 = vmatpush1.msra.mxu0 %v2262_v29  ;;  %v1952_v29 = vadd.f32 %v1951_v37, %v1881_v3  ;;  %v2832_v37 = vld [vmem:[%s7359_s5 + $0xb0] sm:$0xff] }
 0x26b   :  { %2688 = vmatprep.subr.mxu0 %v2259_v30  ;;  %v2402_v3 = vld [vmem:[%s7358_s3 + $0x4f0] sm:$0xff] }
 0x26c   :  { %2689 = vmatpush1.msra.mxu0 %v2258_v31 }
 0x26d   :  { %2690 = vmatprep.subr.mxu0 %v2255_v33 }
 0x26e   :  { %2691 = vmatpush1.msra.mxu0 %v2254_v34 }
 0x26f   :  { %2692 = vmatprep.subr.mxu0 %v2251_v36 }
 0x270   :  { %2693 = vmatpush1.msra.mxu0 %v2250_v38 }
 0x271   :  { %2694 = vmatprep.subr.mxu0 %v2247_v39 }
 0x272   :  { %2695 = vmatpush1.msra.mxu0 %v2246_v9 }
 0x273   :  { %2696 = vmatprep.subr.mxu0 %v2371_v40 }
 0x274   :  { %2697 = vmatpush2.msra.mxu0 %v2370_v41 }
 0x275   :  { %2698 = vmatprep.subr.mxu0 %v2367_v43 }
 0x276   :  { %2699 = vmatpush2.msra.mxu0 %v2366_v44 }
 0x277   :  { %2700 = vmatprep.subr.mxu0 %v2363_v45 }
 0x278   :  { %2701 = vmatpush2.msra.mxu0 %v2362_v46 }
 0x279   :  { %2702 = vmatprep.subr.mxu0 %v2359_v49 }
 0x27a   :  { %2703 = vmatpush2.msra.mxu0 %v2358_v17 }
 0x27b   :  { %2704 = vmatprep.subr.mxu0 %v2355_v51  ;;  %v2841_v51 = vld [vmem:[%s7359_s5 + $0xf8] sm:$0xff] }
 0x27c   :  { %2705 = vmatpush2.msra.mxu0 %v2354_v52  ;;  %v2825_v52 = vld [vmem:[%s7359_s5 + $0x78] sm:$0xff] }
 0x27d   :  { %2706 = vmatprep.subr.mxu0 %v2351_v54  ;;  %v2840_v54 = vld [vmem:[%s7359_s5 + $0xf0] sm:$0xff] }
 0x27e   :  { %2707 = vmatpush2.msra.mxu0 %v2350_v8  ;;  %v2824_v8 = vld [vmem:[%s7359_s5 + $0x70] sm:$0xff] }
 0x27f   :  { %2708 = vmatprep.subr.mxu0 %v2347_v55 }
 0x280   :  { %2709 = vmatpush2.msra.mxu0 %v2346_v57  ;;  %v2839_v57 = vld [vmem:[%s7359_s5 + $0xe8] sm:$0xff] }
 0x281   :  { %2710 = vmatprep.subr.mxu0 %v2343_v11 }
 0x282   :  { %2711 = vmatpush2.msra.mxu0 %v2342_v42  ;;  %v2434_v42 = vld [vmem:[%s7358_s3 + $0x5f0] sm:$0xff] }
 0x283   :  { %2712 = vmatprep.subr.mxu0 %v2339_v58  ;;  %v2431_v58 = vld [vmem:[%s7358_s3 + $0x5d8] sm:$0xff] }
 0x284   :  { %2713 = vmatpush2.msra.mxu0 %v2338_v47  ;;  %v2823_v47 = vld [vmem:[%s7359_s5 + $0x68] sm:$0xff] }
 0x285   :  { %2714 = vmatprep.subr.mxu0 %v2335_v61  ;;  %v2430_v61 = vld [vmem:[%s7358_s3 + $0x5d0] sm:$0xff] }
 0x286   :  { %2715 = vmatpush2.msra.mxu0 %v2334_v60  ;;  %v2838_v60 = vld [vmem:[%s7359_s5 + $0xe0] sm:$0xff] }
 0x287   :  { %2716 = vmatprep.subr.mxu0 %v2331_v62  ;;  %v2427_v62 = vld [vmem:[%s7358_s3 + $0x5b8] sm:$0xff] }
 0x288   :  { %2717 = vmatpush2.msra.mxu0 %v2330_v1  ;;  %v2822_v1 = vld [vmem:[%s7359_s5 + $0x60] sm:$0xff] }
 0x289   :  { %2718 = vmatprep.subr.mxu0 %v2327_v2  ;;  %v2426_v2 = vld [vmem:[%s7358_s3 + $0x5b0] sm:$0xff] }
 0x28a   :  { %2719 = vmatpush2.msra.mxu0 %v2326_v5  ;;  %v2837_v5 = vld [vmem:[%s7359_s5 + $0xd8] sm:$0xff] }
 0x28b   :  { %2720 = vmatprep.subr.mxu0 %v2323_v6  ;;  %v2423_v6 = vld [vmem:[%s7358_s3 + $0x598] sm:$0xff] }
 0x28c   :  { %2721 = vmatpush2.msra.mxu0 %v2322_v10  ;;  %v2821_v10 = vld [vmem:[%s7359_s5 + $0x58] sm:$0xff] }
 0x28d   :  { %2722 = vmatprep.subr.mxu0 %v2319_v12  ;;  %v2422_v12 = vld [vmem:[%s7358_s3 + $0x590] sm:$0xff] }
 0x28e   :  { %2723 = vmatpush2.msra.mxu0 %v2318_v53  ;;  %v2836_v53 = vld [vmem:[%s7359_s5 + $0xd0] sm:$0xff] }
 0x28f   :  { %2724 = vmatprep.subr.mxu0 %v2315_v56  ;;  %v2022_v28 = vpop.f32.mrf.mxu0  ;;  %v2419_v56 = vld [vmem:[%s7358_s3 + $0x578] sm:$0xff] }
 0x290   :  { %2725 = vmatpush2.msra.mxu0 %v2314_v4  ;;  %v2023_v34 = vadd.f32 %v2022_v28, %v1952_v29  ;;  %v2820_v4 = vld [vmem:[%s7359_s5 + $0x50] sm:$0xff]  ;;  %v2831_v28 = vld [vmem:[%s7359_s5 + $0xa8] sm:$0xff] }
 0x291   :  { %2726 = vmatprep.subr.mxu0 %v2311_v13  ;;  %v2093_v30 = vpop.f32.mrf.mxu1  ;;  %v2024_v31 = vpop.f32.mrf.mxu0  ;;  %v2418_v13 = vld [vmem:[%s7358_s3 + $0x570] sm:$0xff] }
 0x292   :  { %2727 = vmatpush2.msra.mxu0 %v2310_v14  ;;  %v2094_v39 = vadd.f32 %v2093_v30, %v2023_v34  ;;  %v2835_v14 = vld [vmem:[%s7359_s5 + $0xc8] sm:$0xff]  ;;  %v2398_v29 = vld [vmem:[%s7358_s3 + $0x4d0] sm:$0xff]  ;;  %v2830_v30 = vld [vmem:[%s7359_s5 + $0xa0] sm:$0xff] }
 0x293   :  { %2729 = vmatmul.mubr.f32.vlgmr.msra.gmra.mxu0 %v2240_v59  ;;  %v1741_v59 = vadd.f32 %v1740_v24, %v1075_v21  ;;  %v2095_v38 = vpop.f32.mrf.mxu1  ;;  %3027 = vmatprep.subr.mxu0 %v2841_v51  ;;  %v2834_v21 = vld [vmem:[%s7359_s5 + $0xc0] sm:$0xff]  ;;  %v2394_v34 = vld [vmem:[%s7358_s3 + $0x4b0] sm:$0xff] }
 0x294   :  { %3028 = vmatpush3.msra.mxu0 %v2825_v52  ;;  %v2818_v24 = vld [vmem:[%s7359_s5 + $0x40] sm:$0xff]  ;;  %v2498_v51 = vld [vmem:[%s7358_s3 + $0x7f0] sm:$0xff]  ;;  %v2495_v52 = vld [vmem:[%s7358_s3 + $0x7d8] sm:$0xff] }
 0x295   :  { %v1812_v27 = vadd.f32 %v1811_v25, %v1741_v59  ;;  %3029 = vmatprep.subr.mxu0 %v2840_v54  ;;  %v2407_v59 = vld [vmem:[%s7358_s3 + $0x518] sm:$0xff]  ;;  %v2494_v54 = vld [vmem:[%s7358_s3 + $0x7d0] sm:$0xff] }
 0x296   :  { %3030 = vmatpush3.msra.mxu0 %v2824_v8  ;;  %v2817_v25 = vld [vmem:[%s7359_s5 + $0x38] sm:$0xff] }
 0x297   :  { %v1883_v63 = vadd.f32 %v1882_v20, %v1812_v27  ;;  %3031 = vmatprep.subr.mxu0 %v2839_v57  ;;  %v2403_v20 = vld [vmem:[%s7358_s3 + $0x4f8] sm:$0xff]  ;;  %v2816_v27 = vld [vmem:[%s7359_s5 + $0x30] sm:$0xff] }
 0x298   :  { %3032 = vmatpush3.msra.mxu0 %v2823_v47  ;;  %v2491_v8 = vld [vmem:[%s7358_s3 + $0x7b8] sm:$0xff]  ;;  %v2482_v47 = vld [vmem:[%s7358_s3 + $0x770] sm:$0xff] }
 0x299   :  { %v1954_v33 = vadd.f32 %v1953_v23, %v1883_v63  ;;  %3033 = vmatprep.subr.mxu0 %v2838_v60  ;;  %v2399_v63 = vld [vmem:[%s7358_s3 + $0x4d8] sm:$0xff]  ;;  %v2815_v23 = vld [vmem:[%s7359_s5 + $0x28] sm:$0xff]  ;;  %v2478_v60 = vld [vmem:[%s7358_s3 + $0x750] sm:$0xff] }
 0x29a   :  { %3034 = vmatpush3.msra.mxu0 %v2822_v1  ;;  %v2487_v57 = vld [vmem:[%s7358_s3 + $0x798] sm:$0xff]  ;;  %v2474_v1 = vld [vmem:[%s7358_s3 + $0x730] sm:$0xff] }
 0x29b   :  { %v2025_v36 = vadd.f32 %v2024_v31, %v1954_v33  ;;  %3035 = vmatprep.subr.mxu0 %v2837_v5  ;;  %v2395_v31 = vld [vmem:[%s7358_s3 + $0x4b8] sm:$0xff]  ;;  %v2814_v33 = vld [vmem:[%s7359_s5 + $0x20] sm:$0xff]  ;;  %v2470_v5 = vld [vmem:[%s7358_s3 + $0x710] sm:$0xff] }
 0x29c   :  { %3036 = vmatpush3.msra.mxu0 %v2821_v10  ;;  %v2466_v10 = vld [vmem:[%s7358_s3 + $0x6f0] sm:$0xff] }
 0x29d   :  { %v2096_v41 = vadd.f32 %v2095_v38, %v2025_v36  ;;  %3037 = vmatprep.subr.mxu0 %v2836_v53  ;;  %v2391_v36 = vld [vmem:[%s7358_s3 + $0x498] sm:$0xff]  ;;  %v2390_v38 = vld [vmem:[%s7358_s3 + $0x490] sm:$0xff] }
 0x29e   :  { %3038 = vmatpush3.msra.mxu0 %v2820_v4  ;;  %v2462_v53 = vld [vmem:[%s7358_s3 + $0x6d0] sm:$0xff] }
 0x29f   :  { %3039 = vmatprep.subr.mxu0 %v2835_v14  ;;  %v2458_v4 = vld [vmem:[%s7358_s3 + $0x6b0] sm:$0xff] }
 0x2a0   :  { %3040 = vmatpush3.msra.mxu0 %v2819_v48  ;;  %v2454_v14 = vld [vmem:[%s7358_s3 + $0x690] sm:$0xff] }
 0x2a1   :  { %3041 = vmatprep.subr.mxu0 %v2834_v21  ;;  %v2450_v48 = vld [vmem:[%s7358_s3 + $0x670] sm:$0xff] }
 0x2a2   :  { %3042 = vmatpush3.msra.mxu0 %v2818_v24  ;;  %v2446_v21 = vld [vmem:[%s7358_s3 + $0x650] sm:$0xff] }
 0x2a3   :  { %3043 = vmatprep.subr.mxu0 %v2833_v22  ;;  %v2442_v24 = vld [vmem:[%s7358_s3 + $0x630] sm:$0xff] }
 0x2a4   :  { %3044 = vmatpush3.msra.mxu0 %v2817_v25  ;;  %v2438_v22 = vld [vmem:[%s7358_s3 + $0x610] sm:$0xff]  ;;  %v2813_v25 = vld [vmem:[%s7359_s5 + $0x18] sm:$0xff] }
 0x2a5   :  { %3045 = vmatprep.subr.mxu0 %v2832_v37  ;;  %v2811_v37 = vld [vmem:[%s7359_s5 + $0x8] sm:$0xff] }
 0x2a6   :  { %3046 = vmatpush3.msra.mxu0 %v2816_v27  ;;  %v2810_v27 = vld [vmem:[%s7359_s5] sm:$0xff] }
 0x2a7   :  { %3047 = vmatprep.subr.mxu0 %v2831_v28  ;;  %v2857_v28 = vld [vmem:[%s7359_s5 + $0x178] sm:$0xff] }
 0x2a8   :  { %3048 = vmatpush3.msra.mxu0 %v2815_v23  ;;  %v2856_v23 = vld [vmem:[%s7359_s5 + $0x170] sm:$0xff] }
 0x2a9   :  { %3049 = vmatprep.subr.mxu0 %v2830_v30  ;;  %v2855_v30 = vld [vmem:[%s7359_s5 + $0x168] sm:$0xff] }
 0x2aa   :  { %3050 = vmatpush3.msra.mxu0 %v2814_v33  ;;  %v2854_v33 = vld [vmem:[%s7359_s5 + $0x160] sm:$0xff] }
 0x2d2   :  { %v2164_v9 = vpop.f32.mrf.mxu0  ;;  %v2235_v40 = vpop.f32.mrf.mxu1 }
 0x2d3   :  { %v2165_v43 = vadd.f32 %v2164_v9, %v2094_v39  ;;  %v2387_v39 = vld [vmem:[%s7358_s3 + $0x478] sm:$0xff]  ;;  %v2386_v9 = vld [vmem:[%s7358_s3 + $0x470] sm:$0xff] }
 0x2d4   :  { %v2166_v44 = vpop.f32.mrf.mxu0  ;;  %v2237_v49 = vpop.f32.mrf.mxu1 }
 0x2d5   :  { %v2167_v45 = vadd.f32 %v2166_v44, %v2096_v41  ;;  %v6950_v46 = vadd.f32 %v2235_v40, %v2165_v43  ;;  %v2383_v40 = vld [vmem:[%s7358_s3 + $0x458] sm:$0xff]  ;;  %v2382_v41 = vld [vmem:[%s7358_s3 + $0x450] sm:$0xff] }
 0x2d6   :  { %v2379_v43 = vld [vmem:[%s7358_s3 + $0x438] sm:$0xff]  ;;  %v2378_v44 = vld [vmem:[%s7358_s3 + $0x430] sm:$0xff] }
 0x2d7   :  { %v2238_v17 = vadd.f32 %v2237_v49, %v2167_v45  ;;  %v2242_v11 = vmax.f32 %v6950_v46, 0.0  ;;  %v2375_v45 = vld [vmem:[%s7358_s3 + $0x418] sm:$0xff]  ;;  %v2374_v49 = vld [vmem:[%s7358_s3 + $0x410] sm:$0xff] }
 0x2d8   :  { %v2812_v46 = vld [vmem:[%s7359_s5 + $0x10] sm:$0xff] }
 0x2d9   :  { %v2243_v55 = vmax.f32 %v2238_v17, 0.0  ;;  %v2499_v17 = vld [vmem:[%s7358_s3 + $0x7f8] sm:$0xff] }
 0x2db   :  { %2657 = vmatprep.mubr.f32.mxu1 %v2243_v55 }
 0x2dc   :  { %2658 = vmatmul.mubr.f32.vlgmr.msra.gmra.mxu1 %v2242_v11 }
 0x2dd   :  { %2736 = vmatpush1.msra.mxu1 %v2434_v42  ;;  %2799 = vmatprep.mubr.f32.mxu1 %v2243_v55  ;;  %v2490_v55 = vld [vmem:[%s7358_s3 + $0x7b0] sm:$0xff] }
 0x2de   :  { %2737 = vmatprep.subr.mxu1 %v2431_v58  ;;  %v2486_v42 = vld [vmem:[%s7358_s3 + $0x790] sm:$0xff]  ;;  %v2483_v58 = vld [vmem:[%s7358_s3 + $0x778] sm:$0xff] }
 0x2df   :  { %2738 = vmatpush1.msra.mxu1 %v2430_v61  ;;  %v2479_v61 = vld [vmem:[%s7358_s3 + $0x758] sm:$0xff] }
 0x2e0   :  { %2739 = vmatprep.subr.mxu1 %v2427_v62  ;;  %v2475_v62 = vld [vmem:[%s7358_s3 + $0x738] sm:$0xff] }
 0x2e1   :  { %2740 = vmatpush1.msra.mxu1 %v2426_v2  ;;  %v2471_v2 = vld [vmem:[%s7358_s3 + $0x718] sm:$0xff] }
 0x2e2   :  { %2741 = vmatprep.subr.mxu1 %v2423_v6  ;;  %v2467_v6 = vld [vmem:[%s7358_s3 + $0x6f8] sm:$0xff] }
 0x2e3   :  { %2742 = vmatpush1.msra.mxu1 %v2422_v12  ;;  %v2463_v12 = vld [vmem:[%s7358_s3 + $0x6d8] sm:$0xff] }
 0x2e4   :  { %2743 = vmatprep.subr.mxu1 %v2419_v56  ;;  %v2459_v56 = vld [vmem:[%s7358_s3 + $0x6b8] sm:$0xff] }
 0x2e5   :  { %2744 = vmatpush1.msra.mxu1 %v2418_v13  ;;  %v2455_v13 = vld [vmem:[%s7358_s3 + $0x698] sm:$0xff] }
 0x2e6   :  { %2745 = vmatprep.subr.mxu1 %v2415_v32  ;;  %v2451_v32 = vld [vmem:[%s7358_s3 + $0x678] sm:$0xff] }
 0x2e7   :  { %2746 = vmatpush1.msra.mxu1 %v2414_v19  ;;  %v2447_v19 = vld [vmem:[%s7358_s3 + $0x658] sm:$0xff] }
 0x2e8   :  { %2747 = vmatprep.subr.mxu1 %v2411_v50  ;;  %v2443_v50 = vld [vmem:[%s7358_s3 + $0x638] sm:$0xff] }
 0x2e9   :  { %2748 = vmatpush1.msra.mxu1 %v2410_v0  ;;  %v2439_v0 = vld [vmem:[%s7358_s3 + $0x618] sm:$0xff] }
 0x2ea   :  { %2749 = vmatprep.subr.mxu1 %v2407_v59  ;;  %v2829_v59 = vld [vmem:[%s7359_s5 + $0x98] sm:$0xff] }
 0x2eb   :  { %2750 = vmatpush1.msra.mxu1 %v2406_v26  ;;  %3051 = vmatprep.subr.mxu0 %v2829_v59  ;;  %v2828_v26 = vld [vmem:[%s7359_s5 + $0x90] sm:$0xff] }
 0x2ec   :  { %2751 = vmatprep.subr.mxu1 %v2403_v20  ;;  %3052 = vmatpush3.msra.mxu0 %v2813_v25  ;;  %v2826_v20 = vld [vmem:[%s7359_s5 + $0x80] sm:$0xff] }
 0x2ed   :  { %2752 = vmatpush1.msra.mxu1 %v2402_v3  ;;  %3053 = vmatprep.subr.mxu0 %v2828_v26  ;;  %v2873_v3 = vld [vmem:[%s7359_s5 + $0x1f8] sm:$0xff] }
 0x2ee   :  { %2753 = vmatprep.subr.mxu1 %v2399_v63  ;;  %3054 = vmatpush3.msra.mxu0 %v2812_v46  ;;  %v2872_v63 = vld [vmem:[%s7359_s5 + $0x1f0] sm:$0xff] }
 0x2ef   :  { %2754 = vmatpush1.msra.mxu1 %v2398_v29  ;;  %v2871_v29 = vld [vmem:[%s7359_s5 + $0x1e8] sm:$0xff] }
 0x2f0   :  { %2755 = vmatprep.subr.mxu1 %v2395_v31  ;;  %v2870_v31 = vld [vmem:[%s7359_s5 + $0x1e0] sm:$0xff] }
 0x2f1   :  { %2756 = vmatpush1.msra.mxu1 %v2394_v34  ;;  %v2869_v34 = vld [vmem:[%s7359_s5 + $0x1d8] sm:$0xff] }
 0x2f2   :  { %2757 = vmatprep.subr.mxu1 %v2391_v36  ;;  %v2853_v36 = vld [vmem:[%s7359_s5 + $0x158] sm:$0xff] }
 0x2f3   :  { %2758 = vmatpush1.msra.mxu1 %v2390_v38  ;;  %v2868_v38 = vld [vmem:[%s7359_s5 + $0x1d0] sm:$0xff] }
 0x2f4   :  { %2759 = vmatprep.subr.mxu1 %v2387_v39  ;;  %v2852_v39 = vld [vmem:[%s7359_s5 + $0x150] sm:$0xff] }
 0x2f5   :  { %2760 = vmatpush1.msra.mxu1 %v2386_v9  ;;  %v2867_v9 = vld [vmem:[%s7359_s5 + $0x1c8] sm:$0xff] }
 0x2f6   :  { %2761 = vmatprep.subr.mxu1 %v2383_v40  ;;  %v2851_v40 = vld [vmem:[%s7359_s5 + $0x148] sm:$0xff] }
 0x2f7   :  { %2762 = vmatpush1.msra.mxu1 %v2382_v41  ;;  %v2866_v41 = vld [vmem:[%s7359_s5 + $0x1c0] sm:$0xff] }
 0x2f8   :  { %2763 = vmatprep.subr.mxu1 %v2379_v43  ;;  %v2850_v43 = vld [vmem:[%s7359_s5 + $0x140] sm:$0xff] }
 0x2f9   :  { %2764 = vmatpush1.msra.mxu1 %v2378_v44  ;;  %v2865_v44 = vld [vmem:[%s7359_s5 + $0x1b8] sm:$0xff] }
 0x2fa   :  { %2765 = vmatprep.subr.mxu1 %v2375_v45  ;;  %v2849_v45 = vld [vmem:[%s7359_s5 + $0x138] sm:$0xff] }
 0x2fb   :  { %2766 = vmatpush1.msra.mxu1 %v2374_v49  ;;  %v2864_v49 = vld [vmem:[%s7359_s5 + $0x1b0] sm:$0xff] }
 0x2fc   :  { %2767 = vmatprep.subr.mxu1 %v2499_v17  ;;  %v2848_v17 = vld [vmem:[%s7359_s5 + $0x130] sm:$0xff] }
 0x2fd   :  { %2768 = vmatpush2.msra.mxu1 %v2498_v51  ;;  %v2863_v51 = vld [vmem:[%s7359_s5 + $0x1a8] sm:$0xff] }
 0x2fe   :  { %2769 = vmatprep.subr.mxu1 %v2495_v52  ;;  %v2847_v52 = vld [vmem:[%s7359_s5 + $0x128] sm:$0xff] }
 0x2ff   :  { %2770 = vmatpush2.msra.mxu1 %v2494_v54  ;;  %v2862_v54 = vld [vmem:[%s7359_s5 + $0x1a0] sm:$0xff] }
 0x300   :  { %2771 = vmatprep.subr.mxu1 %v2491_v8  ;;  %v2846_v8 = vld [vmem:[%s7359_s5 + $0x120] sm:$0xff] }
 0x301   :  { %2772 = vmatpush2.msra.mxu1 %v2490_v55  ;;  %v2861_v55 = vld [vmem:[%s7359_s5 + $0x198] sm:$0xff] }
 0x302   :  { %2773 = vmatprep.subr.mxu1 %v2487_v57  ;;  %v2845_v57 = vld [vmem:[%s7359_s5 + $0x118] sm:$0xff] }
 0x303   :  { %2774 = vmatpush2.msra.mxu1 %v2486_v42  ;;  %v2860_v42 = vld [vmem:[%s7359_s5 + $0x190] sm:$0xff] }
 0x304   :  { %2775 = vmatprep.subr.mxu1 %v2483_v58  ;;  %v2844_v58 = vld [vmem:[%s7359_s5 + $0x110] sm:$0xff] }
 0x305   :  { %2776 = vmatpush2.msra.mxu1 %v2482_v47  ;;  %v2859_v47 = vld [vmem:[%s7359_s5 + $0x188] sm:$0xff] }
 0x306   :  { %2777 = vmatprep.subr.mxu1 %v2479_v61  ;;  %v2843_v61 = vld [vmem:[%s7359_s5 + $0x108] sm:$0xff] }
 0x307   :  { %2778 = vmatpush2.msra.mxu1 %v2478_v60  ;;  %v2858_v60 = vld [vmem:[%s7359_s5 + $0x180] sm:$0xff] }
 0x308   :  { %2779 = vmatprep.subr.mxu1 %v2475_v62  ;;  %v2842_v62 = vld [vmem:[%s7359_s5 + $0x100] sm:$0xff] }
 0x309   :  { %2780 = vmatpush2.msra.mxu1 %v2474_v1  ;;  %v2500_v1 = vld [vmem:[%s7360_s4] sm:$0xf] }
 0x30a   :  { %2781 = vmatprep.subr.mxu1 %v2471_v2 }
 0x30b   :  { %2782 = vmatpush2.msra.mxu1 %v2470_v5  ;;  %v2505_v5 = vrot.slane %v2500_v1, %v1062_v18  ;;  %v2517_v18 = vrot.slane %v2500_v1, %v1074_v16 }
 0x30c   :  { %2783 = vmatprep.subr.mxu1 %v2467_v6  ;;  %v2509_v6 = vrot.slane %v2500_v1, %v1066_v35 }
 0x30d   :  { %2784 = vmatpush2.msra.mxu1 %v2466_v10 }
 0x30e   :  { %2785 = vmatprep.subr.mxu1 %v2463_v12 }
 0x30f   :  { %2786 = vmatpush2.msra.mxu1 %v2462_v53 }
 0x310   :  { %2787 = vmatprep.subr.mxu1 %v2459_v56 }
 0x311   :  { %2788 = vmatpush2.msra.mxu1 %v2458_v4 }
 0x312   :  { %2789 = vmatprep.subr.mxu1 %v2455_v13 }
 0x313   :  { %2790 = vmatpush2.msra.mxu1 %v2454_v14  ;;  %v2588_v2 = vpop.f32.mrf.mxu0 }
 0x314   :  { %2791 = vmatprep.subr.mxu1 %v2451_v32  ;;  %v2589_v12 = vadd.f32 %v2588_v2, %v2505_v5 }
 0x315   :  { %2792 = vmatpush2.msra.mxu1 %v2450_v48  ;;  %v2590_v10 = vpop.f32.mrf.mxu0 }
 0x316   :  { %2793 = vmatprep.subr.mxu1 %v2447_v19  ;;  %v2591_v56 = vadd.f32 %v2590_v10, %v2509_v6 }
 0x317   :  { %2794 = vmatpush2.msra.mxu1 %v2446_v21  ;;  %v2513_v21 = vrot.slane %v2500_v1, %v1070_v15  ;;  %v3026_v15 = vld [vmem:[%s7361_s6] ss:$0 sm:$0xff] }
 0x318   :  { %2795 = vmatprep.subr.mxu1 %v2443_v50 }
 0x319   :  { %2796 = vmatpush2.msra.mxu1 %v2442_v24 }
 0x31a   :  { %2797 = vmatprep.subr.mxu1 %v2439_v0 }
 0x31b   :  { %2798 = vmatpush2.msra.mxu1 %v2438_v22 }
 0x31c   :  { %2800 = vmatmul.mubr.f32.vlgmr.msra.gmra.mxu1 %v2242_v11  ;;  %v2827_v11 = vld [vmem:[%s7359_s5 + $0x88] sm:$0xff]  ;;  %3062 = vmatprep.subr.mxu1 %v2873_v3 }
 0x31d   :  { %3055 = vmatprep.subr.mxu0 %v2827_v11  ;;  %3063 = vmatpush3.msra.mxu1 %v2857_v28 }
 0x31e   :  { %3056 = vmatpush3.msra.mxu0 %v2811_v37  ;;  %3064 = vmatprep.subr.mxu1 %v2872_v63 }
 0x31f   :  { %3057 = vmatprep.subr.mxu0 %v2826_v20  ;;  %3065 = vmatpush3.msra.mxu1 %v2856_v23 }
 0x320   :  { %3058 = vmatpush3.msra.mxu0 %v2810_v27  ;;  %3066 = vmatprep.subr.mxu1 %v2871_v29 }
 0x321   :  { %3067 = vmatpush3.msra.mxu1 %v2855_v30 }
 0x322   :  { %3068 = vmatprep.subr.mxu1 %v2870_v31 }
 0x323   :  { %3069 = vmatpush3.msra.mxu1 %v2854_v33 }
 0x324   :  { %3070 = vmatprep.subr.mxu1 %v2869_v34 }
 0x325   :  { %3071 = vmatpush3.msra.mxu1 %v2853_v36 }
 0x326   :  { %3072 = vmatprep.subr.mxu1 %v2868_v38 }
 0x327   :  { %3073 = vmatpush3.msra.mxu1 %v2852_v39 }
 0x328   :  { %3074 = vmatprep.subr.mxu1 %v2867_v9 }
 0x329   :  { %3075 = vmatpush3.msra.mxu1 %v2851_v40 }
 0x32a   :  { %3076 = vmatprep.subr.mxu1 %v2866_v41 }
 0x32b   :  { %3077 = vmatpush3.msra.mxu1 %v2850_v43 }
 0x32c   :  { %3078 = vmatprep.subr.mxu1 %v2865_v44 }
 0x32d   :  { %3079 = vmatpush3.msra.mxu1 %v2849_v45 }
 0x32e   :  { %3080 = vmatprep.subr.mxu1 %v2864_v49 }
 0x32f   :  { %3081 = vmatpush3.msra.mxu1 %v2848_v17 }
 0x330   :  { %3082 = vmatprep.subr.mxu1 %v2863_v51 }
 0x331   :  { %3083 = vmatpush3.msra.mxu1 %v2847_v52 }
 0x332   :  { %3084 = vmatprep.subr.mxu1 %v2862_v54 }
 0x333   :  { %3085 = vmatpush3.msra.mxu1 %v2846_v8 }
 0x334   :  { %3086 = vmatprep.subr.mxu1 %v2861_v55 }
 0x335   :  { %3087 = vmatpush3.msra.mxu1 %v2845_v57 }
 0x336   :  { %3088 = vmatprep.subr.mxu1 %v2860_v42 }
 0x337   :  { %3089 = vmatpush3.msra.mxu1 %v2844_v58 }
 0x338   :  { %3090 = vmatprep.subr.mxu1 %v2859_v47 }
 0x339   :  { %3091 = vmatpush3.msra.mxu1 %v2843_v61 }
 0x33a   :  { %3092 = vmatprep.subr.mxu1 %v2858_v60 }
 0x33b   :  { %3093 = vmatpush3.msra.mxu1 %v2842_v62 }
 0x353   :  { %v2730_v19 = vpop.f32.mrf.mxu0 }
 0x354   :  { %v2731_v35 = vadd.f32 %v2730_v19, %v2513_v21 }
 0x355   :  { %v2732_v50 = vpop.f32.mrf.mxu0 }
 0x356   :  { %v2733_v0 = vadd.f32 %v2732_v50, %v2517_v18 }
 0x39c   :  { %v2659_v53 = vpop.f32.mrf.mxu1 }
 0x39d   :  { %v2660_v4 = vadd.f32 %v2659_v53, %v2589_v12 }
 0x39e   :  { %v2661_v13 = vpop.f32.mrf.mxu1 }
 0x39f   :  { %v2662_v14 = vadd.f32 %v2661_v13, %v2591_v56  ;;  %v2806_v48 = vmax.f32 %v2660_v4, 0.0 }
 0x3a1   :  { %v2807_v32 = vmax.f32 %v2662_v14, 0.0 }
 0x3a3   :  { %2945 = vmatprep.mubr.f32.mxu0 %v2807_v32 }
 0x3a4   :  { %2946 = vmatmul.mubr.f32.vlgmr.msra.gmra.mxu0 %v2806_v48 }
 0x3dc   :  { %v2801_v24 = vpop.f32.mrf.mxu1 }
 0x3dd   :  { %v2802_v22 = vadd.f32 %v2801_v24, %v2731_v35 }
 0x3de   :  { %v2803_v59 = vpop.f32.mrf.mxu1 }
 0x3df   :  { %v2804_v25 = vadd.f32 %v2803_v59, %v2733_v0  ;;  %v2808_v46 = vmax.f32 %v2802_v22, 0.0 }
 0x3e1   :  { %v2809_v26 = vmax.f32 %v2804_v25, 0.0 }
 0x3e3   :  { %3015 = vmatprep.mubr.f32.mxu1 %v2809_v26 }
 0x3e4   :  { %3016 = vmatmul.mubr.f32.vlgmr.msra.gmra.mxu1 %v2808_v46 }
 0x464   :  { %v3059_v11 = vpop.f32.mrf.mxu0 }
 0x466   :  { %v3060_v37 = vpop.f32.mrf.mxu0 }
 0x467   :  { %v3061_v20 = vadd.f32 %v3060_v37, %v3059_v11 }
 0x469   :  { %v2948_v27 = vadd.f32 %v3061_v20, %v3026_v15 }
 0x4a4   :  { %v3094_v7 = vpop.f32.mrf.mxu1 }
 0x4a6   :  { %v3095_v16 = vpop.f32.mrf.mxu1 }
 0x4a7   :  { %v3096_v3 = vadd.f32 %v3095_v16, %v3094_v7 }
 0x4a9   :  { %v3018_v28 = vadd.f32 %v3096_v3, %v2948_v27 }
 0x4ab   :  { %3021 = vst [vmem:[%s7362_s7] sm:$0xf] %v3018_v28 }

</bundles_post_ra>
